<compile_context>
chip_gen: v7x
topology: tpu7x:2x2x1
jax: 0.10.0
libtpu: 0.0.40
codegen_flags: <defaults>
</compile_context>

<pallas_src>
import functools

import numpy as np
import jax
import jax.numpy as jnp
from jax.experimental import pallas as pl
from jax.experimental.pallas import tpu as pltpu

FEAT = 16      # feature channels used throughout the network
PAD_H = 1      # spatial halo above/below (H is not a layout dim -> offset free)
PAD_W = 8      # left/right pad on W: 8 keeps the interior store sublane-aligned


def _round_up(x, m):
    return (x + m - 1) // m * m


# ------------------------------ Pallas kernel --------------------------------

def _fused_stage_kernel(x_ref, w_ref, b_ref, o_ref, *, H, W):
    """One full network stage for one batch element, resident in VMEM.

    x_ref : [1, H+2, W+2*PAD_W, CIN]  bf16 padded activation slab (zero halo)
    w_ref : [9, CIN, COUT]            bf16 merged tap weights of all ops of the
                                      stage (band-block 3D conv, 1x1 CPR folded
                                      into the centre tap, SP conv), zero
                                      outside each op's channel block.
    b_ref : [1, COUT]                 f32 merged bias
    o_ref : [1, H+2, W+2*PAD_W, COUT] bf16 output slab written in padded form
                                      (directly consumable by the next stage).
    """
    hw = H * W
    cin = x_ref.shape[-1]
    cout = o_ref.shape[-1]

    # In-kernel im2col: 9 shifted window reads -> 9 MXU dots, f32 accumulate.
    acc = jnp.zeros((hw, cout), jnp.float32)
    for kh in range(3):
        for kw in range(3):
            tap = x_ref[0, kh:kh + H, PAD_W - 1 + kw:PAD_W - 1 + kw + W, :]
            acc = acc + jnp.dot(tap.reshape(hw, cin), w_ref[kh * 3 + kw],
                                preferred_element_type=jnp.float32)

    # f32 epilogue (v5e has no bf16 VALU); bf16 store halves write traffic.
    acc = jnp.maximum(acc + b_ref[...], 0.0)

    # Zero halo first, then store the interior at a sublane-aligned offset.
    o_ref[...] = jnp.zeros(o_ref.shape, o_ref.dtype)
    o_ref[0, PAD_H:PAD_H + H, PAD_W:PAD_W + W, :] = (
        acc.reshape(H, W, cout).astype(o_ref.dtype))


def fused_conv_stage(slab, w_taps, bias, *, H, W):
    """One Pallas call per stage.  Grid over batch, 'parallel' for megacore."""
    B, Hb, Wb, CIN = slab.shape
    COUT = w_taps.shape[-1]
    flops = 2 * B * H * W * 9 * CIN * COUT
    bytes_accessed = (slab.size * slab.dtype.itemsize
                      + w_taps.size * w_taps.dtype.itemsize
                      + bias.size * bias.dtype.itemsize
                      + B * Hb * Wb * COUT * 2)
    return pl.pallas_call(
        functools.partial(_fused_stage_kernel, H=H, W=W),
        out_shape=jax.ShapeDtypeStruct((B, Hb, Wb, COUT), jnp.bfloat16),
        grid_spec=pltpu.PrefetchScalarGridSpec(
            num_scalar_prefetch=0,
            grid=(B,),
            in_specs=[
                pl.BlockSpec((1, Hb, Wb, CIN), lambda b: (b, 0, 0, 0)),
                pl.BlockSpec((9, CIN, COUT), lambda b: (0, 0, 0)),   # resident
                pl.BlockSpec((1, COUT), lambda b: (0, 0)),           # resident
            ],
            out_specs=pl.BlockSpec((1, Hb, Wb, COUT), lambda b: (b, 0, 0, 0)),
        ),
        compiler_params=pltpu.CompilerParams(
            dimension_semantics=("parallel",),
            vmem_limit_bytes=32 * 1024 * 1024,   # ~1 MiB actually used
        ),
        cost_estimate=pl.CostEstimate(flops=flops, transcendentals=0,
                                      bytes_accessed=bytes_accessed),
    )(slab, w_taps, bias)


# --------------------------- spectral preprocessing ---------------------------

def center_pixel(x):
    """Normalize every pixel's spectrum by the patch-center spectrum."""
    B, C, H, W = x.shape
    cp = x[:, :, H // 2, W // 2]
    return x / (cp[:, :, None, None] + 1e-5)


def compute_ratio_withstep(x):
    """Band-ratio maps with steps 1,2,3 averaged over bands -> [B,3,H,W]."""
    chans = []
    for step in (1, 2, 3):
        r = x[:, step:, :, :] / (x[:, :-step, :, :] + 1e-5)
        chans.append(jnp.mean(r, axis=1))
    return jnp.stack(chans, axis=1)


# -------------------------------- parameters ----------------------------------

def init_params(key, in_channel, out_channel):
    """Logical (unpacked) parameters mirroring the PyTorch module structure."""
    keys = iter(jax.random.split(key, 40))

    def xavier(shape, fan_in, fan_out):
        std = (2.0 / (fan_in + fan_out)) ** 0.5
        return jax.random.normal(next(keys), shape, jnp.float32) * std

    zeros = lambda n: jnp.zeros((n,), jnp.float32)

    def conv3d_w(cin, cout):       # [kd, kh, kw, cin, cout]
        return xavier((3, 3, 3, cin, cout), 27 * cin, 27 * cout), zeros(cout)

    def conv2d_w(cin, cout):       # [kh, kw, cin, cout]
        return xavier((3, 3, cin, cout), 9 * cin, 9 * cout), zeros(cout)

    def cvt_w(depth, cin, cout):   # spectral compression over D*cin channels
        return xavier((depth * cin, cout), depth * cin, cout), zeros(cout)

    def lin_w(cin, cout):          # 1x1 sideout conv == linear on GAP features
        return xavier((cin, cout), cin, cout), zeros(cout)

    P = {}
    P['l1_3d'] = conv3d_w(1, FEAT)
    P['l2_3d'] = conv3d_w(FEAT, FEAT)
    P['l3_3d'] = conv3d_w(FEAT, FEAT)
    P['l4_2d'] = conv2d_w(FEAT, FEAT)
    P['l5_2d'] = conv2d_w(FEAT, FEAT)
    for i in (1, 2, 3):
        P[f'cpr{i}'] = cvt_w(in_channel, FEAT, FEAT)
    P['sp1'] = conv2d_w(3, FEAT)
    for i in range(2, 6):
        P[f'sp{i}'] = conv2d_w(FEAT, FEAT)
    for i in range(1, 6):
        P[f'so_sa{i}'] = lin_w(FEAT, out_channel)
        P[f'so_sp{i}'] = lin_w(FEAT, out_channel)
    P['fuse_para'] = jnp.ones((15,), jnp.float32)   # only [:10] used in forward
    return P


def pack_params(params, in_channel, out_channel):
    """One-time packing into padded bf16 tap-weight slabs (done in numpy,
    OUTSIDE jit, so traced-parameter training would not re-pad every step)."""
    D = in_channel
    slab = _round_up(max(D * FEAT + 2 * FEAT, D + 3, 2 * FEAT), 128)
    d16 = D * FEAT
    off_a, off_b = d16, d16 + FEAT          # the two 16-wide side ranges

    def blank():
        return [np.zeros((9, slab, slab), np.float32),
                np.zeros((slab,), np.float32)]

    def add_conv2d(wb, w, b, in_off, out_off):
        w = np.asarray(w, np.float32); b = np.asarray(b, np.float32)
        ci, co = w.shape[2], w.shape[3]
        for kh in range(3):
            for kw in range(3):
                wb[0][kh * 3 + kw, in_off:in_off + ci,
                      out_off:out_off + co] += w[kh, kw]
        wb[1][out_off:out_off + co] += b

    def add_conv1x1(wb, w, b, in_off, out_off):
        w = np.asarray(w, np.float32); b = np.asarray(b, np.float32)
        ci, co = w.shape
        wb[0][4, in_off:in_off + ci, out_off:out_off + co] += w    # centre tap
        wb[1][out_off:out_off + co] += b

    def add_conv3d_bandblock(wb, w3, b, in_off, out_off):
        # Exact reformulation of a 'same' 3x3x3 Conv3d over (band,H,W) as a 2D
        # conv over band-major packed channels (block-tridiagonal weight).
        w3 = np.asarray(w3, np.float32); b = np.asarray(b, np.float32)
        ci, co = w3.shape[3], w3.shape[4]
        for kh in range(3):
            for kw in range(3):
                for do in range(D):
                    for kd in range(3):
                        di = do + kd - 1
                        if 0 <= di < D:
                            wb[0][kh * 3 + kw,
                                  in_off + di * ci:in_off + (di + 1) * ci,
                                  out_off + do * co:out_off + (do + 1) * co] \
                                += w3[kd, kh, kw]
        for do in range(D):
            wb[1][out_off + do * co:out_off + (do + 1) * co] += b

    stages = []
    # call 1: SA1 = l1_3D(x_3d)                    SP1 = SP_conv_1(SP_CT)
    wb = blank()
    add_conv3d_bandblock(wb, *params['l1_3d'], in_off=0, out_off=0)
    add_conv2d(wb, *params['sp1'], in_off=D, out_off=off_a)
    stages.append(wb)
    # call 2: SA2 = l2_3D(SA1)  SA1_2D = CPR1(SA1) SP2 = SP_conv_2(SP1)
    wb = blank()
    add_conv3d_bandblock(wb, *params['l2_3d'], in_off=0, out_off=0)
    add_conv1x1(wb, *params['cpr1'], in_off=0, out_off=off_a)
    add_conv2d(wb, *params['sp2'], in_off=off_a, out_off=off_b)
    stages.append(wb)
    # call 3: SA3 = l3_3D(SA2)  SA2_2D = CPR2(SA2) SP3 = SP_conv_3(SP2)
    wb = blank()
    add_conv3d_bandblock(wb, *params['l3_3d'], in_off=0, out_off=0)
    add_conv1x1(wb, *params['cpr2'], in_off=0, out_off=off_a)
    add_conv2d(wb, *params['sp3'], in_off=off_b, out_off=off_b)
    stages.append(wb)
    # call 4: SA3_2D = CPR3(SA3)                   SP4 = SP_conv_4(SP3)
    wb = blank()
    add_conv1x1(wb, *params['cpr3'], in_off=0, out_off=0)
    add_conv2d(wb, *params['sp4'], in_off=off_b, out_off=FEAT)
    stages.append(wb)
    # call 5: SA4_2D = l4_2D(SA3_2D)               SP5 = SP_conv_5(SP4)
    wb = blank()
    add_conv2d(wb, *params['l4_2d'], in_off=0, out_off=0)
    add_conv2d(wb, *params['sp5'], in_off=FEAT, out_off=FEAT)
    stages.append(wb)
    # call 6: SA5_2D = l5_2D(SA4_2D)
    wb = blank()
    add_conv2d(wb, *params['l5_2d'], in_off=0, out_off=0)
    stages.append(wb)

    packed_stages = [(jnp.asarray(w, jnp.bfloat16),
                      jnp.asarray(b, jnp.float32).reshape(1, slab))
                     for (w, b) in stages]

    so_names = ([f'so_sa{i}' for i in range(1, 6)]
                + [f'so_sp{i}' for i in range(1, 6)])
    so_w = jnp.stack([params[n][0] for n in so_names]).astype(jnp.float32)
    so_b = jnp.stack([params[n][1] for n in so_names]).astype(jnp.float32)

    return {'stages': packed_stages, 'so_w': so_w, 'so_b': so_b,
            'fuse': params['fuse_para'].astype(jnp.float32),
            'slab': slab, 'off_a': off_a, 'off_b': off_b}


# ---------------------------------- forward -----------------------------------

def sisp_2branch_forward(packed, x):
    B, C, H, W = x.shape
    slab = packed['slab']
    off_a, off_b = packed['off_a'], packed['off_b']

    # Spectral preprocessing (XLA; tiny, raw input only, done once).
    sp_ct = compute_ratio_withstep(center_pixel(x))           # [B, 3, H, W]
    x_cl = jnp.transpose(x, (0, 2, 3, 1))                      # [B, H, W, C]
    sp_cl = jnp.transpose(sp_ct, (0, 2, 3, 1))                 # [B, H, W, 3]
    slab0 = jnp.concatenate([x_cl, sp_cl], axis=-1).astype(jnp.bfloat16)
    slab0 = jnp.pad(slab0, ((0, 0), (PAD_H, PAD_H), (PAD_W, PAD_W),
                            (0, slab - (C + 3))))

    # 6 fused Pallas stages; activations chain in padded-slab form.
    slabs = [slab0]
    for w_t, b_t in packed['stages']:
        slabs.append(fused_conv_stage(slabs[-1], w_t, b_t, H=H, W=W))

    # Sideouts (1x1 conv + GAP == GAP + linear) and learned fusion: plain XLA.
    # TODO(synk): the reconstructed sideout2d has no ReLU/BN between the 1x1
    # conv and the pooling; if the real module has one, split this fusion.
    def gap(s, c0):
        v = s[:, PAD_H:PAD_H + H, PAD_W:PAD_W + W, c0:c0 + FEAT]
        return v.astype(jnp.float32).mean(axis=(1, 2))

    feats = [
        gap(slabs[2], off_a),   # SA1_2D
        gap(slabs[3], off_a),   # SA2_2D
        gap(slabs[4], 0),       # SA3_2D
        gap(slabs[5], 0),       # SA4_2D
        gap(slabs[6], 0),       # SA5_2D
        gap(slabs[1], off_a),   # SP1
        gap(slabs[2], off_b),   # SP2
        gap(slabs[3], off_b),   # SP3
        gap(slabs[4], FEAT),    # SP4
        gap(slabs[5], FEAT),    # SP5
    ]
    pooled = jnp.stack(feats, axis=1)                          # [B, 10, FEAT]
    sideouts = jnp.einsum('bnc,nco->bno', pooled, packed['so_w']) + packed['so_b']
    total = jnp.sum(packed['fuse'][:10][None, :, None] * sideouts, axis=1)
    return [total] + [sideouts[:, i] for i in range(10)]


# ------------------------------------ main -------------------------------------

if __name__ == "__main__":
    key = jax.random.PRNGKey(0)
    kx, kp = jax.random.split(key)

    B, C, H, W = 2, 4, 16, 16          # batch, spectral bands, spatial
    out_channel = 8                    # number of classes

    x = jax.random.uniform(kx, (B, C, H, W), jnp.float32, 0.1, 1.0)
    params = init_params(kp, C, out_channel)
    packed = pack_params(params, in_channel=C, out_channel=out_channel)

    fwd = jax.jit(functools.partial(sisp_2branch_forward, packed))
    outs = jax.block_until_ready(fwd(x))

    assert len(outs) == 11
    assert all(o.shape == (B, out_channel) for o in outs)
    assert all(bool(jnp.all(jnp.isfinite(o))) for o in outs)
    print("KERNEL_OK")
</pallas_src>

<mosaic_0001>
module attributes {stable_mosaic.version = 11 : i64} {
  func.func @_fused_stage_kernel(%arg0: i32, %arg1: memref<1x18x32x128xbf16, #tpu.memory_space<vmem>>, %arg2: memref<9x128x128xbf16, #tpu.memory_space<vmem>>, %arg3: memref<1x128xf32, #tpu.memory_space<vmem>>, %arg4: memref<1x18x32x128xbf16, #tpu.memory_space<vmem>>) attributes {dimension_semantics = [#tpu.dimension_semantics<parallel>], iteration_bounds = array<i64: 2>, scalar_prefetch = 0 : i64, scratch_operands = 0 : i64, tpu.core_type = #tpu.core_type<tc>, window_params = [{transform_indices = @transform_0, window_bounds = array<i64: 1, 18, 32, 128>}, {pipeline_mode = #tpu.pipeline_mode<synchronous>, transform_indices = @transform_1, window_bounds = array<i64: 9, 128, 128>}, {pipeline_mode = #tpu.pipeline_mode<synchronous>, transform_indices = @transform_2, window_bounds = array<i64: 1, 128>}, {transform_indices = @transform_3, window_bounds = array<i64: 1, 18, 32, 128>}]} {
    %cst = arith.constant 0.000000e+00 : f32
    %0 = vector.broadcast %cst : f32 to vector<256x128xf32>
    %c0 = arith.constant 0 : index
    %c0_0 = arith.constant 0 : index
    %c7 = arith.constant 7 : index
    %c0_1 = arith.constant 0 : index
    %1 = vector.load %arg1[%c0, %c0_0, %c7, %c0_1] : memref<1x18x32x128xbf16, #tpu.memory_space<vmem>>, vector<1x16x16x128xbf16>
    %2 = vector.shape_cast %1 : vector<1x16x16x128xbf16> to vector<16x16x128xbf16>
    %3 = vector.shape_cast %2 : vector<16x16x128xbf16> to vector<256x128xbf16>
    %c0_2 = arith.constant 0 : index
    %c0_3 = arith.constant 0 : index
    %c0_4 = arith.constant 0 : index
    %4 = vector.load %arg2[%c0_2, %c0_3, %c0_4] : memref<9x128x128xbf16, #tpu.memory_space<vmem>>, vector<1x128x128xbf16>
    %5 = vector.shape_cast %4 : vector<1x128x128xbf16> to vector<128x128xbf16>
    %cst_5 = arith.constant dense<0.000000e+00> : vector<256x128xf32>
    %6 = tpu.matmul %3, %5, %cst_5 {dimension_numbers = #tpu.dot_dimension_numbers<[1], [0], [0], [1], [0, 0, 1, 1], [], []>} : vector<256x128xbf16>, vector<128x128xbf16>, vector<256x128xf32> -> vector<256x128xf32>
    %7 = arith.addf %0, %6 : vector<256x128xf32>
    %c0_6 = arith.constant 0 : index
    %c0_7 = arith.constant 0 : index
    %c8 = arith.constant 8 : index
    %c0_8 = arith.constant 0 : index
    %8 = vector.load %arg1[%c0_6, %c0_7, %c8, %c0_8] : memref<1x18x32x128xbf16, #tpu.memory_space<vmem>>, vector<1x16x16x128xbf16>
    %9 = vector.shape_cast %8 : vector<1x16x16x128xbf16> to vector<16x16x128xbf16>
    %10 = vector.shape_cast %9 : vector<16x16x128xbf16> to vector<256x128xbf16>
    %c1 = arith.constant 1 : index
    %c0_9 = arith.constant 0 : index
    %c0_10 = arith.constant 0 : index
    %11 = vector.load %arg2[%c1, %c0_9, %c0_10] : memref<9x128x128xbf16, #tpu.memory_space<vmem>>, vector<1x128x128xbf16>
    %12 = vector.shape_cast %11 : vector<1x128x128xbf16> to vector<128x128xbf16>
    %cst_11 = arith.constant dense<0.000000e+00> : vector<256x128xf32>
    %13 = tpu.matmul %10, %12, %cst_11 {dimension_numbers = #tpu.dot_dimension_numbers<[1], [0], [0], [1], [0, 0, 1, 1], [], []>} : vector<256x128xbf16>, vector<128x128xbf16>, vector<256x128xf32> -> vector<256x128xf32>
    %14 = arith.addf %7, %13 : vector<256x128xf32>
    %c0_12 = arith.constant 0 : index
    %c0_13 = arith.constant 0 : index
    %c9 = arith.constant 9 : index
    %c0_14 = arith.constant 0 : index
    %15 = vector.load %arg1[%c0_12, %c0_13, %c9, %c0_14] : memref<1x18x32x128xbf16, #tpu.memory_space<vmem>>, vector<1x16x16x128xbf16>
    %16 = vector.shape_cast %15 : vector<1x16x16x128xbf16> to vector<16x16x128xbf16>
    %17 = vector.shape_cast %16 : vector<16x16x128xbf16> to vector<256x128xbf16>
    %c2 = arith.constant 2 : index
    %c0_15 = arith.constant 0 : index
    %c0_16 = arith.constant 0 : index
    %18 = vector.load %arg2[%c2, %c0_15, %c0_16] : memref<9x128x128xbf16, #tpu.memory_space<vmem>>, vector<1x128x128xbf16>
    %19 = vector.shape_cast %18 : vector<1x128x128xbf16> to vector<128x128xbf16>
    %cst_17 = arith.constant dense<0.000000e+00> : vector<256x128xf32>
    %20 = tpu.matmul %17, %19, %cst_17 {dimension_numbers = #tpu.dot_dimension_numbers<[1], [0], [0], [1], [0, 0, 1, 1], [], []>} : vector<256x128xbf16>, vector<128x128xbf16>, vector<256x128xf32> -> vector<256x128xf32>
    %21 = arith.addf %14, %20 : vector<256x128xf32>
    %c0_18 = arith.constant 0 : index
    %c1_19 = arith.constant 1 : index
    %c7_20 = arith.constant 7 : index
    %c0_21 = arith.constant 0 : index
    %22 = vector.load %arg1[%c0_18, %c1_19, %c7_20, %c0_21] : memref<1x18x32x128xbf16, #tpu.memory_space<vmem>>, vector<1x16x16x128xbf16>
    %23 = vector.shape_cast %22 : vector<1x16x16x128xbf16> to vector<16x16x128xbf16>
    %24 = vector.shape_cast %23 : vector<16x16x128xbf16> to vector<256x128xbf16>
    %c3 = arith.constant 3 : index
    %c0_22 = arith.constant 0 : index
    %c0_23 = arith.constant 0 : index
    %25 = vector.load %arg2[%c3, %c0_22, %c0_23] : memref<9x128x128xbf16, #tpu.memory_space<vmem>>, vector<1x128x128xbf16>
    %26 = vector.shape_cast %25 : vector<1x128x128xbf16> to vector<128x128xbf16>
    %cst_24 = arith.constant dense<0.000000e+00> : vector<256x128xf32>
    %27 = tpu.matmul %24, %26, %cst_24 {dimension_numbers = #tpu.dot_dimension_numbers<[1], [0], [0], [1], [0, 0, 1, 1], [], []>} : vector<256x128xbf16>, vector<128x128xbf16>, vector<256x128xf32> -> vector<256x128xf32>
    %28 = arith.addf %21, %27 : vector<256x128xf32>
    %c0_25 = arith.constant 0 : index
    %c1_26 = arith.constant 1 : index
    %c8_27 = arith.constant 8 : index
    %c0_28 = arith.constant 0 : index
    %29 = vector.load %arg1[%c0_25, %c1_26, %c8_27, %c0_28] : memref<1x18x32x128xbf16, #tpu.memory_space<vmem>>, vector<1x16x16x128xbf16>
    %30 = vector.shape_cast %29 : vector<1x16x16x128xbf16> to vector<16x16x128xbf16>
    %31 = vector.shape_cast %30 : vector<16x16x128xbf16> to vector<256x128xbf16>
    %c4 = arith.constant 4 : index
    %c0_29 = arith.constant 0 : index
    %c0_30 = arith.constant 0 : index
    %32 = vector.load %arg2[%c4, %c0_29, %c0_30] : memref<9x128x128xbf16, #tpu.memory_space<vmem>>, vector<1x128x128xbf16>
    %33 = vector.shape_cast %32 : vector<1x128x128xbf16> to vector<128x128xbf16>
    %cst_31 = arith.constant dense<0.000000e+00> : vector<256x128xf32>
    %34 = tpu.matmul %31, %33, %cst_31 {dimension_numbers = #tpu.dot_dimension_numbers<[1], [0], [0], [1], [0, 0, 1, 1], [], []>} : vector<256x128xbf16>, vector<128x128xbf16>, vector<256x128xf32> -> vector<256x128xf32>
    %35 = arith.addf %28, %34 : vector<256x128xf32>
    %c0_32 = arith.constant 0 : index
    %c1_33 = arith.constant 1 : index
    %c9_34 = arith.constant 9 : index
    %c0_35 = arith.constant 0 : index
    %36 = vector.load %arg1[%c0_32, %c1_33, %c9_34, %c0_35] : memref<1x18x32x128xbf16, #tpu.memory_space<vmem>>, vector<1x16x16x128xbf16>
    %37 = vector.shape_cast %36 : vector<1x16x16x128xbf16> to vector<16x16x128xbf16>
    %38 = vector.shape_cast %37 : vector<16x16x128xbf16> to vector<256x128xbf16>
    %c5 = arith.constant 5 : index
    %c0_36 = arith.constant 0 : index
    %c0_37 = arith.constant 0 : index
    %39 = vector.load %arg2[%c5, %c0_36, %c0_37] : memref<9x128x128xbf16, #tpu.memory_space<vmem>>, vector<1x128x128xbf16>
    %40 = vector.shape_cast %39 : vector<1x128x128xbf16> to vector<128x128xbf16>
    %cst_38 = arith.constant dense<0.000000e+00> : vector<256x128xf32>
    %41 = tpu.matmul %38, %40, %cst_38 {dimension_numbers = #tpu.dot_dimension_numbers<[1], [0], [0], [1], [0, 0, 1, 1], [], []>} : vector<256x128xbf16>, vector<128x128xbf16>, vector<256x128xf32> -> vector<256x128xf32>
    %42 = arith.addf %35, %41 : vector<256x128xf32>
    %c0_39 = arith.constant 0 : index
    %c2_40 = arith.constant 2 : index
    %c7_41 = arith.constant 7 : index
    %c0_42 = arith.constant 0 : index
    %43 = vector.load %arg1[%c0_39, %c2_40, %c7_41, %c0_42] : memref<1x18x32x128xbf16, #tpu.memory_space<vmem>>, vector<1x16x16x128xbf16>
    %44 = vector.shape_cast %43 : vector<1x16x16x128xbf16> to vector<16x16x128xbf16>
    %45 = vector.shape_cast %44 : vector<16x16x128xbf16> to vector<256x128xbf16>
    %c6 = arith.constant 6 : index
    %c0_43 = arith.constant 0 : index
    %c0_44 = arith.constant 0 : index
    %46 = vector.load %arg2[%c6, %c0_43, %c0_44] : memref<9x128x128xbf16, #tpu.memory_space<vmem>>, vector<1x128x128xbf16>
    %47 = vector.shape_cast %46 : vector<1x128x128xbf16> to vector<128x128xbf16>
    %cst_45 = arith.constant dense<0.000000e+00> : vector<256x128xf32>
    %48 = tpu.matmul %45, %47, %cst_45 {dimension_numbers = #tpu.dot_dimension_numbers<[1], [0], [0], [1], [0, 0, 1, 1], [], []>} : vector<256x128xbf16>, vector<128x128xbf16>, vector<256x128xf32> -> vector<256x128xf32>
    %49 = arith.addf %42, %48 : vector<256x128xf32>
    %c0_46 = arith.constant 0 : index
    %c2_47 = arith.constant 2 : index
    %c8_48 = arith.constant 8 : index
    %c0_49 = arith.constant 0 : index
    %50 = vector.load %arg1[%c0_46, %c2_47, %c8_48, %c0_49] : memref<1x18x32x128xbf16, #tpu.memory_space<vmem>>, vector<1x16x16x128xbf16>
    %51 = vector.shape_cast %50 : vector<1x16x16x128xbf16> to vector<16x16x128xbf16>
    %52 = vector.shape_cast %51 : vector<16x16x128xbf16> to vector<256x128xbf16>
    %c7_50 = arith.constant 7 : index
    %c0_51 = arith.constant 0 : index
    %c0_52 = arith.constant 0 : index
    %53 = vector.load %arg2[%c7_50, %c0_51, %c0_52] : memref<9x128x128xbf16, #tpu.memory_space<vmem>>, vector<1x128x128xbf16>
    %54 = vector.shape_cast %53 : vector<1x128x128xbf16> to vector<128x128xbf16>
    %cst_53 = arith.constant dense<0.000000e+00> : vector<256x128xf32>
    %55 = tpu.matmul %52, %54, %cst_53 {dimension_numbers = #tpu.dot_dimension_numbers<[1], [0], [0], [1], [0, 0, 1, 1], [], []>} : vector<256x128xbf16>, vector<128x128xbf16>, vector<256x128xf32> -> vector<256x128xf32>
    %56 = arith.addf %49, %55 : vector<256x128xf32>
    %c0_54 = arith.constant 0 : index
    %c2_55 = arith.constant 2 : index
    %c9_56 = arith.constant 9 : index
    %c0_57 = arith.constant 0 : index
    %57 = vector.load %arg1[%c0_54, %c2_55, %c9_56, %c0_57] : memref<1x18x32x128xbf16, #tpu.memory_space<vmem>>, vector<1x16x16x128xbf16>
    %58 = vector.shape_cast %57 : vector<1x16x16x128xbf16> to vector<16x16x128xbf16>
    %59 = vector.shape_cast %58 : vector<16x16x128xbf16> to vector<256x128xbf16>
    %c8_58 = arith.constant 8 : index
    %c0_59 = arith.constant 0 : index
    %c0_60 = arith.constant 0 : index
    %60 = vector.load %arg2[%c8_58, %c0_59, %c0_60] : memref<9x128x128xbf16, #tpu.memory_space<vmem>>, vector<1x128x128xbf16>
    %61 = vector.shape_cast %60 : vector<1x128x128xbf16> to vector<128x128xbf16>
    %cst_61 = arith.constant dense<0.000000e+00> : vector<256x128xf32>
    %62 = tpu.matmul %59, %61, %cst_61 {dimension_numbers = #tpu.dot_dimension_numbers<[1], [0], [0], [1], [0, 0, 1, 1], [], []>} : vector<256x128xbf16>, vector<128x128xbf16>, vector<256x128xf32> -> vector<256x128xf32>
    %63 = arith.addf %56, %62 : vector<256x128xf32>
    %c0_62 = arith.constant 0 : index
    %c0_63 = arith.constant 0 : index
    %64 = vector.load %arg3[%c0_62, %c0_63] : memref<1x128xf32, #tpu.memory_space<vmem>>, vector<1x128xf32>
    %65 = vector.broadcast %64 : vector<1x128xf32> to vector<256x128xf32>
    %66 = arith.addf %63, %65 : vector<256x128xf32>
    %cst_64 = arith.constant 0.000000e+00 : f32
    %67 = vector.broadcast %cst_64 : f32 to vector<256x128xf32>
    %68 = arith.maximumf %66, %67 : vector<256x128xf32>
    %cst_65 = arith.constant 0.000000e+00 : bf16
    %69 = vector.broadcast %cst_65 : bf16 to vector<1x18x32x128xbf16>
    %c0_66 = arith.constant 0 : index
    %c0_67 = arith.constant 0 : index
    %c0_68 = arith.constant 0 : index
    %c0_69 = arith.constant 0 : index
    %70 = vector.load %arg4[%c0_66, %c0_67, %c0_68, %c0_69] : memref<1x18x32x128xbf16, #tpu.memory_space<vmem>>, vector<1x18x32x128xbf16>
    tpu.vector_store %arg4[%c0_66, %c0_67, %c0_68, %c0_69], %69 {strides = array<i32>} : memref<1x18x32x128xbf16, #tpu.memory_space<vmem>>, vector<1x18x32x128xbf16>,
    %71 = vector.shape_cast %68 : vector<256x128xf32> to vector<16x16x128xf32>
    %72 = arith.truncf %71 : vector<16x16x128xf32> to vector<16x16x128xbf16>
    %c0_70 = arith.constant 0 : index
    %c1_71 = arith.constant 1 : index
    %c8_72 = arith.constant 8 : index
    %c0_73 = arith.constant 0 : index
    %73 = vector.load %arg4[%c0_70, %c1_71, %c8_72, %c0_73] : memref<1x18x32x128xbf16, #tpu.memory_space<vmem>>, vector<1x16x16x128xbf16>
    %74 = vector.shape_cast %73 : vector<1x16x16x128xbf16> to vector<16x16x128xbf16>
    %75 = vector.shape_cast %72 : vector<16x16x128xbf16> to vector<1x16x16x128xbf16>
    tpu.vector_store %arg4[%c0_70, %c1_71, %c8_72, %c0_73], %75 {strides = array<i32>} : memref<1x18x32x128xbf16, #tpu.memory_space<vmem>>, vector<1x16x16x128xbf16>,
    return
  }
  func.func @transform_0(%arg0: i32) -> (i32, i32, i32, i32) {
    %c0_i32 = arith.constant 0 : i32
    %c0_i32_0 = arith.constant 0 : i32
    %c0_i32_1 = arith.constant 0 : i32
    %c0_i32_2 = arith.constant 0 : i32
    return %arg0, %c0_i32, %c0_i32_0, %c0_i32_1 : i32, i32, i32, i32
  }
  func.func @transform_1(%arg0: i32) -> (i32, i32, i32) {
    %c0_i32 = arith.constant 0 : i32
    %c0_i32_0 = arith.constant 0 : i32
    %c0_i32_1 = arith.constant 0 : i32
    %c0_i32_2 = arith.constant 0 : i32
    return %c0_i32, %c0_i32_0, %c0_i32_1 : i32, i32, i32
  }
  func.func @transform_2(%arg0: i32) -> (i32, i32) {
    %c0_i32 = arith.constant 0 : i32
    %c0_i32_0 = arith.constant 0 : i32
    %c0_i32_1 = arith.constant 0 : i32
    return %c0_i32, %c0_i32_0 : i32, i32
  }
  func.func @transform_3(%arg0: i32) -> (i32, i32, i32, i32) {
    %c0_i32 = arith.constant 0 : i32
    %c0_i32_0 = arith.constant 0 : i32
    %c0_i32_1 = arith.constant 0 : i32
    %c0_i32_2 = arith.constant 0 : i32
    return %arg0, %c0_i32, %c0_i32_0, %c0_i32_1 : i32, i32, i32, i32
  }
}

</mosaic_0001>

<bundles_post_ra>
// kernel: sisp_2branch_forward.6
= control target key start
LH: loop header
LB: loop body
LE: loop exit
PB: predicated region body
PF: predicated region fallthrough
CT: control target
= control target key end

     0   :  { %s7761_s12 = smov 0   ;;  %s9707_s0 = inlined_call_operand.vmem [shape: bf16[2,18,32,128], index: 0, kind: input, shape index: {}]   ;;  %s9708_s1 = inlined_call_operand.vmem [shape: bf16[9,128,128], index: 1, kind: input, shape index: {}]   ;;  %s9709_s2 = inlined_call_operand.vmem [shape: f32[1,128], index: 2, kind: input, shape index: {}]   ;;  %s9710_s3 = inlined_call_operand.vmem [shape: bf16[2,18,32,128], index: 3, kind: output, shape index: {}]  }
   0x1 LB: > { %s5964_s13 = sadd.s32 4294967295, %s7738_s12   ;;  %p5968_p0 = scmp.ge.s32.totalorder %s7738_s12, 1  ;;  %s7738_s12 = sphi %s7761_s12, %s13_s12  }
   0x2   : > { %p137_p1 = scmp.lt.s32.totalorder %s7738_s12, 3 }
   0x4   : > { %p138_p2 = pnand %p5968_p0, %p137_p1 }
   0x6   : > { %141 = sbr.rel (%p138_p2) target bundleno = 652 (0x28c), region = 32 }
   0xd   : > { %v7584_v0 = vld [vmem:[%s9708_s1 + $0x40] sm:$0xff]   ;;  %p161_p3 = scmp.lt.s32.totalorder %s5964_s13, 1  ;;  %v7586_v2 = vld [vmem:[%s9708_s1 + $0x48] sm:$0xff]   ;;  %v7588_v4 = vld [vmem:[%s9708_s1 + $0x50] sm:$0xff]   ;;  %vm1234_vm0 = vsmask.f32 3328 }
   0xe   : > { %v7585_v1 = vld [vmem:[%s9708_s1 + $0x100] sm:$0xff]   ;;  %6870 = vmatprep.subr.bf16.mxu1 %v7584_v0  ;;  %v7587_v3 = vld [vmem:[%s9708_s1 + $0x108] sm:$0xff]   ;;  %v7589_v5 = vld [vmem:[%s9708_s1 + $0x110] sm:$0xff]   ;;  %vm1235_vm1 = vsmask.f32 7440 }
   0xf   : > { %7062 = vmatprep.subr.bf16.mxu0 %v7585_v1  ;;  %6871 = vmatpush3.bf16.msra.mxu1 %v7584_v0  ;;  %s9888_s13 = smov (!%p161_p3, %s5964_s13), 1  ;;  %v7590_v6 = vld [vmem:[%s9708_s1 + $0x58] sm:$0xff]   ;;  %v7592_v8 = vld [vmem:[%s9708_s1 + $0x60] sm:$0xff]   ;;  %v7594_v10 = vld [vmem:[%s9708_s1 + $0x68] sm:$0xff]   ;;  %vm220_vm3 = vsmask.f32 256 }
  0x10   : > { %7063 = vmatpush3.bf16.msra.mxu0 %v7585_v1  ;;  %6872 = vmatprep.subr.bf16.mxu1 %v7586_v2  ;;  %v7591_v7 = vld [vmem:[%s9708_s1 + $0x118] sm:$0xff]   ;;  %s7574_s30 = smul.u32 288, %s9888_s13  ;;  %v7593_v9 = vld [vmem:[%s9708_s1 + $0x120] sm:$0xff]   ;;  %v7595_v14 = vld [vmem:[%s9708_s1 + $0x128] sm:$0xff]   ;;  %vm221_vm4 = vsmask.f32 4368 }
  0x11   : > { %7064 = vmatprep.subr.bf16.mxu0 %v7587_v3  ;;  %v7596_v22 = vld [vmem:[%s9708_s1 + $0x70] sm:$0xff]   ;;  %v7598_v30 = vld [vmem:[%s9708_s1 + $0x78] sm:$0xff]   ;;  %v7603_v55 = vld [vmem:[%s9708_s1] sm:$0xff]  }
  0x12   : > { %s7807_s10 = scalar_lea.vmem %s9707_s0, %s7574_s30  ;;  %v7597_v23 = vld [vmem:[%s9708_s1 + $0x130] sm:$0xff]   ;;  %v7599_v33 = vld [vmem:[%s9708_s1 + $0x138] sm:$0xff]   ;;  %v7605_v58 = vld [vmem:[%s9708_s1 + $0x140] sm:$0xff]   ;;  %s9474_s16 = scalar_lea.vmem %s9710_s3, %s7574_s30 }
  0x13   : > { %6873 = vmatpush3.bf16.msra.mxu1 %v7586_v2  ;;  %v7813_v11 = vld [vmem:[%s7807_s10 + $0x4] sm:$0xf]  ;;  %v7816_v12 = vld [vmem:[%s7807_s10 + $0x8] sm:$0xf]  ;;  %v7819_v13 = vld [vmem:[%s7807_s10 + $0x14] sm:$0xf] }
  0x14   : > { %7065 = vmatpush3.bf16.msra.mxu0 %v7587_v3  ;;  %6874 = vmatprep.subr.bf16.mxu1 %v7588_v4  ;;  %v229_v15 = vshrl.u32 %v7813_v11, 16  ;;  %v7826_v16 = vld [vmem:[%s7807_s10 + $0x18] sm:$0xf]  ;;  %v6003_v17 = vcombine.low %v7813_v11, %v7816_v12  ;;  %v238_v18 = vshrl.u32 %v7816_v12, 16  ;;  %v1998_v19 = vshrl.u32 %v7819_v13, 16  ;;  %vm8264_vm2 = vmor %vm1234_vm0, %vm1235_vm1 }
  0x15   : > { %7066 = vmatprep.subr.bf16.mxu0 %v7589_v5  ;;  %v6211_v20 = vcombine.low %v7819_v13, %v7826_v16  ;;  %v7835_v21 = vld [vmem:[%s7807_s10 + $0x14] sm:$0xf]  ;;  %v232_v24 = vshll.u32 %v7813_v11, 16  ;;  %v241_v27 = vshll.u32 %v7816_v12, 16  ;;  %v2001_v28 = vshll.u32 %v7819_v13, 16  ;;  %v7624_v60 = vld [vmem:[%s9708_s1 + $0x18] sm:$0xff]   ;;  %vm8447_vm5 = vmor %vm220_vm3, %vm221_vm4 }
  0x16   : > { %v251_v25 = vshrl.u32 %v7835_v21, 16  ;;  %v7845_v26 = vrot.slane %v229_v15, 7  ;;  %6886 = vmatprep.mubr.bf16.mxu1 %v6003_v17  ;;  %v2007_v29 = vshrl.u32 %v7826_v16, 16  ;;  %v7854_v31 = vld [vmem:[%s7807_s10 + $0x18] sm:$0xf]  ;;  %v7862_v34 = vrot.slane %v238_v18, 7 }
  0x17   : > { %6875 = vmatpush3.bf16.msra.mxu1 %v7588_v4  ;;  %7078 = vmatprep.mubr.bf16.mxu0 %v6211_v20  ;;  %v7857_v32 = vld [vmem:[%s7807_s10 + $0x24] sm:$0xf]  ;;  %v7864_v35 = vrot.slane %v1998_v19, 7  ;;  %v260_v36 = vshrl.u32 %v7854_v31, 16  ;;  %v2010_v38 = vshll.u32 %v7826_v16, 16  ;;  %v254_v46 = vshll.u32 %v7835_v21, 16 }
  0x18   : > { %7067 = vmatpush3.bf16.msra.mxu0 %v7589_v5  ;;  %6876 = vmatprep.subr.bf16.mxu1 %v7590_v6  ;;  %v2020_v37 = vshrl.u32 %v7857_v32, 16  ;;  %v7869_v39 = vrot.slane %v251_v25, 7  ;;  %v7872_v40 = vld [vmem:[%s7807_s10 + $0x28] sm:$0xf]  ;;  %v7878_v43 = vld [vmem:[%s7807_s10 + $0x24] sm:$0xf]  ;;  %v6004_v1 = vcombine.low %v7835_v21, %v7854_v31 }
  0x19   : > { %7068 = vmatprep.subr.bf16.mxu0 %v7591_v7  ;;  %9746 = vst [vmem:[#allocation2_spill] sm:$0xff] %v7864_v35  ;;  %v2029_v42 = vshrl.u32 %v7872_v40, 16  ;;  %v2009_v45 = vrot.slane %v2007_v29, 7  ;;  %v7883_v47 = vld [vmem:[%s7807_s10 + $0x28] sm:$0xf]  ;;  %v273_v48 = vshrl.u32 %v7878_v43, 16  ;;  %v6212_v5 = vcombine.low %v7857_v32, %v7872_v40 }
  0x1a   : > { %v7874_v41 = vrot.slane %v2020_v37, 7  ;;  %v7887_v50 = vrot.slane %v260_v36, 7  ;;  %v263_v51 = vshll.u32 %v7854_v31, 16  ;;  %v282_v52 = vshrl.u32 %v7883_v47, 16  ;;  %v7892_v53 = vld [vmem:[%s7807_s10 + $0x34] sm:$0xf] }
  0x1b   : > { %6877 = vmatpush3.bf16.msra.mxu1 %v7590_v6  ;;  %9748 = vst [vmem:[#allocation4_spill] sm:$0xff] %v7892_v53  ;;  %v2023_v56 = vshll.u32 %v7857_v32, 16  ;;  %v2032_v57 = vshll.u32 %v7872_v40, 16  ;;  %v2042_v59 = vshrl.u32 %v7892_v53, 16  ;;  %v7905_v61 = vrot.slane %v2029_v42, 7  ;;  %v7606_v6 = vld [vmem:[%s9708_s1 + $0x148] sm:$0xff]  }
  0x1c   : > { %7069 = vmatpush3.bf16.msra.mxu0 %v7591_v7  ;;  %6878 = vmatprep.subr.bf16.mxu1 %v7592_v8  ;;  %9747 = vst [vmem:[#allocation3_spill] sm:$0xff] %v7874_v41  ;;  %v276_v62 = vshll.u32 %v7878_v43, 16  ;;  %v285_v63 = vshll.u32 %v7883_v47, 16  ;;  %v7910_v0 = vld [vmem:[%s7807_s10 + $0x38] sm:$0xf]  ;;  %v7914_v2 = vrot.slane %v273_v48, 7  ;;  %v7972_v11 = vor.u32 %v2001_v28, %v7864_v35 }
  0x1d   : > { %7070 = vmatprep.subr.bf16.mxu0 %v7593_v9  ;;  %9749 = vst [vmem:[#allocation5_spill] sm:$0xff] %v7910_v0  ;;  %v2051_v3 = vshrl.u32 %v7910_v0, 16  ;;  %v7918_v4 = vld [vmem:[%s7807_s10 + $0x34] sm:$0xf]  ;;  %v7925_v7 = vrot.slane %v282_v52, 7  ;;  %v7610_v19 = vld [vmem:[%s9708_s1 + $0x8] sm:$0xff]   ;;  %v7976_v12 = vor.u32 %v2010_v38, %v2009_v45  ;;  %v7998_v52 = vor.u32 %v254_v46, %v7869_v39 }
  0x1e   : > { %v7942_v20 = vld [vmem:[%s7807_s10 + $0x44] sm:$0xf]  ;;  %v7948_v25 = vld [vmem:[%s7807_s10 + $0x48] sm:$0xf]  ;;  %v7967_v42 = vld [vmem:[%s9708_s1 + $0x10] sm:$0xff]   ;;  %9754 = vst [vmem:[#allocation10_spill] sm:$0xff] %v7972_v11  ;;  %v8049_v17 = vor.u32 %v2023_v56, %v7874_v41 }
  0x1f   : > { %6879 = vmatpush3.bf16.msra.mxu1 %v7592_v8  ;;  %v6005_v8 = vcombine.low %v7878_v43, %v7883_v47  ;;  %9751 = vst [vmem:[#allocation7_spill] sm:$0xff] %v7942_v20  ;;  %9752 = vst [vmem:[#allocation8_spill] sm:$0xff] %v7948_v25  ;;  %v2064_v29 = vshrl.u32 %v7942_v20, 16  ;;  %v7961_v36 = vrot.slane %v2051_v3, 7  ;;  %v2073_v37 = vshrl.u32 %v7948_v25, 16  ;;  %v7634_v31 = vld [vmem:[%s9708_s1 + $0x28] sm:$0xff]  }
  0x20   : > { %7071 = vmatpush3.bf16.msra.mxu0 %v7593_v9  ;;  %6880 = vmatprep.subr.bf16.mxu1 %v7594_v10  ;;  %v7930_v9 = vld [vmem:[%s7807_s10 + $0x38] sm:$0xf]  ;;  %9755 = vst [vmem:[#allocation11_spill] sm:$0xff] %v7976_v12  ;;  %v7985_v48 = vld [vmem:[%s7807_s10 + $0x44] sm:$0xf]  ;;  %9760 = vst [vmem:[#allocation16_spill] sm:$0xff] %v8049_v17 }
  0x21   : > { %7072 = vmatprep.subr.bf16.mxu0 %v7595_v14  ;;  %v304_v18 = vshrl.u32 %v7930_v9, 16  ;;  %9753 = vst [vmem:[#allocation9_spill] sm:$0xff] %v7961_v36  ;;  %v7992_v38 = vld [vmem:[%s7807_s10 + $0x48] sm:$0xf]  ;;  %v317_v45 = vshrl.u32 %v7985_v48, 16 }
  0x22   : > { %v8009_v3 = vld [vmem:[%s7807_s10 + $0x58] sm:$0xf]  ;;  %v8027_v28 = vld [vmem:[%s7807_s10 + $0x54] sm:$0xf]  ;;  %v8055_v44 = vld [vmem:[%s7807_s10 + $0x64] sm:$0xf] }
  0x23   : > { %6881 = vmatpush3.bf16.msra.mxu1 %v7594_v10  ;;  %v295_v10 = vshrl.u32 %v7918_v4, 16  ;;  %v7987_v13 = vrot.slane %v304_v18, 7  ;;  %9758 = vst [vmem:[#allocation14_spill] sm:$0xff] %v8009_v3  ;;  %v7613_v18 = vld [vmem:[%s9708_s1 + $0x158] sm:$0xff]   ;;  %9761 = vst [vmem:[#allocation17_spill] sm:$0xff] %v8055_v44  ;;  %v2108_v32 = vshrl.u32 %v8055_v44, 16 }
  0x24   : > { %7073 = vmatpush3.bf16.msra.mxu0 %v7595_v14  ;;  %6882 = vmatprep.subr.bf16.mxu1 %v7596_v22  ;;  %v7933_v14 = vrot.slane %v2042_v59, 7  ;;  %v326_v59 = vshrl.u32 %v7992_v38, 16  ;;  %v8030_v16 = vld [vmem:[%s7807_s10 + $0x58] sm:$0xf]  ;;  %v8104_v47 = vld [vmem:[%s7807_s10 + $0x68] sm:$0xf] }
  0x25   : > { %7074 = vmatprep.subr.bf16.mxu0 %v7597_v23  ;;  %v348_v15 = vshrl.u32 %v8030_v16, 16  ;;  %v6008_v43 = vcombine.low %v8027_v28, %v8030_v16  ;;  %v8141_v56 = vld [vmem:[%s7807_s10 + $0x74] sm:$0xf] }
  0x26   : > { %9750 = vst [vmem:[#allocation6_spill] sm:$0xff] %v7933_v14  ;;  %v8051_v49 = vrot.slane %v326_v59, 7  ;;  %v7619_v59 = vld [vmem:[%s9708_s1 + $0x160] sm:$0xff]  }
  0x27   : > { %6883 = vmatpush3.bf16.msra.mxu1 %v7596_v22  ;;  %v6213_v22 = vcombine.low %v7892_v53, %v7910_v0 }
  0x28   : > { %7075 = vmatpush3.bf16.msra.mxu0 %v7597_v23  ;;  %6884 = vmatprep.subr.bf16.mxu1 %v7598_v30  ;;  %v298_v23 = vshll.u32 %v7918_v4, 16 }
  0x29   : > { %7076 = vmatprep.subr.bf16.mxu0 %v7599_v33 }
  0x2b   : > { %6885 = vmatpush3.bf16.msra.mxu1 %v7598_v30  ;;  %v7954_v30 = vor.u32 %v232_v24, %v7845_v26  ;;  %v7978_v24 = vrot.slane %v295_v10, 7  ;;  %v6214_v10 = vcombine.low %v7942_v20, %v7948_v25  ;;  %v8235_v25 = vld [vmem:[%s7807_s10 + $0x98] sm:$0xf] }
  0x2c   : > { %7077 = vmatpush3.bf16.msra.mxu0 %v7599_v33  ;;  %6918 = vmatprep.subr.bf16.mxu1 %v7603_v55  ;;  %v7959_v33 = vor.u32 %v241_v27, %v7862_v34  ;;  %v307_v27 = vshll.u32 %v7930_v9, 16  ;;  %v7612_v34 = vld [vmem:[%s9708_s1 + $0x150] sm:$0xff]  }
  0x2d   : > { %7110 = vmatprep.subr.bf16.mxu0 %v7605_v58 }
  0x2e   : > { %6887 = vmatmul.mubr.bf16.vlgmr.msra.gmra.mrb[0].mxu1 %v6004_v1  ;;  %v8006_v1 = vld [vmem:[%s7807_s10 + $0x54] sm:$0xf] }
  0x2f   : > { %7079 = vmatmul.mubr.bf16.vlgmr.msra.gmra.mrb[0].mxu0 %v6212_v5  ;;  %6919 = vmatpush3.bf16.msra.mxu1 %v7603_v55  ;;  %v6006_v55 = vcombine.low %v7918_v4, %v7930_v9  ;;  %9757 = vst [vmem:[#allocation13_spill] sm:$0xff] %v8006_v1  ;;  %v8011_v5 = vrot.slane %v2073_v37, 7  ;;  %v2086_v46 = vshrl.u32 %v8006_v1, 16  ;;  %v6007_v37 = vcombine.low %v7985_v48, %v7992_v38 }
  0x30   : > { %7111 = vmatpush3.bf16.msra.mxu0 %v7605_v58  ;;  %6890 = vmatprep.mubr.bf16.mxu1 %v6005_v8  ;;  %v8002_v58 = vrot.slane %v2064_v29, 7  ;;  %v2095_v8 = vshrl.u32 %v8009_v3, 16  ;;  %v8111_v4 = vrot.slane %v2108_v32, 7 }
  0x31   : > { %7112 = vmatprep.subr.bf16.mxu0 %v7606_v6  ;;  %7082 = vmatprep.mubr.bf16.mxu0 %v6213_v22  ;;  %9759 = vst [vmem:[#allocation15_spill] sm:$0xff] %v8011_v5  ;;  %v8021_v22 = vrot.slane %v317_v45, 7  ;;  %v339_v45 = vshrl.u32 %v8027_v28, 16  ;;  %v8057_v29 = vrot.slane %v2086_v46, 7  ;;  %v8079_v46 = vor.u32 %v276_v62, %v7914_v2 }
  0x32   : > { %9756 = vst [vmem:[#allocation12_spill] sm:$0xff] %v8002_v58  ;;  %6920 = vmatprep.subr.bf16.mxu1 %v7610_v19  ;;  %v8059_v21 = vrot.slane %v2095_v8, 7  ;;  %v8093_v8 = vor.u32 %v298_v23, %v7978_v24  ;;  %9766 = vst [vmem:[#allocation22_spill] sm:$0xff] %v8111_v4  ;;  %v9770_v62 = vshll.u32 %v7985_v48, 16  ;;  %v7626_v48 = vld [vmem:[%s9708_s1 + $0x170] sm:$0xff]  }
  0x33   : > { %6921 = vmatpush3.bf16.msra.mxu1 %v7610_v19  ;;  %v6215_v19 = vcombine.low %v8006_v1, %v8009_v3  ;;  %9762 = vst [vmem:[#allocation18_spill] sm:$0xff] %v8057_v29  ;;  %v8081_v40 = vrot.slane %v339_v45, 7  ;;  %v8132_v45 = vld [vmem:[%s7807_s10 + $0x78] sm:$0xf]  ;;  %v8232_v1 = vld [vmem:[%s7807_s10 + $0x94] sm:$0xf] }
  0x34   : > { %7113 = vmatpush3.bf16.msra.mxu0 %v7606_v6  ;;  %6922 = vmatprep.subr.bf16.mxu1 %v7967_v42  ;;  %v8044_v6 = vor.u32 %v263_v51, %v7887_v50  ;;  %9763 = vst [vmem:[#allocation19_spill] sm:$0xff] %v8059_v21  ;;  %v8063_v50 = vld [vmem:[%s7807_s10 + $0x68] sm:$0xf]  ;;  %v8069_v51 = vor.u32 %v2032_v57, %v7905_v61  ;;  %v8083_v57 = vrot.slane %v348_v15, 7  ;;  %v8101_v15 = vld [vmem:[%s7807_s10 + $0x64] sm:$0xf] }
  0x35   : > { %7114 = vmatprep.subr.bf16.mxu0 %v7612_v34  ;;  %9764 = vst [vmem:[#allocation20_spill] sm:$0xff] %v8063_v50  ;;  %v8088_v61 = vor.u32 %v285_v63, %v7925_v7  ;;  %v8109_v63 = vor.u32 %v307_v27, %v7987_v13  ;;  %v6216_v7 = vcombine.low %v8055_v44, %v8063_v50  ;;  %v361_v23 = vshrl.u32 %v8101_v15, 16  ;;  %v7620_v27 = vld [vmem:[%s9708_s1 + $0x168] sm:$0xff]  }
  0x36   : > { %6891 = vmatmul.mubr.bf16.gmra.mrb[4].mxu1 %v6006_v55  ;;  %9765 = vst [vmem:[#allocation21_spill] sm:$0xff] %v8069_v51  ;;  %v2117_v55 = vshrl.u32 %v8063_v50, 16  ;;  %v364_v13 = vshll.u32 %v8101_v15, 16  ;;  %9769 = vst [vmem:[#allocation25_spill] sm:$0xff] %v8132_v45  ;;  %v2139_v54 = vshrl.u32 %v8132_v45, 16  ;;  %v8153_v50 = vor.u32 %v9770_v62, %v8021_v22 }
  0x37   : > { %7083 = vmatmul.mubr.bf16.gmra.mrb[4].mxu0 %v6214_v10  ;;  %6894 = vmatprep.mubr.bf16.mxu1 %v6007_v37  ;;  %v370_v10 = vshrl.u32 %v8104_v47, 16  ;;  %v7630_v37 = vld [vmem:[%s9708_s1 + $0x20] sm:$0xff]   ;;  %v8165_v21 = vld [vmem:[%s7807_s10 + $0x88] sm:$0xf] }
  0x38   : > { %7115 = vmatpush3.bf16.msra.mxu0 %v7612_v34  ;;  %7086 = vmatprep.mubr.bf16.mxu0 %v6215_v19  ;;  %v8123_v9 = vrot.slane %v2117_v55, 7  ;;  %v6009_v19 = vcombine.low %v8101_v15, %v8104_v47  ;;  %v8135_v34 = vrot.slane %v361_v23, 7  ;;  %v373_v55 = vshll.u32 %v8104_v47, 16  ;;  %v195_v23 = vld [vmem:[%s7807_s10 + $0x78] sm:$0xf]  ;;  %9774 = vst [vmem:[#allocation29_spill] sm:$0xff] %v8165_v21 }
  0x39   : > { %7116 = vmatprep.subr.bf16.mxu0 %v7613_v18  ;;  %6923 = vmatpush3.bf16.msra.mxu1 %v7967_v42  ;;  %v8118_v42 = vld [vmem:[%s7807_s10 + $0x74] sm:$0xf]  ;;  %v372_v15 = vrot.slane %v370_v10, 7  ;;  %v383_v47 = vshrl.u32 %v8141_v56, 16  ;;  %v386_v10 = vshll.u32 %v8141_v56, 16  ;;  %v392_v4 = vshrl.u32 %v195_v23, 16 }
  0x3a   : > { %9767 = vst [vmem:[#allocation23_spill] sm:$0xff] %v8118_v42  ;;  %6924 = vmatprep.subr.bf16.mxu1 %v7624_v60  ;;  %9768 = vst [vmem:[#allocation24_spill] sm:$0xff] %v8123_v9  ;;  %v2130_v32 = vshrl.u32 %v8118_v42, 16  ;;  %v395_v3 = vshll.u32 %v195_v23, 16 }
  0x3c   : > { %7117 = vmatpush3.bf16.msra.mxu0 %v7613_v18  ;;  %v6217_v18 = vcombine.low %v8118_v42, %v8132_v45  ;;  %v8155_v9 = vrot.slane %v2130_v32, 7  ;;  %v8159_v42 = vrot.slane %v2139_v54, 7  ;;  %v8180_v54 = vrot.slane %v383_v47, 7 }
  0x3d   : > { %7118 = vmatprep.subr.bf16.mxu0 %v7619_v59  ;;  %6925 = vmatpush3.bf16.msra.mxu1 %v7624_v60  ;;  %v8162_v60 = vld [vmem:[%s7807_s10 + $0x84] sm:$0xf]  ;;  %v394_v32 = vrot.slane %v392_v4, 7  ;;  %v2161_v45 = vshrl.u32 %v8165_v21, 16  ;;  %v9777_v4 = vshll.u32 %v8030_v16, 16 }
  0x3e   : > { %6895 = vmatmul.mubr.bf16.gmra.mrb[8].mxu1 %v6008_v43  ;;  %9771 = vst [vmem:[#allocation26_spill] sm:$0xff] %v8155_v9  ;;  %6926 = vmatprep.subr.bf16.mxu1 %v7630_v37  ;;  %9772 = vst [vmem:[#allocation27_spill] sm:$0xff] %v8159_v42  ;;  %v9775_v43 = vshll.u32 %v7992_v38, 16  ;;  %v2152_v44 = vshrl.u32 %v8162_v60, 16  ;;  %v8201_v42 = vor.u32 %v364_v13, %v8135_v34  ;;  %v8211_v16 = vld [vmem:[%s7807_s10 + $0x88] sm:$0xf] }
  0x3f   : > { %7087 = vmatmul.mubr.bf16.gmra.mrb[8].mxu0 %v6216_v7  ;;  %6898 = vmatprep.mubr.bf16.mxu1 %v6009_v19  ;;  %9773 = vst [vmem:[#allocation28_spill] sm:$0xff] %v8162_v60  ;;  %v9776_v7 = vshll.u32 %v8027_v28, 16  ;;  %v6010_v28 = vcombine.low %v8141_v56, %v195_v23  ;;  %v8203_v56 = vor.u32 %v373_v55, %v372_v15  ;;  %v414_v13 = vshrl.u32 %v8211_v16, 16  ;;  %v6235_v23 = vld [vmem:[%s7807_s10 + $0x14] sm:$0xf] }
  0x40   : > { %v8173_v62 = vor.u32 %v9775_v43, %v8051_v49  ;;  %7119 = vmatpush3.bf16.msra.mxu0 %v7619_v59  ;;  %7090 = vmatprep.mubr.bf16.mxu0 %v6217_v18  ;;  %v7638_v49 = vld [vmem:[%s9708_s1 + $0x30] sm:$0xff]   ;;  %v8193_v18 = vor.u32 %v9777_v4, %v8083_v57  ;;  %v8195_v47 = vrot.slane %v2152_v44, 7  ;;  %v8197_v43 = vrot.slane %v2161_v45, 7  ;;  %v7627_v44 = vld [vmem:[%s9708_s1 + $0x178] sm:$0xff]  }
  0x41   : > { %v8178_v19 = vor.u32 %v9776_v7, %v8081_v40  ;;  %7120 = vmatprep.subr.bf16.mxu0 %v7620_v27  ;;  %6927 = vmatpush3.bf16.msra.mxu1 %v7630_v37  ;;  %v197_v7 = vld [vmem:[%s7807_s10 + $0x84] sm:$0xf]  ;;  %v6218_v37 = vcombine.low %v8162_v60, %v8165_v21  ;;  %v7642_v4 = vld [vmem:[%s9708_s1 + $0x38] sm:$0xff]   ;;  %v8227_v55 = vor.u32 %v395_v3, %v394_v32  ;;  %v3072_v60 = vshll.u32 %v6235_v23, 16 }
  0x42   : > { %9778 = vst [vmem:[#allocation30_spill] sm:$0xff] %v8195_v47  ;;  %9779 = vst [vmem:[#allocation31_spill] sm:$0xff] %v8197_v43  ;;  %6928 = vmatprep.subr.bf16.mxu1 %v7634_v31  ;;  %v405_v57 = vshrl.u32 %v197_v7, 16  ;;  %v408_v45 = vshll.u32 %v197_v7, 16  ;;  %v6011_v15 = vcombine.low %v197_v7, %v8211_v16  ;;  %v6236_v38 = vld [vmem:[%s7807_s10 + $0x18] sm:$0xf]  ;;  %v8225_v43 = vor.u32 %v386_v10, %v8180_v54 }
  0x43   : > { %v6237_v21 = vld [vmem:[%s7807_s10 + $0x1c] sm:$0x1]  ;;  %v8229_v7 = vrot.slane %v414_v13, 7  ;;  %v3078_v47 = vshll.u32 %v6236_v38, 16  ;;  %v3082_v9 = vshrl.u32 %v6236_v38, 16  ;;  %v3074_v10 = vrot.slane %v3072_v60, 5 }
  0x44   : > { %7121 = vmatpush3.bf16.msra.mxu0 %v7620_v27  ;;  %v8220_v59 = vrot.slane %v405_v57, 7  ;;  %v3069_v27 = vshrl.u32 %v6235_v23, 16  ;;  %v3088_v29 = vshll.u32 %v6237_v21, 16  ;;  %v436_v38 = vshrl.u32 %v8235_v25, 16  ;;  %v6238_v23 = vld [vmem:[%s7807_s10 + $0x24] sm:$0xf] }
  0x45   : > { %7122 = vmatprep.subr.bf16.mxu0 %v7626_v48  ;;  %6929 = vmatpush3.bf16.msra.mxu1 %v7634_v31  ;;  %v427_v31 = vshrl.u32 %v8232_v1, 16  ;;  %v3080_v32 = vrot.slane %v3078_v47, 5  ;;  %v7740_v21 = vmov 0  }
  0x46   : > { %6899 = vmatmul.mubr.bf16.gmra.mrb[12].mxu1 %v6010_v28  ;;  %6930 = vmatprep.subr.bf16.mxu1 %v7638_v49  ;;  %v3071_v57 = vrot.slane %v3069_v27, 4  ;;  %v3084_v28 = vrot.slane %v3082_v9, 4  ;;  %v8250_v47 = vrot.slane %v436_v38, 7  ;;  %v6239_v27 = vld [vmem:[%s7807_s10 + $0x28] sm:$0xf]  ;;  %5676 = vst [vmem:[%s9474_s16] sm:$0xf] %v7740_v21 }
  0x47   : > { %7091 = vmatmul.mubr.bf16.gmra.mrb[12].mxu0 %v6218_v37  ;;  %6902 = vmatprep.mubr.bf16.mxu1 %v6011_v15  ;;  %v3090_v37 = vrot.slane %v3088_v29, 5  ;;  %v8240_v13 = vrot.slane %v427_v31, 7  ;;  %v6012_v15 = vcombine.low %v8232_v1, %v8235_v25  ;;  %v8257_v29 = vld [vmem:[%s9708_s1 + $0x80] sm:$0xff]   ;;  %v8260_v31 = vor.u32 %v408_v45, %v8220_v59  ;;  %5685 = vst [vmem:[%s9474_s16 + $0x24] sm:$0xf] %v7740_v21 }
  0x48   : > { %7123 = vmatpush3.bf16.msra.mxu0 %v7626_v48  ;;  %v8248_v48 = vld [vmem:[%s9708_s1 + $0x180] sm:$0xff]   ;;  %v3075_v60 = vor.u32 %v3074_v10, %v3071_v57  ;;  %v3085_v9 = vor.u32 %v3084_v28, %v3080_v32  ;;  %v3093_v57 = vshrl.u32 %v6238_v23, 16  ;;  %v3096_v10 = vshll.u32 %v6238_v23, 16  ;;  %5677 = vst [vmem:[%s9474_s16 + $0x4] sm:$0xf] %v7740_v21 }
  0x49   : > { %7124 = vmatprep.subr.bf16.mxu0 %v7627_v44  ;;  %6931 = vmatpush3.bf16.msra.mxu1 %v7638_v49  ;;  %v6240_v49 = vld [vmem:[%s7807_s10 + $0x2c] sm:$0x1]  ;;  %v3102_v28 = vshll.u32 %v6239_v27, 16  ;;  %v3106_v38 = vshrl.u32 %v6239_v27, 16  ;;  %v8279_v27 = vld [vmem:[%s7807_s10 + $0xa8] sm:$0xf] }
  0x4a   : > { %6932 = vmatprep.subr.bf16.mxu1 %v7642_v4  ;;  %v3076_v3 = vrot.slane %v3075_v60, 4  ;;  %v3086_v5 = vrot.slane %v3085_v9, 4  ;;  %v3112_v20 = vshll.u32 %v6240_v49, 16  ;;  %v3095_v58 = vrot.slane %v3093_v57, 4  ;;  %v8276_v9 = vld [vmem:[%s7807_s10 + $0xa4] sm:$0xf] }
  0x4b   : > { %v3098_v17 = vrot.slane %v3096_v10, 5  ;;  %v3104_v0 = vrot.slane %v3102_v28, 5  ;;  %v3108_v36 = vrot.slane %v3106_v38, 4  ;;  %v6242_v28 = vld [vmem:[%s7807_s10 + $0x38] sm:$0xf] }
  0x4c   : > { %7125 = vmatpush3.bf16.msra.mxu0 %v7627_v44  ;;  %v3081_v23 = vsel %vm8264_vm2, %v3076_v3, %v3080_v32  ;;  %v3091_v44 = vsel %vm8264_vm2, %v3086_v5, %v3090_v37  ;;  %v3114_v60 = vrot.slane %v3112_v20, 5  ;;  %v449_v3 = vshrl.u32 %v8276_v9, 16  ;;  %v6241_v32 = vld [vmem:[%s7807_s10 + $0x34] sm:$0xf]  ;;  %v6243_v38 = vld [vmem:[%s7807_s10 + $0x3c] sm:$0x1] }
  0x4d   : > { %7158 = vmatprep.subr.bf16.mxu0 %v8248_v48  ;;  %6933 = vmatpush3.bf16.msra.mxu1 %v7642_v4  ;;  %v6299_v57 = vcombine.low %v3081_v23, %v3091_v44  ;;  %v3099_v4 = vor.u32 %v3098_v17, %v3095_v58  ;;  %v3109_v10 = vor.u32 %v3108_v36, %v3104_v0  ;;  %v458_v20 = vshrl.u32 %v8279_v27, 16  ;;  %v8295_v58 = vld [vmem:[%s7807_s10 + $0xb4] sm:$0xf]  ;;  %v8300_v37 = vld [vmem:[%s7807_s10 + $0xb8] sm:$0xf] }
  0x4e   : > { %6903 = vmatmul.mubr.bf16.gmra.mrb[16].mxu1 %v6012_v15  ;;  %6966 = vmatprep.subr.bf16.mxu1 %v8257_v29  ;;  %v6013_v15 = vcombine.low %v8276_v9, %v8279_v27  ;;  %v8292_v17 = vrot.slane %v449_v3, 7  ;;  %v3117_v36 = vshrl.u32 %v6241_v32, 16  ;;  %9782 = vst [vmem:[#allocation32_spill] sm:$0xff] %v8295_v58  ;;  %v3120_v5 = vshll.u32 %v6241_v32, 16  ;;  %9783 = vst [vmem:[#allocation33_spill] sm:$0xff] %v8300_v37  ;;  %v7635_v32 = vld [vmem:[%s9708_s1 + $0x188] sm:$0xff]  }
  0x4f   : > { %7126 = vmatprep.mubr.bf16.mxu0 %v6299_v57  ;;  %v3100_v23 = vrot.slane %v3099_v4, 4  ;;  %v3110_v44 = vrot.slane %v3109_v10, 4  ;;  %v8297_v49 = vrot.slane %v458_v20, 7  ;;  %v3126_v45 = vshll.u32 %v6242_v28, 16  ;;  %5678 = vst [vmem:[%s9474_s16 + $0x8] sm:$0xf] %v7740_v21 }
  0x50   : > { %6906 = vmatprep.mubr.bf16.mxu1 %v6013_v15  ;;  %v3130_v53 = vshrl.u32 %v6242_v28, 16  ;;  %v3119_v10 = vrot.slane %v3117_v36, 4  ;;  %v3136_v3 = vshll.u32 %v6243_v38, 16  ;;  %v3122_v11 = vrot.slane %v3120_v5, 5  ;;  %v6244_v15 = vld [vmem:[%s7807_s10 + $0x44] sm:$0xf] }
  0x51   : > { %v3105_v57 = vsel %vm8264_vm2, %v3100_v23, %v3104_v0  ;;  %v3115_v4 = vsel %vm8264_vm2, %v3110_v44, %v3114_v60  ;;  %v3128_v20 = vrot.slane %v3126_v45, 5  ;;  %v471_v51 = vshrl.u32 %v8295_v58, 16  ;;  %v6245_v60 = vld [vmem:[%s7807_s10 + $0x48] sm:$0xf]  ;;  %v6246_v5 = vld [vmem:[%s7807_s10 + $0x4c] sm:$0x1] }
  0x52   : > { %v6300_v14 = vcombine.low %v3105_v57, %v3115_v4  ;;  %v3132_v41 = vrot.slane %v3130_v53, 4  ;;  %v3138_v28 = vrot.slane %v3136_v3, 5  ;;  %v480_v23 = vshrl.u32 %v8300_v37, 16  ;;  %v7639_v36 = vld [vmem:[%s9708_s1 + $0x190] sm:$0xff]   ;;  %v8327_v0 = vld [vmem:[%s7807_s10 + $0xc4] sm:$0xf] }
  0x53   : > { %v3123_v38 = vor.u32 %v3122_v11, %v3119_v10  ;;  %v6014_v53 = vcombine.low %v8295_v58, %v8300_v37  ;;  %v8322_v57 = vrot.slane %v471_v51, 7  ;;  %v3144_v11 = vshll.u32 %v6244_v15, 16  ;;  %9786 = vst [vmem:[#allocation36_spill] sm:$0xff] %v8327_v0  ;;  %5679 = vst [vmem:[%s9474_s16 + $0xc] sm:$0xf] %v7740_v21 }
  0x54   : > { %7127 = vmatmul.mubr.bf16.vlgmr.msra.gmra.mrb[0].mxu0 %v6300_v14  ;;  %v3133_v44 = vor.u32 %v3132_v41, %v3128_v20  ;;  %v8324_v4 = vrot.slane %v480_v23, 7  ;;  %v3141_v14 = vshrl.u32 %v6244_v15, 16  ;;  %v3150_v3 = vshll.u32 %v6245_v60, 16  ;;  %5680 = vst [vmem:[%s9474_s16 + $0x10] sm:$0xf] %v7740_v21 }
  0x55   : > { %7159 = vmatpush3.bf16.msra.mxu0 %v8248_v48  ;;  %9784 = vst [vmem:[#allocation34_spill] sm:$0xff] %v8322_v57  ;;  %v3124_v41 = vrot.slane %v3123_v38, 4  ;;  %v3154_v45 = vshrl.u32 %v6245_v60, 16  ;;  %v3146_v12 = vrot.slane %v3144_v11, 5  ;;  %v3160_v48 = vshll.u32 %v6246_v5, 16 }
  0x56   : > { %9785 = vst [vmem:[#allocation35_spill] sm:$0xff] %v8324_v4  ;;  %v3134_v10 = vrot.slane %v3133_v44, 4  ;;  %6907 = vmatmul.mubr.bf16.gmra.mrb[20].mxu1 %v6014_v53  ;;  %7160 = vmatprep.subr.bf16.mxu0 %v7635_v32  ;;  %v3143_v35 = vrot.slane %v3141_v14, 4  ;;  %v493_v51 = vshrl.u32 %v8327_v0, 16  ;;  %v3152_v38 = vrot.slane %v3150_v3, 5 }
  0x57   : > { %v3129_v23 = vsel %vm8264_vm2, %v3124_v41, %v3128_v20  ;;  %v3156_v44 = vrot.slane %v3154_v45, 4  ;;  %v8335_v53 = vld [vmem:[%s7807_s10 + $0xc8] sm:$0xf]  ;;  %v6247_v60 = vld [vmem:[%s7807_s10 + $0x54] sm:$0xf]  ;;  %v3162_v58 = vrot.slane %v3160_v48, 5 }
  0x58   : > { %v3139_v15 = vsel %vm8264_vm2, %v3134_v10, %v3138_v28  ;;  %9787 = vst [vmem:[#allocation37_spill] sm:$0xff] %v8335_v53  ;;  %v3147_v4 = vor.u32 %v3146_v12, %v3143_v35  ;;  %v8338_v5 = vrot.slane %v493_v51, 7  ;;  %v6248_v14 = vld [vmem:[%s7807_s10 + $0x58] sm:$0xf]  ;;  %v502_v41 = vshrl.u32 %v8335_v53, 16 }
  0x59   : > { %v6301_v37 = vcombine.low %v3129_v23, %v3139_v15  ;;  %7161 = vmatpush3.bf16.msra.mxu0 %v7635_v32  ;;  %v3157_v11 = vor.u32 %v3156_v44, %v3152_v38  ;;  %v6249_v45 = vld [vmem:[%s7807_s10 + $0x5c] sm:$0x1]  ;;  %v6015_v32 = vcombine.low %v8327_v0, %v8335_v53  ;;  %v3165_v10 = vshrl.u32 %v6247_v60, 16  ;;  %v8351_v48 = vld [vmem:[%s7807_s10 + $0xd4] sm:$0xf] }
  0x5a   : > { %9788 = vst [vmem:[#allocation38_spill] sm:$0xff] %v8338_v5  ;;  %7162 = vmatprep.subr.bf16.mxu0 %v7639_v36  ;;  %v7643_v35 = vld [vmem:[%s9708_s1 + $0x198] sm:$0xff]   ;;  %v3148_v12 = vrot.slane %v3147_v4, 4  ;;  %v3168_v3 = vshll.u32 %v6247_v60, 16  ;;  %9789 = vst [vmem:[#allocation39_spill] sm:$0xff] %v8351_v48  ;;  %v8353_v23 = vrot.slane %v502_v41, 7 }
  0x5b   : > { %7130 = vmatprep.mubr.bf16.mxu0 %v6301_v37  ;;  %v3158_v51 = vrot.slane %v3157_v11, 4  ;;  %v3174_v15 = vshll.u32 %v6248_v14, 16  ;;  %v3178_v44 = vshrl.u32 %v6248_v14, 16  ;;  %v8356_v28 = vld [vmem:[%s7807_s10 + $0xd8] sm:$0xf]  ;;  %6910 = vmatprep.mubr.bf16.mxu1 %v6015_v32  ;;  %v3167_v4 = vrot.slane %v3165_v10, 4 }
  0x5c   : > { %9790 = vst [vmem:[#allocation40_spill] sm:$0xff] %v8353_v23  ;;  %9791 = vst [vmem:[#allocation41_spill] sm:$0xff] %v8356_v28  ;;  %v3153_v37 = vsel %vm8264_vm2, %v3148_v12, %v3152_v38  ;;  %v3170_v20 = vrot.slane %v3168_v3, 5  ;;  %v3184_v53 = vshll.u32 %v6249_v45, 16  ;;  %v6250_v0 = vld [vmem:[%s7807_s10 + $0x64] sm:$0xf] }
  0x5d   : > { %7163 = vmatpush3.bf16.msra.mxu0 %v7639_v36  ;;  %v3163_v60 = vsel %vm8264_vm2, %v3158_v51, %v3162_v58  ;;  %v3176_v11 = vrot.slane %v3174_v15, 5  ;;  %v3180_v41 = vrot.slane %v3178_v44, 4  ;;  %v515_v23 = vshrl.u32 %v8351_v48, 16  ;;  %v6251_v14 = vld [vmem:[%s7807_s10 + $0x68] sm:$0xf]  ;;  %v7645_v38 = vld [vmem:[%s9708_s1 + $0x1a0] sm:$0xff]  }
  0x5e   : > { %7164 = vmatprep.subr.bf16.mxu0 %v7643_v35  ;;  %v6302_v12 = vcombine.low %v3153_v37, %v3163_v60  ;;  %v3171_v32 = vor.u32 %v3170_v20, %v3167_v4  ;;  %v3186_v10 = vrot.slane %v3184_v53, 5  ;;  %v6252_v36 = vld [vmem:[%s7807_s10 + $0x6c] sm:$0x1]  ;;  %v524_v58 = vshrl.u32 %v8356_v28, 16  ;;  %5681 = vst [vmem:[%s9474_s16 + $0x14] sm:$0xf] %v7740_v21 }
  0x5f   : > { %v3181_v3 = vor.u32 %v3180_v41, %v3176_v11  ;;  %v8370_v5 = vrot.slane %v515_v23, 7  ;;  %v6016_v44 = vcombine.low %v8351_v48, %v8356_v28  ;;  %v3189_v37 = vshrl.u32 %v6250_v0, 16  ;;  %v8379_v23 = vld [vmem:[%s7807_s10 + $0xe4] sm:$0xf]  ;;  %v8384_v28 = vld [vmem:[%s7807_s10 + $0xe8] sm:$0xf] }
  0x60   : > { %7131 = vmatmul.mubr.bf16.gmra.mrb[4].mxu0 %v6302_v12  ;;  %v3172_v15 = vrot.slane %v3171_v32, 4  ;;  %v3192_v20 = vshll.u32 %v6250_v0, 16  ;;  %v8376_v4 = vrot.slane %v524_v58, 7  ;;  %v3198_v60 = vshll.u32 %v6251_v14, 16  ;;  %9794 = vst [vmem:[#allocation44_spill] sm:$0xff] %v8379_v23  ;;  %9795 = vst [vmem:[#allocation45_spill] sm:$0xff] %v8384_v28 }
  0x61   : > { %9792 = vst [vmem:[#allocation42_spill] sm:$0xff] %v8370_v5  ;;  %v3182_v53 = vrot.slane %v3181_v3, 4  ;;  %v3202_v41 = vshrl.u32 %v6251_v14, 16  ;;  %7165 = vmatpush3.bf16.msra.mxu0 %v7643_v35  ;;  %6911 = vmatmul.mubr.bf16.gmra.mrb[24].mxu1 %v6016_v44  ;;  %v3191_v12 = vrot.slane %v3189_v37, 4  ;;  %v3208_v45 = vshll.u32 %v6252_v36, 16  ;;  %v7647_v0 = vld [vmem:[%s9708_s1 + $0x1a8] sm:$0xff]  }
  0x62   : > { %9793 = vst [vmem:[#allocation43_spill] sm:$0xff] %v8376_v4  ;;  %v3177_v51 = vsel %vm8264_vm2, %v3172_v15, %v3176_v11  ;;  %v3194_v32 = vrot.slane %v3192_v20, 5  ;;  %7166 = vmatprep.subr.bf16.mxu0 %v7645_v38  ;;  %v3200_v35 = vrot.slane %v3198_v60, 5  ;;  %v537_v11 = vshrl.u32 %v8379_v23, 16  ;;  %v6253_v58 = vld [vmem:[%s7807_s10 + $0x74] sm:$0xf] }
  0x63   : > { %v3187_v14 = vsel %vm8264_vm2, %v3182_v53, %v3186_v10  ;;  %v3204_v3 = vrot.slane %v3202_v41, 4  ;;  %v3210_v36 = vrot.slane %v3208_v45, 5  ;;  %v6254_v20 = vld [vmem:[%s7807_s10 + $0x78] sm:$0xf]  ;;  %v546_v5 = vshrl.u32 %v8384_v28, 16 }
  0x64   : > { %v6303_v15 = vcombine.low %v3177_v51, %v3187_v14  ;;  %v3195_v44 = vor.u32 %v3194_v32, %v3191_v12  ;;  %v8395_v48 = vrot.slane %v537_v11, 7  ;;  %v6255_v53 = vld [vmem:[%s7807_s10 + $0x7c] sm:$0x1]  ;;  %v6017_v51 = vcombine.low %v8379_v23, %v8384_v28  ;;  %v8403_v12 = vld [vmem:[%s7807_s10 + $0xf4] sm:$0xf] }
  0x65   : > { %v3205_v4 = vor.u32 %v3204_v3, %v3200_v35  ;;  %7167 = vmatpush3.bf16.msra.mxu0 %v7645_v38  ;;  %v3213_v45 = vshrl.u32 %v6253_v58, 16  ;;  %v3216_v41 = vshll.u32 %v6253_v58, 16  ;;  %9797 = vst [vmem:[#allocation47_spill] sm:$0xff] %v8403_v12  ;;  %v7649_v32 = vld [vmem:[%s9708_s1 + $0x1b0] sm:$0xff]   ;;  %v8408_v3 = vrot.slane %v546_v5, 7 }
  0x66   : > { %9796 = vst [vmem:[#allocation46_spill] sm:$0xff] %v8395_v48  ;;  %7134 = vmatprep.mubr.bf16.mxu0 %v6303_v15  ;;  %v3196_v60 = vrot.slane %v3195_v44, 4  ;;  %7168 = vmatprep.subr.bf16.mxu0 %v7647_v0  ;;  %v3222_v38 = vshll.u32 %v6254_v20, 16  ;;  %v3226_v11 = vshrl.u32 %v6254_v20, 16  ;;  %v8411_v15 = vld [vmem:[%s7807_s10 + $0xf8] sm:$0xf] }
  0x67   : > { %v3206_v14 = vrot.slane %v3205_v4, 4  ;;  %9798 = vst [vmem:[#allocation48_spill] sm:$0xff] %v8408_v3  ;;  %9799 = vst [vmem:[#allocation49_spill] sm:$0xff] %v8411_v15  ;;  %6914 = vmatprep.mubr.bf16.mxu1 %v6017_v51  ;;  %v3215_v58 = vrot.slane %v3213_v45, 4  ;;  %v3218_v10 = vrot.slane %v3216_v41, 5  ;;  %v3232_v37 = vshll.u32 %v6255_v53, 16 }
  0x68   : > { %v3201_v44 = vsel %vm8264_vm2, %v3196_v60, %v3200_v35  ;;  %v6256_v28 = vld [vmem:[%s7807_s10 + $0x84] sm:$0xf]  ;;  %v3224_v48 = vrot.slane %v3222_v38, 5  ;;  %v3228_v4 = vrot.slane %v3226_v11, 4  ;;  %v559_v5 = vshrl.u32 %v8403_v12, 16  ;;  %v7651_v20 = vld [vmem:[%s9708_s1 + $0x1b8] sm:$0xff]  }
  0x69   : > { %v3211_v23 = vsel %vm8264_vm2, %v3206_v14, %v3210_v36  ;;  %v6257_v3 = vld [vmem:[%s7807_s10 + $0x88] sm:$0xf]  ;;  %7169 = vmatpush3.bf16.msra.mxu0 %v7647_v0  ;;  %v3219_v60 = vor.u32 %v3218_v10, %v3215_v58  ;;  %v3234_v51 = vrot.slane %v3232_v37, 5  ;;  %v6258_v45 = vld [vmem:[%s7807_s10 + $0x8c] sm:$0x1]  ;;  %v568_v14 = vshrl.u32 %v8411_v15, 16 }
  0x6a   : > { %v6304_v35 = vcombine.low %v3201_v44, %v3211_v23  ;;  %7170 = vmatprep.subr.bf16.mxu0 %v7649_v32  ;;  %v3229_v36 = vor.u32 %v3228_v4, %v3224_v48  ;;  %v8425_v41 = vrot.slane %v559_v5, 7  ;;  %v6018_v23 = vcombine.low %v8403_v12, %v8411_v15  ;;  %v172_v11 = vld [vmem:[%s7807_s10] sm:$0x8]  ;;  %v6259_v5 = vld [vmem:[%s7807_s10 + $0x94] sm:$0xf] }
  0x6b   : > { %v3220_v38 = vrot.slane %v3219_v60, 4  ;;  %v3237_v10 = vshrl.u32 %v6256_v28, 16  ;;  %v3240_v37 = vshll.u32 %v6256_v28, 16  ;;  %v8432_v58 = vrot.slane %v568_v14, 7  ;;  %v6260_v15 = vld [vmem:[%s7807_s10 + $0x98] sm:$0xf] }
  0x6c   : > { %9800 = vst [vmem:[#allocation50_spill] sm:$0xff] %v8425_v41  ;;  %7135 = vmatmul.mubr.bf16.gmra.mrb[8].mxu0 %v6304_v35  ;;  %v3230_v44 = vrot.slane %v3229_v36, 4  ;;  %v3246_v53 = vshll.u32 %v6257_v3, 16  ;;  %v3250_v4 = vshrl.u32 %v6257_v3, 16  ;;  %6915 = vmatmul.mubr.bf16.gmra.mrb[28].mxu1 %v6018_v23  ;;  %v3256_v41 = vshll.u32 %v6258_v45, 16  ;;  %v8441_v28 = vld [vmem:[%s9708_s1 + $0x1c0] sm:$0xff]  }
  0x6d   : > { %9801 = vst [vmem:[#allocation51_spill] sm:$0xff] %v8432_v58  ;;  %7171 = vmatpush3.bf16.msra.mxu0 %v7649_v32  ;;  %v3225_v0 = vsel %vm8264_vm2, %v3220_v38, %v3224_v48  ;;  %v3239_v35 = vrot.slane %v3237_v10, 4  ;;  %v3242_v60 = vrot.slane %v3240_v37, 5  ;;  %v6261_v14 = vld [vmem:[%s7807_s10 + $0x9c] sm:$0x1]  ;;  %v224_v58 = vshrl.u32 %v172_v11, 16 }
  0x6e   : > { %7172 = vmatprep.subr.bf16.mxu0 %v7651_v20  ;;  %v3235_v3 = vsel %vm8264_vm2, %v3230_v44, %v3234_v51  ;;  %v3248_v36 = vrot.slane %v3246_v53, 5  ;;  %v3252_v32 = vrot.slane %v3250_v4, 4  ;;  %v3258_v23 = vrot.slane %v3256_v41, 5  ;;  %v175_v10 = vld [vmem:[%s7807_s10 + $0x10] sm:$0x8] }
  0x6f   : > { %v6305_v48 = vcombine.low %v3225_v0, %v3235_v3  ;;  %v3243_v38 = vor.u32 %v3242_v60, %v3239_v35  ;;  %v3261_v12 = vshrl.u32 %v6259_v5, 16  ;;  %v3264_v57 = vshll.u32 %v6259_v5, 16  ;;  %5682 = vst [vmem:[%s9474_s16 + $0x18] sm:$0xf] %v7740_v21  ;;  %5683 = vst [vmem:[%s9474_s16 + $0x1c] sm:$0xf] %v7740_v21 }
  0x70   : > { %v3253_v45 = vor.u32 %v3252_v32, %v3248_v36  ;;  %v9804_v53 = vrot.slane %v7845_v26, 4  ;;  %v3270_v0 = vshll.u32 %v6260_v15, 16  ;;  %v3274_v44 = vshrl.u32 %v6260_v15, 16  ;;  %v6262_v26 = vld [vmem:[%s7807_s10 + $0xa4] sm:$0xf] }
  0x71   : > { %7173 = vmatpush3.bf16.msra.mxu0 %v7651_v20  ;;  %7138 = vmatprep.mubr.bf16.mxu0 %v6305_v48  ;;  %v3244_v51 = vrot.slane %v3243_v38, 4  ;;  %v5971_v35 = vrot.slane %v224_v58, 11  ;;  %v3263_v11 = vrot.slane %v3261_v12, 4  ;;  %v3266_v5 = vrot.slane %v3264_v57, 5  ;;  %v6263_v58 = vld [vmem:[%s7807_s10 + $0xa8] sm:$0xf] }
  0x72   : > { %v244_v41 = vsel %vm8447_vm5, %v9804_v53, %v7959_v33  ;;  %7206 = vmatprep.subr.bf16.mxu0 %v8441_v28  ;;  %v3254_v4 = vrot.slane %v3253_v45, 4  ;;  %v3272_v60 = vrot.slane %v3270_v0, 5  ;;  %v3276_v3 = vrot.slane %v3274_v44, 4  ;;  %5684 = vst [vmem:[%s9474_s16 + $0x20] sm:$0xf] %v7740_v21 }
  0x73   : > { %v3249_v20 = vsel %vm8264_vm2, %v3244_v51, %v3248_v36  ;;  %v3280_v32 = vshll.u32 %v6261_v14, 16  ;;  %v235_v15 = vsel %vm8447_vm5, %v5971_v35, %v7954_v30  ;;  %v3267_v48 = vor.u32 %v3266_v5, %v3263_v11  ;;  %v6264_v36 = vld [vmem:[%s7807_s10 + $0xac] sm:$0x1]  ;;  %v178_v35 = vld [vmem:[%s7807_s10 + $0x20] sm:$0x8] }
  0x74   : > { %v3259_v33 = vsel %vm8264_vm2, %v3254_v4, %v3258_v23  ;;  %v246_v38 = vshrl.u32 %v175_v10, 16  ;;  %v6027_v57 = vcombine.low %v235_v15, %v244_v41  ;;  %v3277_v45 = vor.u32 %v3276_v3, %v3272_v60  ;;  %v7646_v11 = vld [vmem:[%s9708_s1 + $0x88] sm:$0xff]   ;;  %v6265_v3 = vld [vmem:[%s7807_s10 + $0xb4] sm:$0xf]  ;;  %5686 = vst [vmem:[%s9474_s16 + $0x28] sm:$0xf] %v7740_v21 }
  0x75   : > { %v6306_v12 = vcombine.low %v3249_v20, %v3259_v33  ;;  %v3282_v53 = vrot.slane %v3280_v32, 5  ;;  %v3268_v51 = vrot.slane %v3267_v48, 4  ;;  %v9805_v0 = vrot.slane %v7869_v39, 4  ;;  %v6266_v32 = vld [vmem:[%s7807_s10 + $0xb8] sm:$0xf] }
  0x76   : > { %v5972_v14 = vrot.slane %v246_v38, 11  ;;  %v3285_v30 = vshrl.u32 %v6262_v26, 16  ;;  %6934 = vmatprep.mubr.bf16.mxu1 %v6027_v57  ;;  %v3278_v10 = vrot.slane %v3277_v45, 4  ;;  %v3288_v44 = vshll.u32 %v6262_v26, 16  ;;  %5687 = vst [vmem:[%s9474_s16 + $0x2c] sm:$0xf] %v7740_v21 }
  0x77   : > { %v266_v23 = vsel %vm8447_vm5, %v9805_v0, %v8044_v6  ;;  %7139 = vmatmul.mubr.bf16.gmra.mrb[12].mxu0 %v6306_v12  ;;  %v3294_v4 = vshll.u32 %v6263_v58, 16  ;;  %v3298_v41 = vshrl.u32 %v6263_v58, 16  ;;  %v3273_v39 = vsel %vm8264_vm2, %v3268_v51, %v3272_v60  ;;  %v6267_v60 = vld [vmem:[%s7807_s10 + $0xbc] sm:$0x1]  ;;  %v181_v0 = vld [vmem:[%s7807_s10 + $0x30] sm:$0x8] }
  0x78   : > { %v257_v6 = vsel %vm8447_vm5, %v5972_v14, %v7998_v52  ;;  %v3287_v5 = vrot.slane %v3285_v30, 4  ;;  %v3304_v20 = vshll.u32 %v6264_v36, 16  ;;  %v3283_v26 = vsel %vm8264_vm2, %v3278_v10, %v3282_v53  ;;  %5688 = vst [vmem:[%s9474_s16 + $0x30] sm:$0xf] %v7740_v21  ;;  %5689 = vst [vmem:[%s9474_s16 + $0x34] sm:$0xf] %v7740_v21 }
  0x79   : > { %v6028_v33 = vcombine.low %v257_v6, %v266_v23  ;;  %v3290_v15 = vrot.slane %v3288_v44, 5  ;;  %v3296_v48 = vrot.slane %v3294_v4, 5  ;;  %v6307_v38 = vcombine.low %v3273_v39, %v3283_v26  ;;  %v7648_v44 = vld [vmem:[%s9708_s1 + $0x90] sm:$0xff]   ;;  %5690 = vst [vmem:[%s9474_s16 + $0x38] sm:$0xf] %v7740_v21 }
  0x7a   : > { %v3300_v58 = vrot.slane %v3298_v41, 4  ;;  %v3306_v12 = vrot.slane %v3304_v20, 5  ;;  %v268_v57 = vshrl.u32 %v178_v35, 16  ;;  %v9806_v52 = vrot.slane %v7914_v2, 4  ;;  %5691 = vst [vmem:[%s9474_s16 + $0x3c] sm:$0xf] %v7740_v21 }
  0x7b   : > { %6935 = vmatmul.mubr.bf16.vlgmr.msra.gmra.mrb[0].mxu1 %v6028_v33  ;;  %v3291_v45 = vor.u32 %v3290_v15, %v3287_v5  ;;  %v3309_v51 = vshrl.u32 %v6265_v3, 16  ;;  %v3312_v14 = vshll.u32 %v6265_v3, 16  ;;  %7142 = vmatprep.mubr.bf16.mxu0 %v6307_v38  ;;  %v3318_v30 = vshll.u32 %v6266_v32, 16  ;;  %v6268_v5 = vld [vmem:[%s7807_s10 + $0xc4] sm:$0xf] }
  0x7c   : > { %v288_v36 = vsel %vm8447_vm5, %v9806_v52, %v8088_v61  ;;  %v3301_v53 = vor.u32 %v3300_v58, %v3296_v48  ;;  %6967 = vmatpush3.bf16.msra.mxu1 %v8257_v29  ;;  %v5973_v23 = vrot.slane %v268_v57, 11  ;;  %v3322_v10 = vshrl.u32 %v6266_v32, 16  ;;  %v6269_v33 = vld [vmem:[%s7807_s10 + $0xc8] sm:$0xf]  ;;  %5692 = vst [vmem:[%s9474_s16 + $0x40] sm:$0xf] %v7740_v21 }
  0x7d   : > { %v3292_v2 = vrot.slane %v3291_v45, 4  ;;  %v3311_v4 = vrot.slane %v3309_v51, 4  ;;  %v3314_v41 = vrot.slane %v3312_v14, 5  ;;  %v3328_v61 = vshll.u32 %v6267_v60, 16  ;;  %6968 = vmatprep.subr.bf16.mxu1 %v7646_v11  ;;  %v6270_v60 = vld [vmem:[%s7807_s10 + $0xcc] sm:$0x1] }
  0x7e   : > { %v3302_v35 = vrot.slane %v3301_v53, 4  ;;  %v279_v39 = vsel %vm8447_vm5, %v5973_v23, %v8079_v46  ;;  %v3320_v29 = vrot.slane %v3318_v30, 5  ;;  %v3324_v6 = vrot.slane %v3322_v10, 4  ;;  %v184_v51 = vld [vmem:[%s7807_s10 + $0x40] sm:$0x8] }
  0x7f   : > { %v3297_v20 = vsel %vm8264_vm2, %v3292_v2, %v3296_v48  ;;  %v6029_v3 = vcombine.low %v279_v39, %v288_v36  ;;  %v3315_v32 = vor.u32 %v3314_v41, %v3311_v4  ;;  %v3330_v26 = vrot.slane %v3328_v61, 5  ;;  %v6271_v10 = vld [vmem:[%s7807_s10 + $0xd4] sm:$0xf]  ;;  %5693 = vst [vmem:[%s9474_s16 + $0x44] sm:$0xf] %v7740_v21 }
  0x80   : > { %v3307_v15 = vsel %vm8264_vm2, %v3302_v35, %v3306_v12  ;;  %v3325_v38 = vor.u32 %v3324_v6, %v3320_v29  ;;  %v290_v58 = vshrl.u32 %v181_v0, 16  ;;  %v9807_v57 = vrot.slane %v7978_v24, 4  ;;  %6969 = vmatpush3.bf16.msra.mxu1 %v7646_v11  ;;  %v7650_v12 = vld [vmem:[%s9708_s1 + $0x98] sm:$0xff]   ;;  %5694 = vst [vmem:[%s9474_s16 + $0x48] sm:$0xf] %v7740_v21 }
  0x81   : > { %v6308_v45 = vcombine.low %v3297_v20, %v3307_v15  ;;  %6938 = vmatprep.mubr.bf16.mxu1 %v6029_v3  ;;  %v3316_v48 = vrot.slane %v3315_v32, 4  ;;  %v3333_v52 = vshrl.u32 %v6268_v5, 16  ;;  %v3336_v36 = vshll.u32 %v6268_v5, 16  ;;  %6970 = vmatprep.subr.bf16.mxu1 %v7648_v44  ;;  %v6272_v35 = vld [vmem:[%s7807_s10 + $0xd8] sm:$0xf]  ;;  %v7652_v20 = vld [vmem:[%s9708_s1 + $0xa0] sm:$0xff]  }
  0x82   : > { %v310_v46 = vsel %vm8447_vm5, %v9807_v57, %v8109_v63  ;;  %v3326_v14 = vrot.slane %v3325_v38, 4  ;;  %v5974_v24 = vrot.slane %v290_v58, 11  ;;  %v3342_v0 = vshll.u32 %v6269_v33, 16  ;;  %v187_v57 = vld [vmem:[%s7807_s10 + $0x50] sm:$0x8] }
  0x83   : > { %v3346_v53 = vshrl.u32 %v6269_v33, 16  ;;  %7143 = vmatmul.mubr.bf16.gmra.mrb[16].mxu0 %v6308_v45  ;;  %v3321_v63 = vsel %vm8264_vm2, %v3316_v48, %v3320_v29  ;;  %v3335_v11 = vrot.slane %v3333_v52, 4  ;;  %v3338_v23 = vrot.slane %v3336_v36, 5  ;;  %v6273_v33 = vld [vmem:[%s7807_s10 + $0xdc] sm:$0x1] }
  0x84   : > { %v3352_v30 = vshll.u32 %v6270_v60, 16  ;;  %v3331_v2 = vsel %vm8264_vm2, %v3326_v14, %v3330_v26  ;;  %v301_v4 = vsel %vm8447_vm5, %v5974_v24, %v8093_v8  ;;  %v3344_v41 = vrot.slane %v3342_v0, 5  ;;  %6971 = vmatpush3.bf16.msra.mxu1 %v7648_v44  ;;  %v6274_v14 = vld [vmem:[%s7807_s10 + $0xe4] sm:$0xf]  ;;  %v7654_v24 = vld [vmem:[%s9708_s1 + $0xa8] sm:$0xff]  }
  0x85   : > { %v3348_v61 = vrot.slane %v3346_v53, 4  ;;  %v6309_v39 = vcombine.low %v3321_v63, %v3331_v2  ;;  %v6030_v6 = vcombine.low %v301_v4, %v310_v46  ;;  %v3339_v29 = vor.u32 %v3338_v23, %v3335_v11  ;;  %6972 = vmatprep.subr.bf16.mxu1 %v7650_v12  ;;  %v6275_v63 = vld [vmem:[%s7807_s10 + $0xe8] sm:$0xf]  ;;  %v6276_v2 = vld [vmem:[%s7807_s10 + $0xec] sm:$0x1]  ;;  %v7656_v4 = vld [vmem:[%s9708_s1 + $0xb0] sm:$0xff]  }
  0x86   : > { %v3354_v5 = vrot.slane %v3352_v30, 5  ;;  %v312_v32 = vshrl.u32 %v184_v51, 16  ;;  %v324_v26 = vrot.slane %v8021_v22, 4  ;;  %v3357_v8 = vshrl.u32 %v6271_v10, 16  ;;  %5695 = vst [vmem:[%s9474_s16 + $0x4c] sm:$0xf] %v7740_v21 }
  0x87   : > { %v3349_v3 = vor.u32 %v3348_v61, %v3344_v41  ;;  %7146 = vmatprep.mubr.bf16.mxu0 %v6309_v39  ;;  %6939 = vmatmul.mubr.bf16.gmra.mrb[4].mxu1 %v6030_v6  ;;  %v3340_v44 = vrot.slane %v3339_v29, 4  ;;  %v3360_v15 = vshll.u32 %v6271_v10, 16  ;;  %v3366_v38 = vshll.u32 %v6272_v35, 16  ;;  %v190_v6 = vld [vmem:[%s7807_s10 + $0x60] sm:$0x8] }
  0x88   : > { %v3370_v58 = vshrl.u32 %v6272_v35, 16  ;;  %v5975_v60 = vrot.slane %v312_v32, 11  ;;  %v332_v45 = vsel %vm8447_vm5, %v324_v26, %v8173_v62  ;;  %v3359_v48 = vrot.slane %v3357_v8, 4  ;;  %6973 = vmatpush3.bf16.msra.mxu1 %v7650_v12  ;;  %v6277_v8 = vld [vmem:[%s7807_s10 + $0xf4] sm:$0xf] }
  0x89   : > { %v3350_v46 = vrot.slane %v3349_v3, 4  ;;  %v3345_v22 = vsel %vm8264_vm2, %v3340_v44, %v3344_v41  ;;  %v3362_v52 = vrot.slane %v3360_v15, 5  ;;  %v3368_v36 = vrot.slane %v3366_v38, 5  ;;  %6974 = vmatprep.subr.bf16.mxu1 %v7652_v20  ;;  %5696 = vst [vmem:[%s9474_s16 + $0x50] sm:$0xf] %v7740_v21 }
  0x8a   : > { %v3372_v51 = vrot.slane %v3370_v58, 4  ;;  %v323_v62 = vsel %vm8447_vm5, %v5975_v60, %v8153_v50  ;;  %v3376_v12 = vshll.u32 %v6273_v33, 16  ;;  %v334_v53 = vshrl.u32 %v187_v57, 16  ;;  %v6278_v58 = vld [vmem:[%s7807_s10 + $0xf8] sm:$0xf] }
  0x8b   : > { %v3355_v0 = vsel %vm8264_vm2, %v3350_v46, %v3354_v5  ;;  %v6031_v23 = vcombine.low %v323_v62, %v332_v45  ;;  %v3363_v30 = vor.u32 %v3362_v52, %v3359_v48  ;;  %v346_v35 = vrot.slane %v8081_v40, 4  ;;  %v6279_v45 = vld [vmem:[%s7807_s10 + $0xfc] sm:$0x1]  ;;  %5697 = vst [vmem:[%s9474_s16 + $0x54] sm:$0xf] %v7740_v21 }
  0x8c   : > { %v6310_v11 = vcombine.low %v3345_v22, %v3355_v0  ;;  %v3373_v10 = vor.u32 %v3372_v51, %v3368_v36  ;;  %v3378_v41 = vrot.slane %v3376_v12, 5  ;;  %v5976_v61 = vrot.slane %v334_v53, 11  ;;  %6975 = vmatpush3.bf16.msra.mxu1 %v7652_v20  ;;  %v7658_v51 = vld [vmem:[%s9708_s1 + $0xb8] sm:$0xff]   ;;  %5698 = vst [vmem:[%s9474_s16 + $0x58] sm:$0xf] %v7740_v21 }
  0x8d   : > { %v3381_v39 = vshrl.u32 %v6274_v14, 16  ;;  %6942 = vmatprep.mubr.bf16.mxu1 %v6031_v23  ;;  %v3364_v50 = vrot.slane %v3363_v30, 4  ;;  %v3384_v5 = vshll.u32 %v6274_v14, 16  ;;  %v3390_v3 = vshll.u32 %v6275_v63, 16  ;;  %6976 = vmatprep.subr.bf16.mxu1 %v7654_v24  ;;  %5699 = vst [vmem:[%s9474_s16 + $0x5c] sm:$0xf] %v7740_v21 }
  0x8e   : > { %7147 = vmatmul.mubr.bf16.gmra.mrb[20].mxu0 %v6310_v11  ;;  %v3374_v29 = vrot.slane %v3373_v10, 4  ;;  %v345_v32 = vsel %vm8447_vm5, %v5976_v61, %v8178_v19  ;;  %v354_v26 = vsel %vm8447_vm5, %v346_v35, %v8193_v18  ;;  %v3394_v33 = vshrl.u32 %v6275_v63, 16  ;;  %5700 = vst [vmem:[%s9474_s16 + $0x60] sm:$0xf] %v7740_v21  ;;  %5701 = vst [vmem:[%s9474_s16 + $0x64] sm:$0xf] %v7740_v21 }
  0x8f   : > { %v3383_v40 = vrot.slane %v3381_v39, 4  ;;  %v3369_v20 = vsel %vm8264_vm2, %v3364_v50, %v3368_v36  ;;  %v6032_v15 = vcombine.low %v345_v32, %v354_v26  ;;  %v3386_v38 = vrot.slane %v3384_v5, 5  ;;  %v193_v36 = vld [vmem:[%s7807_s10 + $0x70] sm:$0x8]  ;;  %v6280_v39 = vld [vmem:[%s7807_s10 + $0x104] sm:$0xf] }
  0x90   : > { %v3379_v44 = vsel %vm8264_vm2, %v3374_v29, %v3378_v41  ;;  %v3392_v19 = vrot.slane %v3390_v3, 5  ;;  %v3396_v46 = vrot.slane %v3394_v33, 4  ;;  %v3400_v60 = vshll.u32 %v6276_v2, 16  ;;  %6977 = vmatpush3.bf16.msra.mxu1 %v7654_v24  ;;  %v8575_v2 = vld [vmem:[%s9708_s1 + $0xc0] sm:$0xff]   ;;  %5702 = vst [vmem:[%s9474_s16 + $0x68] sm:$0xf] %v7740_v21 }
  0x91   : > { %v6311_v57 = vcombine.low %v3369_v20, %v3379_v44  ;;  %6943 = vmatmul.mubr.bf16.gmra.mrb[8].mxu1 %v6032_v15  ;;  %v3387_v18 = vor.u32 %v3386_v38, %v3383_v40  ;;  %v356_v48 = vshrl.u32 %v190_v6, 16  ;;  %v368_v22 = vrot.slane %v8135_v34, 4  ;;  %6978 = vmatprep.subr.bf16.mxu1 %v7656_v4  ;;  %v6281_v6 = vld [vmem:[%s7807_s10 + $0x108] sm:$0xf]  ;;  %5703 = vst [vmem:[%s9474_s16 + $0x6c] sm:$0xf] %v7740_v21 }
  0x92   : > { %v3405_v52 = vshrl.u32 %v6277_v8, 16  ;;  %v3397_v14 = vor.u32 %v3396_v46, %v3392_v19  ;;  %v3402_v0 = vrot.slane %v3400_v60, 5  ;;  %v3408_v62 = vshll.u32 %v6277_v8, 16  ;;  %v6282_v8 = vld [vmem:[%s7807_s10 + $0x10c] sm:$0x1] }
  0x93   : > { %7150 = vmatprep.mubr.bf16.mxu0 %v6311_v57  ;;  %v3414_v12 = vshll.u32 %v6278_v58, 16  ;;  %v3388_v24 = vrot.slane %v3387_v18, 4  ;;  %v5977_v53 = vrot.slane %v356_v48, 11  ;;  %v376_v34 = vsel %vm8447_vm5, %v368_v22, %v8203_v56  ;;  %v6324_v48 = vld [vmem:[%s7807_s10 + $0x24] sm:$0xf] }
  0x94   : > { %v3407_v63 = vrot.slane %v3405_v52, 4  ;;  %v3398_v11 = vrot.slane %v3397_v14, 4  ;;  %v3410_v23 = vrot.slane %v3408_v62, 5  ;;  %v3418_v10 = vshrl.u32 %v6278_v58, 16  ;;  %6979 = vmatpush3.bf16.msra.mxu1 %v7656_v4  ;;  %5704 = vst [vmem:[%s9474_s16 + $0x70] sm:$0xf] %v7740_v21 }
  0x95   : > { %v3416_v30 = vrot.slane %v3414_v12, 5  ;;  %v3393_v41 = vsel %vm8264_vm2, %v3388_v24, %v3392_v19  ;;  %v367_v61 = vsel %vm8447_vm5, %v5977_v53, %v8201_v42  ;;  %v3424_v35 = vshll.u32 %v6279_v45, 16  ;;  %6980 = vmatprep.subr.bf16.mxu1 %v7658_v51  ;;  %v6323_v19 = vld [vmem:[%s7807_s10 + $0x20] sm:$0x8]  ;;  %v6325_v12 = vld [vmem:[%s7807_s10 + $0x28] sm:$0xf] }
  0x96   : > { %v378_v56 = vshrl.u32 %v193_v36, 16  ;;  %v3403_v4 = vsel %vm8264_vm2, %v3398_v11, %v3402_v0  ;;  %v6033_v50 = vcombine.low %v367_v61, %v376_v34  ;;  %v3411_v29 = vor.u32 %v3410_v23, %v3407_v63  ;;  %5705 = vst [vmem:[%s9474_s16 + $0x74] sm:$0xf] %v7740_v21  ;;  %5706 = vst [vmem:[%s9474_s16 + $0x78] sm:$0xf] %v7740_v21 }
  0x97   : > { %v3420_v5 = vrot.slane %v3418_v10, 4  ;;  %v6312_v3 = vcombine.low %v3393_v41, %v3403_v4  ;;  %v3426_v32 = vrot.slane %v3424_v35, 5  ;;  %v390_v40 = vrot.slane %v8180_v54, 4  ;;  %v196_v54 = vld [vmem:[%s7807_s10 + $0x80] sm:$0x8] }
  0x98   : > { %v5978_v26 = vrot.slane %v378_v56, 11  ;;  %6946 = vmatprep.mubr.bf16.mxu1 %v6033_v50  ;;  %v3412_v42 = vrot.slane %v3411_v29, 4  ;;  %v3429_v20 = vshrl.u32 %v6280_v39, 16  ;;  %v3432_v44 = vshll.u32 %v6280_v39, 16  ;;  %6981 = vmatpush3.bf16.msra.mxu1 %v7658_v51  ;;  %5707 = vst [vmem:[%s9474_s16 + $0x7c] sm:$0xf] %v7740_v21 }
  0x99   : > { %v3421_v33 = vor.u32 %v3420_v5, %v3416_v30  ;;  %7151 = vmatmul.mubr.bf16.gmra.mrb[24].mxu0 %v6312_v3  ;;  %v398_v38 = vsel %vm8447_vm5, %v390_v40, %v8227_v55  ;;  %v3438_v58 = vshll.u32 %v6281_v6, 16  ;;  %v3442_v57 = vshrl.u32 %v6281_v6, 16  ;;  %7014 = vmatprep.subr.bf16.mxu1 %v8575_v2  ;;  %v6326_v3 = vld [vmem:[%s7807_s10 + $0x30] sm:$0x8]  ;;  %5708 = vst [vmem:[%s9474_s16 + $0x80] sm:$0xf] %v7740_v21 }
  0x9a   : > { %v389_v15 = vsel %vm8447_vm5, %v5978_v26, %v8225_v43  ;;  %v3417_v46 = vsel %vm8264_vm2, %v3412_v42, %v3416_v30  ;;  %v3431_v18 = vrot.slane %v3429_v20, 4  ;;  %v3434_v22 = vrot.slane %v3432_v44, 5  ;;  %5709 = vst [vmem:[%s9474_s16 + $0x84] sm:$0xf] %v7740_v21  ;;  %5710 = vst [vmem:[%s9474_s16 + $0x88] sm:$0xf] %v7740_v21 }
  0x9b   : > { %v3422_v60 = vrot.slane %v3421_v33, 4  ;;  %v6034_v45 = vcombine.low %v389_v15, %v398_v38  ;;  %v3440_v43 = vrot.slane %v3438_v58, 5  ;;  %v3444_v52 = vrot.slane %v3442_v57, 4  ;;  %5711 = vst [vmem:[%s9474_s16 + $0x8c] sm:$0xf] %v7740_v21 }
  0x9c   : > { %v3448_v36 = vshll.u32 %v6282_v8, 16  ;;  %v400_v51 = vshrl.u32 %v196_v54, 16  ;;  %v412_v14 = vrot.slane %v8220_v59, 4  ;;  %v9808_v0 = vshll.u32 %v8211_v16, 16  ;;  %v6328_v8 = vld [vmem:[%s7807_s10 + $0x38] sm:$0xf] }
  0x9d   : > { %v3427_v55 = vsel %vm8264_vm2, %v3422_v60, %v3426_v32  ;;  %6947 = vmatmul.mubr.bf16.gmra.mrb[12].mxu1 %v6034_v45  ;;  %v3435_v53 = vor.u32 %v3434_v22, %v3431_v18  ;;  %v3445_v34 = vor.u32 %v3444_v52, %v3440_v43  ;;  %v3824_v30 = vshrl.u32 %v6323_v19, 16  ;;  %v6327_v32 = vld [vmem:[%s7807_s10 + $0x34] sm:$0xf]  ;;  %v202_v60 = vld [vmem:[%s7807_s10 + $0xa0] sm:$0x8] }
  0x9e   : > { %v419_v62 = vor.u32 %v9808_v0, %v8229_v7  ;;  %v6313_v24 = vcombine.low %v3417_v46, %v3427_v55  ;;  %v3450_v63 = vrot.slane %v3448_v36, 5  ;;  %v5979_v11 = vrot.slane %v400_v51, 11  ;;  %v199_v7 = vld [vmem:[%s7807_s10 + $0x90] sm:$0x8]  ;;  %v6330_v52 = vld [vmem:[%s7807_s10 + $0x44] sm:$0xf] }
  0x9f   : > { %v3829_v10 = vshrl.u32 %v6324_v48, 16  ;;  %v3436_v59 = vrot.slane %v3435_v53, 4  ;;  %v3446_v41 = vrot.slane %v3445_v34, 4  ;;  %v3832_v61 = vshll.u32 %v6324_v48, 16  ;;  %v6331_v0 = vld [vmem:[%s7807_s10 + $0x48] sm:$0xf] }
  0xa0   : > { %v420_v23 = vsel %vm8447_vm5, %v412_v14, %v419_v62  ;;  %7154 = vmatprep.mubr.bf16.mxu0 %v6313_v24  ;;  %v3838_v16 = vshrl.u32 %v6325_v12, 16  ;;  %v411_v35 = vsel %vm8447_vm5, %v5979_v11, %v8260_v31  ;;  %v6371_v56 = vrot.slane %v3824_v30, 11  ;;  %5712 = vst [vmem:[%s9474_s16 + $0x90] sm:$0xf] %v7740_v21  ;;  %5713 = vst [vmem:[%s9474_s16 + $0x94] sm:$0xf] %v7740_v21 }
  0xa1   : > { %v3831_v39 = vrot.slane %v3829_v10, 7  ;;  %v3841_v6 = vshll.u32 %v6325_v12, 16  ;;  %v3441_v4 = vsel %vm8264_vm2, %v3436_v59, %v3440_v43  ;;  %v3451_v50 = vsel %vm8264_vm2, %v3446_v41, %v3450_v63  ;;  %v205_v59 = vld [vmem:[%s7807_s10 + $0xb0] sm:$0x8]  ;;  %5714 = vst [vmem:[%s9474_s16 + $0x98] sm:$0xf] %v7740_v21 }
  0xa2   : > { %v6035_v29 = vcombine.low %v411_v35, %v420_v23  ;;  %v3840_v5 = vrot.slane %v3838_v16, 7  ;;  %v6314_v26 = vcombine.low %v3441_v4, %v3451_v50  ;;  %v422_v33 = vshrl.u32 %v199_v7, 16  ;;  %5715 = vst [vmem:[%s9474_s16 + $0x9c] sm:$0xf] %v7740_v21  ;;  %5716 = vst [vmem:[%s9474_s16 + $0xa0] sm:$0xf] %v7740_v21 }
  0xa3   : > { %v3834_v40 = vor.u32 %v3832_v61, %v3831_v39  ;;  %v3836_v42 = vrot.slane %v3831_v39, 4  ;;  %v9809_v20 = vshll.u32 %v8232_v1, 16  ;;  %v434_v15 = vrot.slane %v8240_v13, 4  ;;  %v7655_v39 = vld [vmem:[%s9708_s1 + $0x1c8] sm:$0xff]   ;;  %5717 = vst [vmem:[%s9474_s16 + $0xa4] sm:$0xf] %v7740_v21 }
  0xa4   : > { %6950 = vmatprep.mubr.bf16.mxu1 %v6035_v29  ;;  %v3843_v31 = vor.u32 %v3841_v6, %v3840_v5  ;;  %v9810_v38 = vshll.u32 %v8235_v25, 16  ;;  %7155 = vmatmul.mubr.bf16.gmra.mrb[28].mxu0 %v6314_v26  ;;  %v5980_v54 = vrot.slane %v422_v33, 11  ;;  %v3846_v19 = vshrl.u32 %v6326_v3, 16  ;;  %v6329_v25 = vld [vmem:[%s7807_s10 + $0x40] sm:$0x8] }
  0xa5   : > { %v432_v44 = vor.u32 %v9809_v20, %v8240_v13  ;;  %v3835_v57 = vsel %vm8447_vm5, %v6371_v56, %v3834_v40  ;;  %v3851_v46 = vshrl.u32 %v6327_v32, 16  ;;  %v3854_v45 = vshll.u32 %v6327_v32, 16  ;;  %v6333_v56 = vld [vmem:[%s7807_s10 + $0x54] sm:$0xf]  ;;  %v6334_v5 = vld [vmem:[%s7807_s10 + $0x58] sm:$0xf] }
  0xa6   : > { %v441_v58 = vor.u32 %v9810_v38, %v8250_v47  ;;  %v3844_v1 = vsel %vm8447_vm5, %v3836_v42, %v3843_v31  ;;  %v3860_v18 = vshrl.u32 %v6328_v8, 16  ;;  %v6372_v22 = vrot.slane %v3846_v19, 11  ;;  %v9813_v26 = vld [vmem:[#allocation34_spill] sm:$0xff]  ;;  %v9814_v40 = vld [vmem:[#allocation32_spill] sm:$0xff]  ;;  %5718 = vst [vmem:[%s9474_s16 + $0xa8] sm:$0xf] %v7740_v21 }
  0xa7   : > { %v6403_v47 = vcombine.low %v3835_v57, %v3844_v1  ;;  %v433_v48 = vsel %vm8447_vm5, %v5980_v54, %v432_v44  ;;  %v3853_v43 = vrot.slane %v3851_v46, 7  ;;  %v3863_v51 = vshll.u32 %v6328_v8, 16  ;;  %v9816_v44 = vld [vmem:[#allocation35_spill] sm:$0xff]  ;;  %v208_v1 = vld [vmem:[%s7807_s10 + $0xc0] sm:$0x8] }
  0xa8   : > { %v442_v13 = vsel %vm8447_vm5, %v434_v15, %v441_v58  ;;  %v3862_v55 = vrot.slane %v3860_v18, 7  ;;  %v444_v14 = vshrl.u32 %v202_v60, 16  ;;  %v9811_v24 = vshll.u32 %v8276_v9, 16  ;;  %v9817_v15 = vld [vmem:[#allocation33_spill] sm:$0xff]  ;;  %5719 = vst [vmem:[%s9474_s16 + $0xac] sm:$0xf] %v7740_v21 }
  0xa9   : > { %v6036_v36 = vcombine.low %v433_v48, %v442_v13  ;;  %7174 = vmatprep.mubr.bf16.mxu0 %v6403_v47  ;;  %v3856_v62 = vor.u32 %v3854_v45, %v3853_v43  ;;  %v3858_v12 = vrot.slane %v3853_v43, 4  ;;  %v456_v34 = vrot.slane %v8292_v17, 4  ;;  %v6335_v43 = vld [vmem:[%s7807_s10 + $0x60] sm:$0x8]  ;;  %5720 = vst [vmem:[%s9474_s16 + $0xb0] sm:$0xf] %v7740_v21 }
  0xaa   : > { %v454_v53 = vor.u32 %v9811_v24, %v8292_v17  ;;  %v3865_v63 = vor.u32 %v3863_v51, %v3862_v55  ;;  %v5981_v11 = vrot.slane %v444_v14, 11  ;;  %v9812_v23 = vshll.u32 %v8279_v27, 16  ;;  %5721 = vst [vmem:[%s9474_s16 + $0xb4] sm:$0xf] %v7740_v21  ;;  %5722 = vst [vmem:[%s9474_s16 + $0xb8] sm:$0xf] %v7740_v21 }
  0xab   : > { %6951 = vmatmul.mubr.bf16.gmra.mrb[16].mxu1 %v6036_v36  ;;  %v3868_v10 = vshrl.u32 %v6329_v25, 16  ;;  %v3857_v41 = vsel %vm8447_vm5, %v6372_v22, %v3856_v62  ;;  %v3873_v61 = vshrl.u32 %v6330_v52, 16  ;;  %v3876_v9 = vshll.u32 %v6330_v52, 16  ;;  %v7657_v52 = vld [vmem:[%s9708_s1 + $0x1d0] sm:$0xff]   ;;  %v6337_v62 = vld [vmem:[%s7807_s10 + $0x68] sm:$0xf] }
  0xac   : > { %v463_v30 = vor.u32 %v9812_v23, %v8297_v49  ;;  %v3882_v16 = vshrl.u32 %v6331_v0, 16  ;;  %v3866_v17 = vsel %vm8447_vm5, %v3858_v12, %v3865_v63  ;;  %v455_v7 = vsel %vm8447_vm5, %v5981_v11, %v454_v53  ;;  %v6332_v49 = vld [vmem:[%s7807_s10 + $0x50] sm:$0x8]  ;;  %v9819_v53 = vld [vmem:[#allocation38_spill] sm:$0xff]  ;;  %5723 = vst [vmem:[%s9474_s16 + $0xbc] sm:$0xf] %v7740_v21 }
  0xad   : > { %v6373_v27 = vrot.slane %v3868_v10, 11  ;;  %v6404_v6 = vcombine.low %v3857_v41, %v3866_v17  ;;  %v3875_v50 = vrot.slane %v3873_v61, 7  ;;  %v3885_v3 = vshll.u32 %v6331_v0, 16  ;;  %v6336_v0 = vld [vmem:[%s7807_s10 + $0x64] sm:$0xf]  ;;  %v9823_v41 = vld [vmem:[#allocation37_spill] sm:$0xff] }
  0xae   : > { %v464_v35 = vsel %vm8447_vm5, %v456_v34, %v463_v30  ;;  %v3884_v29 = vrot.slane %v3882_v16, 7  ;;  %v466_v32 = vshrl.u32 %v205_v59, 16  ;;  %v9815_v42 = vshll.u32 %v9814_v40, 16  ;;  %v9820_v34 = vld [vmem:[#allocation36_spill] sm:$0xff]  ;;  %5724 = vst [vmem:[%s9474_s16 + $0xc0] sm:$0xf] %v7740_v21 }
  0xaf   : > { %v6037_v4 = vcombine.low %v455_v7, %v464_v35  ;;  %v478_v8 = vrot.slane %v9813_v26, 4  ;;  %7175 = vmatmul.mubr.bf16.vlgmr.msra.gmra.mrb[0].mxu0 %v6404_v6  ;;  %v3878_v31 = vor.u32 %v3876_v9, %v3875_v50  ;;  %v3880_v20 = vrot.slane %v3875_v50, 4  ;;  %v9822_v59 = vld [vmem:[#allocation40_spill] sm:$0xff]  ;;  %v7659_v7 = vld [vmem:[%s9708_s1 + $0x1d8] sm:$0xff]   ;;  %5725 = vst [vmem:[%s9474_s16 + $0xc4] sm:$0xf] %v7740_v21 }
  0xb0   : > { %v476_v33 = vor.u32 %v9815_v42, %v9813_v26  ;;  %v9818_v38 = vshll.u32 %v9817_v15, 16  ;;  %v3890_v57 = vshrl.u32 %v6332_v49, 16  ;;  %7207 = vmatpush3.bf16.msra.mxu0 %v8441_v28  ;;  %v3887_v54 = vor.u32 %v3885_v3, %v3884_v29  ;;  %v211_v17 = vld [vmem:[%s7807_s10 + $0xd0] sm:$0x8]  ;;  %v6339_v40 = vld [vmem:[%s7807_s10 + $0x74] sm:$0xf] }
  0xb1   : > { %6954 = vmatprep.mubr.bf16.mxu1 %v6037_v4  ;;  %v5982_v19 = vrot.slane %v466_v32, 11  ;;  %v3895_v46 = vshrl.u32 %v6333_v56, 16  ;;  %v3898_v60 = vshll.u32 %v6333_v56, 16  ;;  %v3879_v13 = vsel %vm8447_vm5, %v6373_v27, %v3878_v31  ;;  %7208 = vmatprep.subr.bf16.mxu0 %v7655_v39  ;;  %v9826_v31 = vld [vmem:[#allocation39_spill] sm:$0xff]  ;;  %5726 = vst [vmem:[%s9474_s16 + $0xc8] sm:$0xf] %v7740_v21 }
  0xb2   : > { %v485_v58 = vor.u32 %v9818_v38, %v9816_v44  ;;  %v6374_v18 = vrot.slane %v3890_v57, 11  ;;  %v3904_v25 = vshrl.u32 %v6334_v5, 16  ;;  %v3888_v47 = vsel %vm8447_vm5, %v3880_v20, %v3887_v54  ;;  %v6340_v38 = vld [vmem:[%s7807_s10 + $0x78] sm:$0xf]  ;;  %5727 = vst [vmem:[%s9474_s16 + $0xcc] sm:$0xf] %v7740_v21 }
  0xb3   : > { %v477_v28 = vsel %vm8447_vm5, %v5982_v19, %v476_v33  ;;  %v3897_v48 = vrot.slane %v3895_v46, 7  ;;  %v3907_v22 = vshll.u32 %v6334_v5, 16  ;;  %v6405_v36 = vcombine.low %v3879_v13, %v3888_v47  ;;  %v9828_v19 = vld [vmem:[#allocation43_spill] sm:$0xff]  ;;  %v9829_v46 = vld [vmem:[#allocation41_spill] sm:$0xff]  ;;  %5728 = vst [vmem:[%s9474_s16 + $0xd0] sm:$0xf] %v7740_v21 }
  0xb4   : > { %v486_v45 = vsel %vm8447_vm5, %v478_v8, %v485_v58  ;;  %v3906_v51 = vrot.slane %v3904_v25, 7  ;;  %v488_v14 = vshrl.u32 %v208_v1, 16  ;;  %7209 = vmatpush3.bf16.msra.mxu0 %v7655_v39  ;;  %v9821_v63 = vshll.u32 %v9820_v34, 16  ;;  %v6338_v39 = vld [vmem:[%s7807_s10 + $0x70] sm:$0x8]  ;;  %v9825_v8 = vld [vmem:[#allocation42_spill] sm:$0xff] }
  0xb5   : > { %v6038_v55 = vcombine.low %v477_v28, %v486_v45  ;;  %v3900_v12 = vor.u32 %v3898_v60, %v3897_v48  ;;  %v3902_v24 = vrot.slane %v3897_v48, 4  ;;  %v500_v23 = vrot.slane %v9819_v53, 4  ;;  %7178 = vmatprep.mubr.bf16.mxu0 %v6405_v36  ;;  %7210 = vmatprep.subr.bf16.mxu0 %v7657_v52  ;;  %v7661_v58 = vld [vmem:[%s9708_s1 + $0x1e0] sm:$0xff]   ;;  %5729 = vst [vmem:[%s9474_s16 + $0xd4] sm:$0xf] %v7740_v21 }
  0xb6   : > { %v498_v11 = vor.u32 %v9821_v63, %v9819_v53  ;;  %v3909_v30 = vor.u32 %v3907_v22, %v3906_v51  ;;  %v5983_v10 = vrot.slane %v488_v14, 11  ;;  %v9824_v61 = vshll.u32 %v9823_v41, 16  ;;  %v214_v28 = vld [vmem:[%s7807_s10 + $0xe0] sm:$0x8]  ;;  %5730 = vst [vmem:[%s9474_s16 + $0xd8] sm:$0xf] %v7740_v21 }
  0xb7   : > { %6955 = vmatmul.mubr.bf16.gmra.mrb[20].mxu1 %v6038_v55  ;;  %v3912_v16 = vshrl.u32 %v6335_v43, 16  ;;  %v3901_v35 = vsel %vm8447_vm5, %v6374_v18, %v3900_v12  ;;  %v3917_v27 = vshrl.u32 %v6336_v0, 16  ;;  %v3920_v49 = vshll.u32 %v6336_v0, 16  ;;  %v6341_v36 = vld [vmem:[%s7807_s10 + $0x80] sm:$0x8]  ;;  %v7663_v55 = vld [vmem:[%s9708_s1 + $0x1e8] sm:$0xff]  }
  0xb8   : > { %v507_v9 = vor.u32 %v9824_v61, %v9822_v59  ;;  %v3926_v56 = vshrl.u32 %v6337_v62, 16  ;;  %v3910_v6 = vsel %vm8447_vm5, %v3902_v24, %v3909_v30  ;;  %v499_v4 = vsel %vm8447_vm5, %v5983_v10, %v498_v11  ;;  %7211 = vmatpush3.bf16.msra.mxu0 %v7657_v52  ;;  %v6342_v12 = vld [vmem:[%s7807_s10 + $0x84] sm:$0xf]  ;;  %v6343_v11 = vld [vmem:[%s7807_s10 + $0x88] sm:$0xf]  ;;  %v9832_v59 = vld [vmem:[#allocation44_spill] sm:$0xff] }
  0xb9   : > { %v6375_v29 = vrot.slane %v3912_v16, 11  ;;  %v6406_v5 = vcombine.low %v3901_v35, %v3910_v6  ;;  %v3919_v32 = vrot.slane %v3917_v27, 7  ;;  %v3929_v42 = vshll.u32 %v6337_v62, 16  ;;  %7212 = vmatprep.subr.bf16.mxu0 %v7659_v7  ;;  %v9831_v10 = vld [vmem:[#allocation46_spill] sm:$0xff]  ;;  %v9835_v35 = vld [vmem:[#allocation45_spill] sm:$0xff] }
  0xba   : > { %v508_v50 = vsel %vm8447_vm5, %v500_v23, %v507_v9  ;;  %v3928_v26 = vrot.slane %v3926_v56, 7  ;;  %v510_v33 = vshrl.u32 %v211_v17, 16  ;;  %v9827_v20 = vshll.u32 %v9826_v31, 16  ;;  %5731 = vst [vmem:[%s9474_s16 + $0xdc] sm:$0xf] %v7740_v21 }
  0xbb   : > { %v6039_v3 = vcombine.low %v499_v4, %v508_v50  ;;  %v522_v15 = vrot.slane %v9825_v8, 4  ;;  %7179 = vmatmul.mubr.bf16.gmra.mrb[4].mxu0 %v6406_v5  ;;  %v3922_v57 = vor.u32 %v3920_v49, %v3919_v32  ;;  %v3924_v54 = vrot.slane %v3919_v32, 4  ;;  %5732 = vst [vmem:[%s9474_s16 + $0xe0] sm:$0xf] %v7740_v21  ;;  %5733 = vst [vmem:[%s9474_s16 + $0xe4] sm:$0xf] %v7740_v21 }
  0xbc   : > { %v520_v44 = vor.u32 %v9827_v20, %v9825_v8  ;;  %v9830_v60 = vshll.u32 %v9829_v46, 16  ;;  %v3934_v13 = vshrl.u32 %v6338_v39, 16  ;;  %v3931_v45 = vor.u32 %v3929_v42, %v3928_v26  ;;  %7213 = vmatpush3.bf16.msra.mxu0 %v7659_v7  ;;  %v9834_v7 = vld [vmem:[#allocation48_spill] sm:$0xff]  ;;  %5734 = vst [vmem:[%s9474_s16 + $0xe8] sm:$0xf] %v7740_v21 }
  0xbd   : > { %6958 = vmatprep.mubr.bf16.mxu1 %v6039_v3  ;;  %v5984_v18 = vrot.slane %v510_v33, 11  ;;  %v3939_v25 = vshrl.u32 %v6339_v40, 16  ;;  %v3942_v47 = vshll.u32 %v6339_v40, 16  ;;  %v3923_v48 = vsel %vm8447_vm5, %v6375_v29, %v3922_v57  ;;  %7214 = vmatprep.subr.bf16.mxu0 %v7661_v58  ;;  %v217_v29 = vld [vmem:[%s7807_s10 + $0xf0] sm:$0x8]  ;;  %v9838_v57 = vld [vmem:[#allocation47_spill] sm:$0xff] }
  0xbe   : > { %v529_v1 = vor.u32 %v9830_v60, %v9828_v19  ;;  %v6376_v43 = vrot.slane %v3934_v13, 11  ;;  %v3948_v52 = vshrl.u32 %v6340_v38, 16  ;;  %v3932_v51 = vsel %vm8447_vm5, %v3924_v54, %v3931_v45  ;;  %v6344_v40 = vld [vmem:[%s7807_s10 + $0x90] sm:$0x8]  ;;  %v6345_v20 = vld [vmem:[%s7807_s10 + $0x94] sm:$0xf] }
  0xbf   : > { %v521_v14 = vsel %vm8447_vm5, %v5984_v18, %v520_v44  ;;  %v3941_v0 = vrot.slane %v3939_v25, 7  ;;  %v3951_v62 = vshll.u32 %v6340_v38, 16  ;;  %v6407_v24 = vcombine.low %v3923_v48, %v3932_v51  ;;  %v7665_v44 = vld [vmem:[%s9708_s1 + $0x1f0] sm:$0xff]   ;;  %v6346_v60 = vld [vmem:[%s7807_s10 + $0x98] sm:$0xf]  ;;  %v9840_v45 = vld [vmem:[#allocation51_spill] sm:$0xff] }
  0xc0   : > { %v530_v22 = vsel %vm8447_vm5, %v522_v15, %v529_v1  ;;  %v3950_v34 = vrot.slane %v3948_v52, 7  ;;  %v532_v63 = vshrl.u32 %v214_v28, 16  ;;  %v9833_v41 = vshll.u32 %v9832_v59, 16  ;;  %7215 = vmatpush3.bf16.msra.mxu0 %v7661_v58  ;;  %v9837_v58 = vld [vmem:[#allocation50_spill] sm:$0xff]  ;;  %v9841_v18 = vld [vmem:[#allocation49_spill] sm:$0xff] }
  0xc1   : > { %v6040_v53 = vcombine.low %v521_v14, %v530_v22  ;;  %v3944_v23 = vor.u32 %v3942_v47, %v3941_v0  ;;  %v3946_v30 = vrot.slane %v3941_v0, 4  ;;  %v544_v9 = vrot.slane %v9831_v10, 4  ;;  %7182 = vmatprep.mubr.bf16.mxu0 %v6407_v24  ;;  %7216 = vmatprep.subr.bf16.mxu0 %v7663_v55  ;;  %v1186_v48 = vld [vmem:[%s7807_s10 + $0x4] sm:$0xf]  ;;  %v1187_v51 = vld [vmem:[%s7807_s10 + $0x8] sm:$0xf] }
  0xc2   : > { %v542_v61 = vor.u32 %v9833_v41, %v9831_v10  ;;  %v3953_v16 = vor.u32 %v3951_v62, %v3950_v34  ;;  %v5985_v17 = vrot.slane %v532_v63, 11  ;;  %v9836_v27 = vshll.u32 %v9835_v35, 16  ;;  %v7667_v14 = vld [vmem:[%s9708_s1 + $0x1f8] sm:$0xff]   ;;  %5735 = vst [vmem:[%s9474_s16 + $0xec] sm:$0xf] %v7740_v21 }
  0xc3   : > { %6959 = vmatmul.mubr.bf16.gmra.mrb[24].mxu1 %v6040_v53  ;;  %v3956_v56 = vshrl.u32 %v6341_v36, 16  ;;  %v3945_v39 = vsel %vm8447_vm5, %v6376_v43, %v3944_v23  ;;  %v3961_v6 = vshrl.u32 %v6342_v12, 16  ;;  %v3964_v4 = vshll.u32 %v6342_v12, 16  ;;  %v6347_v23 = vld [vmem:[%s7807_s10 + $0xa0] sm:$0x8] }
  0xc4   : > { %v551_v49 = vor.u32 %v9836_v27, %v9834_v7  ;;  %v3970_v50 = vshrl.u32 %v6343_v11, 16  ;;  %v3954_v5 = vsel %vm8447_vm5, %v3946_v30, %v3953_v16  ;;  %v543_v3 = vsel %vm8447_vm5, %v5985_v17, %v542_v61  ;;  %7217 = vmatpush3.bf16.msra.mxu0 %v7663_v55  ;;  %v6348_v61 = vld [vmem:[%s7807_s10 + $0xa4] sm:$0xf]  ;;  %5736 = vst [vmem:[%s9474_s16 + $0xf0] sm:$0xf] %v7740_v21 }
  0xc5   : > { %v6377_v26 = vrot.slane %v3956_v56, 11  ;;  %v6408_v42 = vcombine.low %v3945_v39, %v3954_v5  ;;  %v3963_v8 = vrot.slane %v3961_v6, 7  ;;  %v3973_v15 = vshll.u32 %v6343_v11, 16  ;;  %7218 = vmatprep.subr.bf16.mxu0 %v7665_v44  ;;  %v1188_v11 = vld [vmem:[%s7807_s10 + $0xc] sm:$0x1]  ;;  %v8780_v6 = vld [vmem:[%s9708_s1 + $0x200] sm:$0xff]  }
  0xc6   : > { %v552_v32 = vsel %vm8447_vm5, %v544_v9, %v551_v49  ;;  %v3972_v31 = vrot.slane %v3970_v50, 7  ;;  %v554_v38 = vshrl.u32 %v217_v29, 16  ;;  %v9839_v54 = vshll.u32 %v9838_v57, 16  ;;  %v6349_v39 = vld [vmem:[%s7807_s10 + $0xa8] sm:$0xf] }
  0xc7   : > { %v6041_v33 = vcombine.low %v543_v3, %v552_v32  ;;  %v566_v46 = vrot.slane %v9837_v58, 4  ;;  %7183 = vmatmul.mubr.bf16.gmra.mrb[8].mxu0 %v6408_v42  ;;  %v3966_v1 = vor.u32 %v3964_v4, %v3963_v8  ;;  %v3968_v13 = vrot.slane %v3963_v8, 4  ;;  %v1189_v3 = vld [vmem:[%s7807_s10 + $0x14] sm:$0xf]  ;;  %5737 = vst [vmem:[%s9474_s16 + $0xf4] sm:$0xf] %v7740_v21 }
  0xc8   : > { %v564_v19 = vor.u32 %v9839_v54, %v9837_v58  ;;  %v9842_v25 = vshll.u32 %v9841_v18, 16  ;;  %v3978_v28 = vshrl.u32 %v6344_v40, 16  ;;  %v3975_v22 = vor.u32 %v3973_v15, %v3972_v31  ;;  %7219 = vmatpush3.bf16.msra.mxu0 %v7665_v44  ;;  %5738 = vst [vmem:[%s9474_s16 + $0xf8] sm:$0xf] %v7740_v21  ;;  %5739 = vst [vmem:[%s9474_s16 + $0xfc] sm:$0xf] %v7740_v21 }
  0xc9   : > { %6962 = vmatprep.mubr.bf16.mxu1 %v6041_v33  ;;  %v5986_v43 = vrot.slane %v554_v38, 11  ;;  %v3983_v52 = vshrl.u32 %v6345_v20, 16  ;;  %v3986_v36 = vshll.u32 %v6345_v20, 16  ;;  %v3967_v0 = vsel %vm8447_vm5, %v6377_v26, %v3966_v1  ;;  %7220 = vmatprep.subr.bf16.mxu0 %v7667_v14  ;;  %v1190_v33 = vld [vmem:[%s7807_s10 + $0x18] sm:$0xf] }
  0xca   : > { %v573_v47 = vor.u32 %v9842_v25, %v9840_v45  ;;  %v6378_v12 = vrot.slane %v3978_v28, 11  ;;  %v3992_v24 = vshrl.u32 %v6346_v60, 16  ;;  %v3976_v53 = vsel %vm8447_vm5, %v3968_v13, %v3975_v22  ;;  %5740 = vst [vmem:[%s9474_s16 + $0x100] sm:$0xf] %v7740_v21  ;;  %5741 = vst [vmem:[%s9474_s16 + $0x104] sm:$0xf] %v7740_v21 }
  0xcb   : > { %v565_v55 = vsel %vm8447_vm5, %v5986_v43, %v564_v19  ;;  %v3985_v34 = vrot.slane %v3983_v52, 7  ;;  %v3995_v63 = vshll.u32 %v6346_v60, 16  ;;  %v6409_v30 = vcombine.low %v3967_v0, %v3976_v53  ;;  %v1191_v19 = vld [vmem:[%s7807_s10 + $0x1c] sm:$0x1]  ;;  %v6351_v52 = vld [vmem:[%s7807_s10 + $0xb4] sm:$0xf] }
  0xcc   : > { %v574_v62 = vsel %vm8447_vm5, %v566_v46, %v573_v47  ;;  %v3994_v59 = vrot.slane %v3992_v24, 7  ;;  %v1238_v41 = vshrl.u32 %v1186_v48, 16  ;;  %v1241_v17 = vshll.u32 %v1186_v48, 16  ;;  %7221 = vmatpush3.bf16.msra.mxu0 %v7667_v14  ;;  %v6350_v47 = vld [vmem:[%s7807_s10 + $0xb0] sm:$0x8] }
  0xcd   : > { %v6042_v10 = vcombine.low %v565_v55, %v574_v62  ;;  %v3988_v9 = vor.u32 %v3986_v36, %v3985_v34  ;;  %v3990_v16 = vrot.slane %v3985_v34, 4  ;;  %v1247_v7 = vshll.u32 %v1187_v51, 16  ;;  %7186 = vmatprep.mubr.bf16.mxu0 %v6409_v30  ;;  %7254 = vmatprep.subr.bf16.mxu0 %v8780_v6  ;;  %v6352_v53 = vld [vmem:[%s7807_s10 + $0xb8] sm:$0xf]  ;;  %v1192_v34 = vld [vmem:[%s7807_s10 + $0x24] sm:$0xf] }
  0xce   : > { %v3997_v35 = vor.u32 %v3995_v63, %v3994_v59  ;;  %v1240_v27 = vrot.slane %v1238_v41, 4  ;;  %v1251_v49 = vshrl.u32 %v1187_v51, 16  ;;  %v1257_v56 = vshll.u32 %v1188_v11, 16  ;;  %5742 = vst [vmem:[%s9474_s16 + $0x108] sm:$0xf] %v7740_v21 }
  0xcf   : > { %6963 = vmatmul.mubr.bf16.gmra.mrb[28].mxu1 %v6042_v10  ;;  %v3989_v4 = vsel %vm8447_vm5, %v6378_v12, %v3988_v9  ;;  %v1243_v50 = vrot.slane %v1241_v17, 5  ;;  %v1249_v29 = vrot.slane %v1247_v7, 5  ;;  %v4000_v5 = vshrl.u32 %v6347_v23, 16  ;;  %v1193_v10 = vld [vmem:[%s7807_s10 + $0x28] sm:$0xf] }
  0xd0   : > { %v3998_v32 = vsel %vm8447_vm5, %v3990_v16, %v3997_v35  ;;  %v1253_v26 = vrot.slane %v1251_v49, 4  ;;  %v1259_v40 = vrot.slane %v1257_v56, 5  ;;  %v4005_v42 = vshrl.u32 %v6348_v61, 16  ;;  %v1194_v49 = vld [vmem:[%s7807_s10 + $0x2c] sm:$0x1] }
  0xd1   : > { %v6410_v8 = vcombine.low %v3989_v4, %v3998_v32  ;;  %v1244_v31 = vor.u32 %v1243_v50, %v1240_v27  ;;  %v6379_v20 = vrot.slane %v4000_v5, 11  ;;  %v4008_v44 = vshll.u32 %v6348_v61, 16  ;;  %v6353_v32 = vld [vmem:[%s7807_s10 + $0xc0] sm:$0x8]  ;;  %5743 = vst [vmem:[%s9474_s16 + $0x10c] sm:$0xf] %v7740_v21 }
  0xd2   : > { %v1254_v15 = vor.u32 %v1253_v26, %v1249_v29  ;;  %v4007_v38 = vrot.slane %v4005_v42, 7  ;;  %v4014_v58 = vshrl.u32 %v6349_v39, 16  ;;  %v4017_v57 = vshll.u32 %v6349_v39, 16  ;;  %5744 = vst [vmem:[%s9474_s16 + $0x110] sm:$0xf] %v7740_v21 }
  0xd3   : > { %7187 = vmatmul.mubr.bf16.gmra.mrb[12].mxu0 %v6410_v8  ;;  %v1245_v54 = vrot.slane %v1244_v31, 4  ;;  %v1262_v46 = vshrl.u32 %v1189_v3, 16  ;;  %v1265_v60 = vshll.u32 %v1189_v3, 16  ;;  %v1271_v1 = vshll.u32 %v1190_v33, 16  ;;  %v8808_v8 = vld [vmem:[%s7807_s10 + $0xc4] sm:$0xf] }
  0xd4   : > { %v1255_v13 = vrot.slane %v1254_v15, 4  ;;  %v4010_v45 = vor.u32 %v4008_v44, %v4007_v38  ;;  %v4012_v18 = vrot.slane %v4007_v38, 4  ;;  %v4016_v25 = vrot.slane %v4014_v58, 7  ;;  %v8815_v38 = vld [vmem:[%s7807_s10 + $0xc8] sm:$0xf] }
  0xd5   : > { %v1250_v28 = vsel %vm8264_vm2, %v1245_v54, %v1249_v29  ;;  %v1264_v48 = vrot.slane %v1262_v46, 4  ;;  %v1267_v22 = vrot.slane %v1265_v60, 5  ;;  %v1273_v43 = vrot.slane %v1271_v1, 5  ;;  %v1195_v58 = vld [vmem:[%s7807_s10 + $0x34] sm:$0xf] }
  0xd6   : > { %v1260_v36 = vsel %vm8264_vm2, %v1255_v13, %v1259_v40  ;;  %v4011_v51 = vsel %vm8447_vm5, %v6379_v20, %v4010_v45  ;;  %v4019_v14 = vor.u32 %v4017_v57, %v4016_v25  ;;  %v1275_v0 = vshrl.u32 %v1190_v33, 16  ;;  %v7662_v57 = vld [vmem:[%s9708_s1 + $0xc8] sm:$0xff]   ;;  %v1196_v1 = vld [vmem:[%s7807_s10 + $0x38] sm:$0xf]  ;;  %5745 = vst [vmem:[%s9474_s16 + $0x114] sm:$0xf] %v7740_v21 }
  0xd7   : > { %v6067_v62 = vcombine.low %v1250_v28, %v1260_v36  ;;  %v1268_v12 = vor.u32 %v1267_v22, %v1264_v48  ;;  %v1281_v24 = vshll.u32 %v1191_v19, 16  ;;  %v4022_v55 = vshrl.u32 %v6350_v47, 16  ;;  %5746 = vst [vmem:[%s9474_s16 + $0x118] sm:$0xf] %v7740_v21  ;;  %5747 = vst [vmem:[%s9474_s16 + $0x11c] sm:$0xf] %v7740_v21 }
  0xd8   : > { %v4020_v63 = vsel %vm8447_vm5, %v4012_v18, %v4019_v14  ;;  %v1277_v11 = vrot.slane %v1275_v0, 4  ;;  %v4027_v23 = vshrl.u32 %v6351_v52, 16  ;;  %v4030_v30 = vshll.u32 %v6351_v52, 16 }
  0xd9   : > { %6982 = vmatprep.mubr.bf16.mxu1 %v6067_v62  ;;  %v6411_v59 = vcombine.low %v4011_v51, %v4020_v63  ;;  %v1269_v41 = vrot.slane %v1268_v12, 4  ;;  %v1283_v61 = vrot.slane %v1281_v24, 5  ;;  %v6380_v9 = vrot.slane %v4022_v55, 11  ;;  %v1197_v51 = vld [vmem:[%s7807_s10 + $0x3c] sm:$0x1] }
  0xda   : > { %v1278_v16 = vor.u32 %v1277_v11, %v1273_v43  ;;  %v4029_v17 = vrot.slane %v4027_v23, 7  ;;  %v4036_v7 = vshrl.u32 %v6352_v53, 16  ;;  %v4039_v35 = vshll.u32 %v6352_v53, 16  ;;  %v6356_v53 = vld [vmem:[%s7807_s10 + $0xd0] sm:$0x8] }
  0xdb   : > { %7190 = vmatprep.mubr.bf16.mxu0 %v6411_v59  ;;  %v1274_v27 = vsel %vm8264_vm2, %v1269_v41, %v1273_v43  ;;  %v1286_v56 = vshrl.u32 %v1192_v34, 16  ;;  %v1289_v39 = vshll.u32 %v1192_v34, 16  ;;  %v1295_v4 = vshll.u32 %v1193_v10, 16  ;;  %v8837_v23 = vld [vmem:[%s7807_s10 + $0xd4] sm:$0xf] }
  0xdc   : > { %v1279_v50 = vrot.slane %v1278_v16, 4  ;;  %v4032_v29 = vor.u32 %v4030_v30, %v4029_v17  ;;  %v4034_v5 = vrot.slane %v4029_v17, 4  ;;  %v4038_v3 = vrot.slane %v4036_v7, 7 }
  0xdd   : > { %v1288_v26 = vrot.slane %v1286_v56, 4  ;;  %v1291_v40 = vrot.slane %v1289_v39, 5  ;;  %v1297_v42 = vrot.slane %v1295_v4, 5  ;;  %v1299_v33 = vshrl.u32 %v1193_v10, 16 }
  0xde   : > { %v1284_v31 = vsel %vm8264_vm2, %v1279_v50, %v1283_v61  ;;  %v4033_v20 = vsel %vm8447_vm5, %v6380_v9, %v4032_v29  ;;  %v4041_v44 = vor.u32 %v4039_v35, %v4038_v3  ;;  %v1305_v15 = vshll.u32 %v1194_v49, 16  ;;  %v8842_v61 = vld [vmem:[%s7807_s10 + $0xd8] sm:$0xf]  ;;  %v1198_v35 = vld [vmem:[%s7807_s10 + $0x44] sm:$0xf] }
  0xdf   : > { %v6068_v54 = vcombine.low %v1274_v27, %v1284_v31  ;;  %v1292_v19 = vor.u32 %v1291_v40, %v1288_v26  ;;  %v1301_v46 = vrot.slane %v1299_v33, 4  ;;  %v4044_v60 = vshrl.u32 %v6353_v32, 16  ;;  %v1199_v27 = vld [vmem:[%s7807_s10 + $0x48] sm:$0xf]  ;;  %v7666_v50 = vld [vmem:[%s9708_s1 + $0xd8] sm:$0xff]  }
  0xe0   : > { %v4042_v13 = vsel %vm8447_vm5, %v4034_v5, %v4041_v44  ;;  %v1307_v45 = vrot.slane %v1305_v15, 5  ;;  %v4049_v18 = vshrl.u32 %v8808_v8, 16  ;;  %v4052_v25 = vshll.u32 %v8808_v8, 16  ;;  %v1200_v15 = vld [vmem:[%s7807_s10 + $0x4c] sm:$0x1] }
  0xe1   : > { %6983 = vmatmul.mubr.bf16.vlgmr.msra.gmra.mrb[0].mxu1 %v6068_v54  ;;  %v6412_v47 = vcombine.low %v4033_v20, %v4042_v13  ;;  %v1293_v28 = vrot.slane %v1292_v19, 4  ;;  %v1302_v48 = vor.u32 %v1301_v46, %v1297_v42  ;;  %v6381_v22 = vrot.slane %v4044_v60, 11  ;;  %v6359_v60 = vld [vmem:[%s7807_s10 + $0xe0] sm:$0x8] }
  0xe2   : > { %7015 = vmatpush3.bf16.msra.mxu1 %v8575_v2  ;;  %v4051_v43 = vrot.slane %v4049_v18, 7  ;;  %v4058_v52 = vshrl.u32 %v8815_v38, 16  ;;  %v4061_v36 = vshll.u32 %v8815_v38, 16  ;;  %v1310_v14 = vshrl.u32 %v1195_v58, 16  ;;  %v7664_v2 = vld [vmem:[%s9708_s1 + $0xd0] sm:$0xff]  }
  0xe3   : > { %7191 = vmatmul.mubr.bf16.gmra.mrb[16].mxu0 %v6412_v47  ;;  %v1298_v0 = vsel %vm8264_vm2, %v1293_v28, %v1297_v42  ;;  %v1303_v62 = vrot.slane %v1302_v48, 4  ;;  %v1313_v12 = vshll.u32 %v1195_v58, 16  ;;  %v1319_v24 = vshll.u32 %v1196_v1, 16  ;;  %7016 = vmatprep.subr.bf16.mxu1 %v7662_v57  ;;  %v8865_v47 = vld [vmem:[%s7807_s10 + $0xe4] sm:$0xf] }
  0xe4   : > { %v4054_v55 = vor.u32 %v4052_v25, %v4051_v43  ;;  %v4056_v34 = vrot.slane %v4051_v43, 4  ;;  %v4060_v63 = vrot.slane %v4058_v52, 7  ;;  %v1312_v11 = vrot.slane %v1310_v14, 4  ;;  %v8868_v28 = vld [vmem:[%s7807_s10 + $0xe8] sm:$0xf] }
  0xe5   : > { %v1308_v30 = vsel %vm8264_vm2, %v1303_v62, %v1307_v45  ;;  %v1315_v10 = vrot.slane %v1313_v12, 5  ;;  %v1321_v59 = vrot.slane %v1319_v24, 5  ;;  %v1323_v41 = vshrl.u32 %v1196_v1, 16  ;;  %v7669_v1 = vld [vmem:[%s9708_s1 + $0xe0] sm:$0xff]   ;;  %v1202_v12 = vld [vmem:[%s7807_s10 + $0x58] sm:$0xf] }
  0xe6   : > { %v6069_v9 = vcombine.low %v1298_v0, %v1308_v30  ;;  %v4055_v16 = vsel %vm8447_vm5, %v6381_v22, %v4054_v55  ;;  %v4063_v17 = vor.u32 %v4061_v36, %v4060_v63  ;;  %v1329_v7 = vshll.u32 %v1197_v51, 16  ;;  %7017 = vmatpush3.bf16.msra.mxu1 %v7662_v57  ;;  %v1201_v36 = vld [vmem:[%s7807_s10 + $0x54] sm:$0xf]  ;;  %v7673_v24 = vld [vmem:[%s9708_s1 + $0xe8] sm:$0xff]  }
  0xe7   : > { %v1316_v49 = vor.u32 %v1315_v10, %v1312_v11  ;;  %v1325_v56 = vrot.slane %v1323_v41, 4  ;;  %v4066_v39 = vshrl.u32 %v6356_v53, 16  ;;  %v4071_v4 = vshrl.u32 %v8837_v23, 16  ;;  %7018 = vmatprep.subr.bf16.mxu1 %v7664_v2 }
  0xe8   : > { %6986 = vmatprep.mubr.bf16.mxu1 %v6069_v9  ;;  %v4064_v29 = vsel %vm8447_vm5, %v4056_v34, %v4063_v17  ;;  %v1331_v5 = vrot.slane %v1329_v7, 5  ;;  %v4074_v3 = vshll.u32 %v8837_v23, 16  ;;  %v4080_v32 = vshrl.u32 %v8842_v61, 16 }
  0xe9   : > { %v6413_v26 = vcombine.low %v4055_v16, %v4064_v29  ;;  %v1317_v40 = vrot.slane %v1316_v49, 4  ;;  %v1326_v42 = vor.u32 %v1325_v56, %v1321_v59  ;;  %v6382_v33 = vrot.slane %v4066_v39, 11  ;;  %v6362_v29 = vld [vmem:[%s7807_s10 + $0xf0] sm:$0x8] }
  0xea   : > { %v4073_v31 = vrot.slane %v4071_v4, 7  ;;  %v4082_v20 = vrot.slane %v4080_v32, 7  ;;  %v4083_v44 = vshll.u32 %v8842_v61, 16  ;;  %v1334_v58 = vshrl.u32 %v1198_v35, 16  ;;  %7019 = vmatpush3.bf16.msra.mxu1 %v7664_v2 }
  0xeb   : > { %7194 = vmatprep.mubr.bf16.mxu0 %v6413_v26  ;;  %v1322_v57 = vsel %vm8264_vm2, %v1317_v40, %v1321_v59  ;;  %v1327_v54 = vrot.slane %v1326_v42, 4  ;;  %v1337_v19 = vshll.u32 %v1198_v35, 16  ;;  %v1343_v46 = vshll.u32 %v1199_v27, 16  ;;  %7020 = vmatprep.subr.bf16.mxu1 %v7666_v50  ;;  %v1203_v35 = vld [vmem:[%s7807_s10 + $0x5c] sm:$0x1] }
  0xec   : > { %v4076_v13 = vor.u32 %v4074_v3, %v4073_v31  ;;  %v4078_v45 = vrot.slane %v4073_v31, 4  ;;  %v4085_v18 = vor.u32 %v4083_v44, %v4082_v20  ;;  %v1336_v25 = vrot.slane %v1334_v58, 4  ;;  %v8893_v42 = vld [vmem:[%s7807_s10 + $0xf4] sm:$0xf]  ;;  %v1204_v58 = vld [vmem:[%s7807_s10 + $0x64] sm:$0xf] }
  0xed   : > { %v1332_v48 = vsel %vm8264_vm2, %v1327_v54, %v1331_v5  ;;  %v1339_v22 = vrot.slane %v1337_v19, 5  ;;  %v1345_v43 = vrot.slane %v1343_v46, 5  ;;  %v1347_v52 = vshrl.u32 %v1199_v27, 16  ;;  %v7677_v5 = vld [vmem:[%s9708_s1 + $0xf0] sm:$0xff]  }
  0xee   : > { %v6070_v51 = vcombine.low %v1322_v57, %v1332_v48  ;;  %v4077_v14 = vsel %vm8447_vm5, %v6382_v33, %v4076_v13  ;;  %v4086_v0 = vsel %vm8447_vm5, %v4078_v45, %v4085_v18  ;;  %v1353_v62 = vshll.u32 %v1200_v15, 16  ;;  %7021 = vmatpush3.bf16.msra.mxu1 %v7666_v50  ;;  %v8896_v33 = vld [vmem:[%s7807_s10 + $0xf8] sm:$0xf] }
  0xef   : > { %v6414_v53 = vcombine.low %v4077_v14, %v4086_v0  ;;  %v1340_v2 = vor.u32 %v1339_v22, %v1336_v25  ;;  %v1349_v55 = vrot.slane %v1347_v52, 4  ;;  %v4088_v34 = vshrl.u32 %v6359_v60, 16  ;;  %7022 = vmatprep.subr.bf16.mxu1 %v7669_v1  ;;  %v7681_v18 = vld [vmem:[%s9708_s1 + $0xf8] sm:$0xff]   ;;  %v1205_v52 = vld [vmem:[%s7807_s10 + $0x68] sm:$0xf] }
  0xf0   : > { %6987 = vmatmul.mubr.bf16.gmra.mrb[4].mxu1 %v6070_v51  ;;  %v1355_v63 = vrot.slane %v1353_v62, 5  ;;  %v4093_v11 = vshrl.u32 %v8865_v47, 16  ;;  %v4096_v30 = vshll.u32 %v8865_v47, 16  ;;  %v4102_v10 = vshrl.u32 %v8868_v28, 16  ;;  %v1206_v62 = vld [vmem:[%s7807_s10 + $0x6c] sm:$0x1] }
  0xf1   : > { %7195 = vmatmul.mubr.bf16.gmra.mrb[20].mxu0 %v6414_v53  ;;  %v1341_v59 = vrot.slane %v1340_v2, 4  ;;  %v1350_v41 = vor.u32 %v1349_v55, %v1345_v43  ;;  %v6383_v9 = vrot.slane %v4088_v34, 11  ;;  %v4105_v16 = vshll.u32 %v8868_v28, 16 }
  0xf2   : > { %v4095_v17 = vrot.slane %v4093_v11, 7  ;;  %v4104_v7 = vrot.slane %v4102_v10, 7  ;;  %v1358_v27 = vshrl.u32 %v1201_v36, 16  ;;  %v1361_v49 = vshll.u32 %v1201_v36, 16  ;;  %7023 = vmatpush3.bf16.msra.mxu1 %v7669_v1  ;;  %v8920_v10 = vld [vmem:[%s7807_s10 + $0x104] sm:$0xf] }
  0xf3   : > { %v1346_v56 = vsel %vm8264_vm2, %v1341_v59, %v1345_v43  ;;  %v1351_v39 = vrot.slane %v1350_v41, 4  ;;  %v1367_v4 = vshll.u32 %v1202_v12, 16  ;;  %v1371_v50 = vshrl.u32 %v1202_v12, 16  ;;  %7024 = vmatprep.subr.bf16.mxu1 %v7673_v24  ;;  %v6365_v12 = vld [vmem:[%s7807_s10 + $0x100] sm:$0x8] }
  0xf4   : > { %v4098_v3 = vor.u32 %v4096_v30, %v4095_v17  ;;  %v4100_v32 = vrot.slane %v4095_v17, 4  ;;  %v4107_v26 = vor.u32 %v4105_v16, %v4104_v7  ;;  %v1360_v40 = vrot.slane %v1358_v27, 4  ;;  %v8923_v17 = vld [vmem:[%s7807_s10 + $0x108] sm:$0xf] }
  0xf5   : > { %v1356_v31 = vsel %vm8264_vm2, %v1351_v39, %v1355_v63  ;;  %v1363_v20 = vrot.slane %v1361_v49, 5  ;;  %v1369_v44 = vrot.slane %v1367_v4, 5  ;;  %v1373_v15 = vrot.slane %v1371_v50, 4 }
  0xf6   : > { %v6071_v57 = vcombine.low %v1346_v56, %v1356_v31  ;;  %v4099_v54 = vsel %vm8447_vm5, %v6383_v9, %v4098_v3  ;;  %v4108_v19 = vsel %vm8447_vm5, %v4100_v32, %v4107_v26  ;;  %v1377_v46 = vshll.u32 %v1203_v35, 16  ;;  %7025 = vmatpush3.bf16.msra.mxu1 %v7673_v24 }
  0xf7   : > { %v6415_v60 = vcombine.low %v4099_v54, %v4108_v19  ;;  %v1364_v1 = vor.u32 %v1363_v20, %v1360_v40  ;;  %v1374_v13 = vor.u32 %v1373_v15, %v1369_v44  ;;  %v4110_v45 = vshrl.u32 %v6362_v29, 16  ;;  %7026 = vmatprep.subr.bf16.mxu1 %v7677_v5  ;;  %v1207_v29 = vld [vmem:[%s7807_s10 + $0x74] sm:$0xf] }
  0xf8   : > { %6990 = vmatprep.mubr.bf16.mxu1 %v6071_v57  ;;  %v1379_v25 = vrot.slane %v1377_v46, 5  ;;  %v4115_v48 = vshrl.u32 %v8893_v42, 16  ;;  %v4118_v22 = vshll.u32 %v8893_v42, 16  ;;  %v4124_v43 = vshrl.u32 %v8896_v33, 16  ;;  %v8938_v57 = vld [vmem:[%s9708_s1 + $0x100] sm:$0xff]  }
  0xf9   : > { %7198 = vmatprep.mubr.bf16.mxu0 %v6415_v60  ;;  %v1365_v36 = vrot.slane %v1364_v1, 4  ;;  %v1375_v51 = vrot.slane %v1374_v13, 4  ;;  %v6384_v14 = vrot.slane %v4110_v45, 11  ;;  %v4127_v0 = vshll.u32 %v8896_v33, 16  ;;  %v6368_v1 = vld [vmem:[%s7807_s10 + $0x110] sm:$0x8] }
  0xfa   : > { %v4117_v24 = vrot.slane %v4115_v48, 7  ;;  %v4126_v53 = vrot.slane %v4124_v43, 7  ;;  %v1382_v2 = vshrl.u32 %v1204_v58, 16  ;;  %v1385_v55 = vshll.u32 %v1204_v58, 16  ;;  %7027 = vmatpush3.bf16.msra.mxu1 %v7677_v5  ;;  %v1208_v5 = vld [vmem:[%s7807_s10 + $0x78] sm:$0xf] }
  0xfb   : > { %v1370_v34 = vsel %vm8264_vm2, %v1365_v36, %v1369_v44  ;;  %v1380_v63 = vsel %vm8264_vm2, %v1375_v51, %v1379_v25  ;;  %v1391_v11 = vshll.u32 %v1205_v52, 16  ;;  %v1395_v30 = vshrl.u32 %v1205_v52, 16  ;;  %7028 = vmatprep.subr.bf16.mxu1 %v7681_v18  ;;  %v1209_v58 = vld [vmem:[%s7807_s10 + $0x7c] sm:$0x1]  ;;  %v8948_v36 = vld [vmem:[%s7807_s10 + $0x114] sm:$0xf] }
  0xfc   : > { %v6072_v59 = vcombine.low %v1370_v34, %v1380_v63  ;;  %v4120_v41 = vor.u32 %v4118_v22, %v4117_v24  ;;  %v4122_v9 = vrot.slane %v4117_v24, 4  ;;  %v4129_v16 = vor.u32 %v4127_v0, %v4126_v53 }
  0xfd   : > { %v1384_v7 = vrot.slane %v1382_v2, 4  ;;  %v1387_v35 = vrot.slane %v1385_v55, 5  ;;  %v1393_v27 = vrot.slane %v1391_v11, 5  ;;  %v1397_v49 = vrot.slane %v1395_v30, 4  ;;  %v8953_v55 = vld [vmem:[%s7807_s10 + $0x118] sm:$0xf] }
  0xfe   : > { %6991 = vmatmul.mubr.bf16.gmra.mrb[8].mxu1 %v6072_v59  ;;  %v4121_v56 = vsel %vm8447_vm5, %v6384_v14, %v4120_v41  ;;  %v4130_v39 = vsel %vm8447_vm5, %v4122_v9, %v4129_v16  ;;  %v1401_v4 = vshll.u32 %v1206_v62, 16  ;;  %v4132_v50 = vshrl.u32 %v6365_v12, 16  ;;  %v1210_v59 = vld [vmem:[%s7807_s10 + $0x84] sm:$0xf] }
  0xff   : > { %v6416_v3 = vcombine.low %v4121_v56, %v4130_v39  ;;  %v1388_v32 = vor.u32 %v1387_v35, %v1384_v7  ;;  %v1398_v26 = vor.u32 %v1397_v49, %v1393_v27  ;;  %v4137_v40 = vshrl.u32 %v8920_v10, 16  ;;  %7029 = vmatpush3.bf16.msra.mxu1 %v7681_v18  ;;  %v1211_v39 = vld [vmem:[%s7807_s10 + $0x88] sm:$0xf] }
 0x100   : > { %v1403_v31 = vrot.slane %v1401_v4, 5  ;;  %v6385_v20 = vrot.slane %v4132_v50, 11  ;;  %v4140_v44 = vshll.u32 %v8920_v10, 16  ;;  %v4146_v15 = vshrl.u32 %v8923_v17, 16  ;;  %7302 = vmatprep.subr.bf16.mxu1 %v8938_v57 }
 0x101   : > { %7199 = vmatmul.mubr.bf16.gmra.mrb[24].mxu0 %v6416_v3  ;;  %v1389_v54 = vrot.slane %v1388_v32, 4  ;;  %v1399_v19 = vrot.slane %v1398_v26, 4  ;;  %v4139_v46 = vrot.slane %v4137_v40, 7  ;;  %v4149_v60 = vshll.u32 %v8923_v17, 16 }
 0x102   : > { %v4148_v13 = vrot.slane %v4146_v15, 7  ;;  %v1406_v45 = vshrl.u32 %v1207_v29, 16  ;;  %v1409_v18 = vshll.u32 %v1207_v29, 16  ;;  %v1415_v25 = vshll.u32 %v1208_v5, 16  ;;  %v1212_v29 = vld [vmem:[%s7807_s10 + $0x8c] sm:$0x1] }
 0x103   : > { %v1394_v48 = vsel %vm8264_vm2, %v1389_v54, %v1393_v27  ;;  %v1404_v22 = vsel %vm8264_vm2, %v1399_v19, %v1403_v31  ;;  %v4142_v43 = vor.u32 %v4140_v44, %v4139_v46  ;;  %v4144_v52 = vrot.slane %v4139_v46, 4 }
 0x104   : > { %v6073_v51 = vcombine.low %v1394_v48, %v1404_v22  ;;  %v4151_v14 = vor.u32 %v4149_v60, %v4148_v13  ;;  %v1408_v0 = vrot.slane %v1406_v45, 4  ;;  %v1411_v62 = vrot.slane %v1409_v18, 5  ;;  %v7706_v48 = vld [vmem:[%s7807_s10 + $0x28] sm:$0xf] }
 0x105   : > { %v4143_v12 = vsel %vm8447_vm5, %v6385_v20, %v4142_v43  ;;  %v1417_v24 = vrot.slane %v1415_v25, 5  ;;  %v1419_v53 = vshrl.u32 %v1208_v5, 16  ;;  %v1425_v2 = vshll.u32 %v1209_v58, 16  ;;  %v7705_v25 = vld [vmem:[%s7807_s10 + $0x24] sm:$0xf] }
 0x106   : > { %6994 = vmatprep.mubr.bf16.mxu1 %v6073_v51  ;;  %v4152_v34 = vsel %vm8447_vm5, %v4144_v52, %v4151_v14  ;;  %v1412_v63 = vor.u32 %v1411_v62, %v1408_v0  ;;  %v4154_v11 = vshrl.u32 %v6368_v1, 16  ;;  %v4159_v30 = vshrl.u32 %v8948_v36, 16  ;;  %v1213_v1 = vld [vmem:[%s7807_s10 + $0x94] sm:$0xf]  ;;  %v1214_v43 = vld [vmem:[%s7807_s10 + $0x98] sm:$0xf] }
 0x107   : > { %v6417_v41 = vcombine.low %v4143_v12, %v4152_v34  ;;  %v1421_v9 = vrot.slane %v1419_v53, 4  ;;  %v1427_v16 = vrot.slane %v1425_v2, 5  ;;  %v4162_v7 = vshll.u32 %v8948_v36, 16  ;;  %v1215_v52 = vld [vmem:[%s7807_s10 + $0x9c] sm:$0x1] }
 0x108   : > { %v1413_v35 = vrot.slane %v1412_v63, 4  ;;  %v6386_v27 = vrot.slane %v4154_v11, 11  ;;  %v4161_v49 = vrot.slane %v4159_v30, 7  ;;  %v4168_v56 = vshrl.u32 %v8953_v55, 16  ;;  %v1216_v34 = vld [vmem:[%s7807_s10 + $0xa4] sm:$0xf] }
 0x109   : > { %7202 = vmatprep.mubr.bf16.mxu0 %v6417_v41  ;;  %v1422_v4 = vor.u32 %v1421_v9, %v1417_v24  ;;  %v4171_v50 = vshll.u32 %v8953_v55, 16  ;;  %v1430_v5 = vshrl.u32 %v1210_v59, 16  ;;  %v1433_v3 = vshll.u32 %v1210_v59, 16  ;;  %v1217_v41 = vld [vmem:[%s7807_s10 + $0xa8] sm:$0xf] }
 0x10a   : > { %v1418_v32 = vsel %vm8264_vm2, %v1413_v35, %v1417_v24  ;;  %v4164_v26 = vor.u32 %v4162_v7, %v4161_v49  ;;  %v4166_v40 = vrot.slane %v4161_v49, 4  ;;  %v4170_v31 = vrot.slane %v4168_v56, 7  ;;  %v7707_v35 = vld [vmem:[%s7807_s10 + $0x34] sm:$0xf]  ;;  %v1218_v56 = vld [vmem:[%s7807_s10 + $0xac] sm:$0x1] }
 0x10b   : > { %v1423_v20 = vrot.slane %v1422_v4, 4  ;;  %v1432_v44 = vrot.slane %v1430_v5, 4  ;;  %v1435_v15 = vrot.slane %v1433_v3, 5  ;;  %v1439_v58 = vshll.u32 %v1211_v39, 16 }
 0x10c   : > { %v4165_v54 = vsel %vm8447_vm5, %v6386_v27, %v4164_v26  ;;  %v4173_v19 = vor.u32 %v4171_v50, %v4170_v31  ;;  %v1443_v46 = vshrl.u32 %v1211_v39, 16  ;;  %v1449_v60 = vshll.u32 %v1212_v29, 16  ;;  %v7708_v27 = vld [vmem:[%s7807_s10 + $0x38] sm:$0xf] }
 0x10d   : > { %v1428_v13 = vsel %vm8264_vm2, %v1423_v20, %v1427_v16  ;;  %v1436_v45 = vor.u32 %v1435_v15, %v1432_v44  ;;  %v1441_v18 = vrot.slane %v1439_v58, 5  ;;  %v6443_v22 = vcombine.low %v7705_v25, %v7706_v48  ;;  %v1219_v15 = vld [vmem:[%s7807_s10 + $0xb4] sm:$0xf] }
 0x10e   : > { %v6074_v51 = vcombine.low %v1418_v32, %v1428_v13  ;;  %v4174_v14 = vsel %vm8447_vm5, %v4166_v40, %v4173_v19  ;;  %v1445_v0 = vrot.slane %v1443_v46, 4  ;;  %v1451_v62 = vrot.slane %v1449_v60, 5  ;;  %v1220_v60 = vld [vmem:[%s7807_s10 + $0xb8] sm:$0xf] }
 0x10f   : > { %v6418_v12 = vcombine.low %v4165_v54, %v4174_v14  ;;  %v1437_v24 = vrot.slane %v1436_v45, 4  ;;  %v1454_v53 = vshrl.u32 %v1213_v1, 16  ;;  %v1457_v2 = vshll.u32 %v1213_v1, 16 }
 0x110   : > { %6995 = vmatmul.mubr.bf16.gmra.mrb[12].mxu1 %v6074_v51  ;;  %v1446_v63 = vor.u32 %v1445_v0, %v1441_v18  ;;  %v1463_v11 = vshll.u32 %v1214_v43, 16  ;;  %v1467_v30 = vshrl.u32 %v1214_v43, 16  ;;  %v1473_v59 = vshll.u32 %v1215_v52, 16  ;;  %v7710_v43 = vld [vmem:[%s7807_s10 + $0x48] sm:$0xf] }
 0x111   : > { %7203 = vmatmul.mubr.bf16.gmra.mrb[28].mxu0 %v6418_v12  ;;  %v1442_v9 = vsel %vm8264_vm2, %v1437_v24, %v1441_v18  ;;  %v1456_v16 = vrot.slane %v1454_v53, 4  ;;  %v1459_v7 = vrot.slane %v1457_v2, 5  ;;  %v6444_v49 = vcombine.low %v7707_v35, %v7708_v27  ;;  %v1221_v51 = vld [vmem:[%s7807_s10 + $0xbc] sm:$0x1]  ;;  %v7675_v0 = vld [vmem:[%s9708_s1 + $0x208] sm:$0xff]  }
 0x112   : > { %v1447_v39 = vrot.slane %v1446_v63, 4  ;;  %7222 = vmatprep.mubr.bf16.mxu0 %v6443_v22  ;;  %v1465_v4 = vrot.slane %v1463_v11, 5  ;;  %v1469_v50 = vrot.slane %v1467_v30, 4  ;;  %v1475_v29 = vrot.slane %v1473_v59, 5  ;;  %v7709_v22 = vld [vmem:[%s7807_s10 + $0x44] sm:$0xf] }
 0x113   : > { %v1460_v5 = vor.u32 %v1459_v7, %v1456_v16  ;;  %v1478_v3 = vshrl.u32 %v1216_v34, 16  ;;  %v1481_v32 = vshll.u32 %v1216_v34, 16  ;;  %v1487_v26 = vshll.u32 %v1217_v41, 16  ;;  %v1222_v2 = vld [vmem:[%s7807_s10 + $0xc4] sm:$0xf] }
 0x114   : > { %v1452_v40 = vsel %vm8264_vm2, %v1447_v39, %v1451_v62  ;;  %v1470_v31 = vor.u32 %v1469_v50, %v1465_v4  ;;  %v1491_v20 = vshrl.u32 %v1217_v41, 16  ;;  %v1497_v44 = vshll.u32 %v1218_v56, 16  ;;  %v1223_v7 = vld [vmem:[%s7807_s10 + $0xc8] sm:$0xf]  ;;  %v7711_v56 = vld [vmem:[%s7807_s10 + $0x54] sm:$0xf] }
 0x115   : > { %v6075_v58 = vcombine.low %v1442_v9, %v1452_v40  ;;  %v1461_v54 = vrot.slane %v1460_v5, 4  ;;  %v1480_v19 = vrot.slane %v1478_v3, 4  ;;  %v1483_v46 = vrot.slane %v1481_v32, 5 }
 0x116   : > { %v1471_v1 = vrot.slane %v1470_v31, 4  ;;  %v1489_v13 = vrot.slane %v1487_v26, 5  ;;  %v1493_v45 = vrot.slane %v1491_v20, 4  ;;  %v1499_v18 = vrot.slane %v1497_v44, 5  ;;  %v1225_v26 = vld [vmem:[%s7807_s10 + $0xd4] sm:$0xf] }
 0x117   : > { %6998 = vmatprep.mubr.bf16.mxu1 %v6075_v58  ;;  %v1466_v25 = vsel %vm8264_vm2, %v1461_v54, %v1465_v4  ;;  %v1484_v48 = vor.u32 %v1483_v46, %v1480_v19  ;;  %v6445_v52 = vcombine.low %v7709_v22, %v7710_v43  ;;  %v1502_v14 = vshrl.u32 %v1219_v15, 16  ;;  %v1224_v4 = vld [vmem:[%s7807_s10 + $0xcc] sm:$0x1]  ;;  %v1226_v46 = vld [vmem:[%s7807_s10 + $0xd8] sm:$0xf] }
 0x118   : > { %v1476_v62 = vsel %vm8264_vm2, %v1471_v1, %v1475_v29  ;;  %v1494_v12 = vor.u32 %v1493_v45, %v1489_v13  ;;  %v1505_v24 = vshll.u32 %v1219_v15, 16  ;;  %v1511_v53 = vshll.u32 %v1220_v60, 16  ;;  %v7714_v45 = vld [vmem:[%s7807_s10 + $0x68] sm:$0xf] }
 0x119   : > { %v6076_v34 = vcombine.low %v1466_v25, %v1476_v62  ;;  %7223 = vmatmul.mubr.bf16.vlgmr.msra.gmra.mrb[0].mxu0 %v6444_v49  ;;  %v1485_v63 = vrot.slane %v1484_v48, 4  ;;  %v1504_v11 = vrot.slane %v1502_v14, 4  ;;  %v1515_v30 = vshrl.u32 %v1220_v60, 16  ;;  %v7712_v49 = vld [vmem:[%s7807_s10 + $0x58] sm:$0xf] }
 0x11a   : > { %7255 = vmatpush3.bf16.msra.mxu0 %v8780_v6  ;;  %v1495_v59 = vrot.slane %v1494_v12, 4  ;;  %7226 = vmatprep.mubr.bf16.mxu0 %v6445_v52  ;;  %v1507_v41 = vrot.slane %v1505_v24, 5  ;;  %v1513_v9 = vrot.slane %v1511_v53, 5  ;;  %v1521_v16 = vshll.u32 %v1221_v51, 16  ;;  %v7679_v6 = vld [vmem:[%s9708_s1 + $0x210] sm:$0xff]   ;;  %v7683_v48 = vld [vmem:[%s9708_s1 + $0x218] sm:$0xff]  }
 0x11b   : > { %6999 = vmatmul.mubr.bf16.gmra.mrb[16].mxu1 %v6076_v34  ;;  %v1490_v35 = vsel %vm8264_vm2, %v1485_v63, %v1489_v13  ;;  %v1517_v27 = vrot.slane %v1515_v30, 4  ;;  %v6446_v39 = vcombine.low %v7711_v56, %v7712_v49  ;;  %7256 = vmatprep.subr.bf16.mxu0 %v7675_v0  ;;  %v1526_v50 = vshrl.u32 %v1222_v2, 16  ;;  %v7713_v13 = vld [vmem:[%s7807_s10 + $0x64] sm:$0xf]  ;;  %v1227_v14 = vld [vmem:[%s7807_s10 + $0xdc] sm:$0x1] }
 0x11c   : > { %v1500_v29 = vsel %vm8264_vm2, %v1495_v59, %v1499_v18  ;;  %v1508_v5 = vor.u32 %v1507_v41, %v1504_v11  ;;  %v1523_v3 = vrot.slane %v1521_v16, 5  ;;  %v1529_v32 = vshll.u32 %v1222_v2, 16  ;;  %v1228_v53 = vld [vmem:[%s7807_s10 + $0xe4] sm:$0xf]  ;;  %v1229_v30 = vld [vmem:[%s7807_s10 + $0xe8] sm:$0xf] }
 0x11d   : > { %v6077_v40 = vcombine.low %v1490_v35, %v1500_v29  ;;  %v1518_v31 = vor.u32 %v1517_v27, %v1513_v9  ;;  %v1528_v20 = vrot.slane %v1526_v50, 4  ;;  %v1535_v44 = vshll.u32 %v1223_v7, 16  ;;  %v7715_v16 = vld [vmem:[%s7807_s10 + $0x74] sm:$0xf]  ;;  %v7686_v27 = vld [vmem:[%s9708_s1 + $0x220] sm:$0xff]  }
 0x11e   : > { %v1509_v15 = vrot.slane %v1508_v5, 4  ;;  %7257 = vmatpush3.bf16.msra.mxu0 %v7675_v0  ;;  %v1531_v58 = vrot.slane %v1529_v32, 5  ;;  %v1539_v54 = vshrl.u32 %v1223_v7, 16  ;;  %v1545_v19 = vshll.u32 %v1224_v4, 16  ;;  %v7716_v7 = vld [vmem:[%s7807_s10 + $0x78] sm:$0xf] }
 0x11f   : > { %7002 = vmatprep.mubr.bf16.mxu1 %v6077_v40  ;;  %v1519_v60 = vrot.slane %v1518_v31, 4  ;;  %v1537_v1 = vrot.slane %v1535_v44, 5  ;;  %v6447_v18 = vcombine.low %v7713_v13, %v7714_v45  ;;  %v1550_v25 = vshrl.u32 %v1225_v26, 16  ;;  %7258 = vmatprep.subr.bf16.mxu0 %v7679_v6  ;;  %v1230_v29 = vld [vmem:[%s7807_s10 + $0xec] sm:$0x1] }
 0x120   : > { %v1514_v22 = vsel %vm8264_vm2, %v1509_v15, %v1513_v9  ;;  %v1532_v43 = vor.u32 %v1531_v58, %v1528_v20  ;;  %v1541_v52 = vrot.slane %v1539_v54, 4  ;;  %v1547_v51 = vrot.slane %v1545_v19, 5  ;;  %v1231_v20 = vld [vmem:[%s7807_s10 + $0xf4] sm:$0xf]  ;;  %v1232_v19 = vld [vmem:[%s7807_s10 + $0xf8] sm:$0xf] }
 0x121   : > { %v1524_v0 = vsel %vm8264_vm2, %v1519_v60, %v1523_v3  ;;  %7227 = vmatmul.mubr.bf16.gmra.mrb[4].mxu0 %v6446_v39  ;;  %v1552_v62 = vrot.slane %v1550_v25, 4  ;;  %v1553_v12 = vshll.u32 %v1225_v26, 16  ;;  %v1559_v24 = vshll.u32 %v1226_v46, 16  ;;  %v7717_v45 = vld [vmem:[%s7807_s10 + $0x84] sm:$0xf] }
 0x122   : > { %v6078_v2 = vcombine.low %v1514_v22, %v1524_v0  ;;  %v1533_v34 = vrot.slane %v1532_v43, 4  ;;  %v1542_v63 = vor.u32 %v1541_v52, %v1537_v1  ;;  %7230 = vmatprep.mubr.bf16.mxu0 %v6447_v18  ;;  %v1563_v11 = vshrl.u32 %v1226_v46, 16  ;;  %7259 = vmatpush3.bf16.msra.mxu0 %v7679_v6  ;;  %v7689_v46 = vld [vmem:[%s9708_s1 + $0x228] sm:$0xff]   ;;  %v1233_v43 = vld [vmem:[%s7807_s10 + $0xfc] sm:$0x1] }
 0x123   : > { %v1555_v59 = vrot.slane %v1553_v12, 5  ;;  %v1561_v41 = vrot.slane %v1559_v24, 5  ;;  %v1569_v9 = vshll.u32 %v1227_v14, 16  ;;  %v6448_v35 = vcombine.low %v7715_v16, %v7716_v7  ;;  %7260 = vmatprep.subr.bf16.mxu0 %v7683_v48  ;;  %v7718_v18 = vld [vmem:[%s7807_s10 + $0x88] sm:$0xf] }
 0x124   : > { %7003 = vmatmul.mubr.bf16.gmra.mrb[20].mxu1 %v6078_v2  ;;  %v1538_v56 = vsel %vm8264_vm2, %v1533_v34, %v1537_v1  ;;  %v1543_v49 = vrot.slane %v1542_v63, 4  ;;  %v1565_v39 = vrot.slane %v1563_v11, 4  ;;  %v1574_v4 = vshrl.u32 %v1228_v53, 16  ;;  %v6091_v24 = vld [vmem:[%s7807_s10 + $0x10] sm:$0x8] }
 0x125   : > { %v1556_v50 = vor.u32 %v1555_v59, %v1552_v62  ;;  %v1571_v6 = vrot.slane %v1569_v9, 5  ;;  %v1577_v5 = vshll.u32 %v1228_v53, 16  ;;  %v1583_v3 = vshll.u32 %v1229_v30, 16  ;;  %v7692_v11 = vld [vmem:[%s9708_s1 + $0x230] sm:$0xff]  }
 0x126   : > { %v1548_v32 = vsel %vm8264_vm2, %v1543_v49, %v1547_v51  ;;  %v1566_v26 = vor.u32 %v1565_v39, %v1561_v41  ;;  %v1576_v40 = vrot.slane %v1574_v4, 4  ;;  %v1587_v31 = vshrl.u32 %v1229_v30, 16  ;;  %7261 = vmatpush3.bf16.msra.mxu0 %v7683_v48  ;;  %v6094_v39 = vld [vmem:[%s7807_s10 + $0x20] sm:$0x8] }
 0x127   : > { %v6079_v44 = vcombine.low %v1538_v56, %v1548_v32  ;;  %v1557_v15 = vrot.slane %v1556_v50, 4  ;;  %v1579_v58 = vrot.slane %v1577_v5, 5  ;;  %v1585_v54 = vrot.slane %v1583_v3, 5  ;;  %7262 = vmatprep.subr.bf16.mxu0 %v7686_v27  ;;  %v9844_v5 = vld [vmem:[#allocation2_spill] sm:$0xff] }
 0x128   : > { %v1567_v60 = vrot.slane %v1566_v26, 4  ;;  %v1589_v1 = vrot.slane %v1587_v31, 4  ;;  %v1593_v13 = vshll.u32 %v1230_v29, 16  ;;  %v6449_v25 = vcombine.low %v7717_v45, %v7718_v18  ;;  %v9843_v29 = vld [vmem:[#allocation11_spill] sm:$0xff]  ;;  %v6097_v26 = vld [vmem:[%s7807_s10 + $0x30] sm:$0x8] }
 0x129   : > { %7006 = vmatprep.mubr.bf16.mxu1 %v6079_v44  ;;  %v1562_v48 = vsel %vm8264_vm2, %v1557_v15, %v1561_v41  ;;  %7231 = vmatmul.mubr.bf16.gmra.mrb[8].mxu0 %v6448_v35  ;;  %v1580_v22 = vor.u32 %v1579_v58, %v1576_v40  ;;  %v1598_v52 = vshrl.u32 %v1231_v20, 16  ;;  %v1601_v51 = vshll.u32 %v1231_v20, 16  ;;  %v7719_v35 = vld [vmem:[%s7807_s10 + $0x94] sm:$0xf]  ;;  %v7721_v44 = vld [vmem:[%s7807_s10 + $0xa4] sm:$0xf] }
 0x12a   : > { %v1572_v14 = vsel %vm8264_vm2, %v1567_v60, %v1571_v6  ;;  %v1590_v0 = vor.u32 %v1589_v1, %v1585_v54  ;;  %v1595_v62 = vrot.slane %v1593_v13, 5  ;;  %7234 = vmatprep.mubr.bf16.mxu0 %v6449_v25  ;;  %v1607_v12 = vshll.u32 %v1232_v19, 16  ;;  %7263 = vmatpush3.bf16.msra.mxu0 %v7686_v27  ;;  %v7720_v27 = vld [vmem:[%s7807_s10 + $0x98] sm:$0xf]  ;;  %v7722_v15 = vld [vmem:[%s7807_s10 + $0xa8] sm:$0xf] }
 0x12b   : > { %v6080_v53 = vcombine.low %v1562_v48, %v1572_v14  ;;  %v1581_v2 = vrot.slane %v1580_v22, 4  ;;  %v1600_v34 = vrot.slane %v1598_v52, 4  ;;  %v1603_v63 = vrot.slane %v1601_v51, 5  ;;  %7264 = vmatprep.subr.bf16.mxu0 %v7689_v46  ;;  %v9846_v1 = vld [vmem:[#allocation21_spill] sm:$0xff]  ;;  %v9847_v13 = vld [vmem:[#allocation3_spill] sm:$0xff]  ;;  %v9849_v52 = vld [vmem:[#allocation10_spill] sm:$0xff] }
 0x12c   : > { %v1591_v30 = vrot.slane %v1590_v0, 4  ;;  %v1609_v59 = vrot.slane %v1607_v12, 5  ;;  %v1611_v41 = vshrl.u32 %v1232_v19, 16  ;;  %v1617_v9 = vshll.u32 %v1233_v43, 16  ;;  %v7724_v25 = vld [vmem:[%s7807_s10 + $0xb8] sm:$0xf] }
 0x12d   : > { %7007 = vmatmul.mubr.bf16.gmra.mrb[24].mxu1 %v6080_v53  ;;  %v1586_v16 = vsel %vm8264_vm2, %v1581_v2, %v1585_v54  ;;  %v1604_v7 = vor.u32 %v1603_v63, %v1600_v34  ;;  %v6450_v56 = vcombine.low %v7719_v35, %v7720_v27  ;;  %v1993_v49 = vshrl.u32 %v6091_v24, 16  ;;  %v7695_v54 = vld [vmem:[%s9708_s1 + $0x238] sm:$0xff]   ;;  %v6100_v22 = vld [vmem:[%s7807_s10 + $0x40] sm:$0x8] }
 0x12e   : > { %v1596_v4 = vsel %vm8264_vm2, %v1591_v30, %v1595_v62  ;;  %v1613_v50 = vrot.slane %v1611_v41, 4  ;;  %v1619_v6 = vrot.slane %v1617_v9, 5  ;;  %v9845_v3 = vrot.slane %v9844_v5, 4  ;;  %7265 = vmatpush3.bf16.msra.mxu0 %v7689_v46  ;;  %v7723_v46 = vld [vmem:[%s7807_s10 + $0xb4] sm:$0xf]  ;;  %v9850_v0 = vld [vmem:[#allocation6_spill] sm:$0xff] }
 0x12f   : > { %v6081_v40 = vcombine.low %v1586_v16, %v1596_v4  ;;  %v1605_v31 = vrot.slane %v1604_v7, 4  ;;  %v6139_v20 = vrot.slane %v1993_v49, 11  ;;  %v6451_v58 = vcombine.low %v7721_v44, %v7722_v15  ;;  %7266 = vmatprep.subr.bf16.mxu0 %v7692_v11  ;;  %v9851_v62 = vld [vmem:[#allocation4_spill] sm:$0xff]  ;;  %v9854_v41 = vld [vmem:[#allocation5_spill] sm:$0xff]  ;;  %v9858_v4 = vld [vmem:[#allocation7_spill] sm:$0xff] }
 0x130   : > { %v2013_v32 = vsel %vm8447_vm5, %v9845_v3, %v9843_v29  ;;  %v1614_v19 = vor.u32 %v1613_v50, %v1609_v59  ;;  %v2015_v60 = vshrl.u32 %v6094_v39, 16  ;;  %v9848_v45 = vrot.slane %v9847_v13, 4  ;;  %v9857_v39 = vld [vmem:[#allocation12_spill] sm:$0xff] }
 0x131   : > { %v6452_v48 = vcombine.low %v7723_v46, %v7724_v25  ;;  %7010 = vmatprep.mubr.bf16.mxu1 %v6081_v40  ;;  %v1610_v43 = vsel %vm8264_vm2, %v1605_v31, %v1609_v59  ;;  %7235 = vmatmul.mubr.bf16.gmra.mrb[12].mxu0 %v6450_v56  ;;  %v2004_v51 = vsel %vm8447_vm5, %v6139_v20, %v9849_v52  ;;  %v2037_v14 = vshrl.u32 %v6097_v26, 16  ;;  %v9853_v59 = vld [vmem:[#allocation9_spill] sm:$0xff]  ;;  %v9856_v56 = vld [vmem:[#allocation16_spill] sm:$0xff]  ;;  %v9860_v31 = vld [vmem:[#allocation15_spill] sm:$0xff] }
 0x132   : > { %v2035_v18 = vsel %vm8447_vm5, %v9848_v45, %v9846_v1  ;;  %v9852_v12 = vshll.u32 %v9851_v62, 16  ;;  %v1615_v53 = vrot.slane %v1614_v19, 4  ;;  %v6171_v2 = vcombine.low %v2004_v51, %v2013_v32  ;;  %7238 = vmatprep.mubr.bf16.mxu0 %v6451_v58  ;;  %7267 = vmatpush3.bf16.msra.mxu0 %v7692_v11  ;;  %v6103_v5 = vld [vmem:[%s7807_s10 + $0x50] sm:$0x8]  ;;  %v9864_v1 = vld [vmem:[#allocation13_spill] sm:$0xff]  ;;  %v9866_v46 = vld [vmem:[#allocation19_spill] sm:$0xff] }
 0x133   : > { %v6140_v34 = vrot.slane %v2015_v60, 11  ;;  %v2049_v63 = vrot.slane %v9850_v0, 4  ;;  %v6141_v30 = vrot.slane %v2037_v14, 11  ;;  %v9855_v9 = vshll.u32 %v9854_v41, 16  ;;  %7268 = vmatprep.subr.bf16.mxu0 %v7695_v54  ;;  %v9861_v20 = vld [vmem:[#allocation8_spill] sm:$0xff]  ;;  %v9863_v60 = vld [vmem:[#allocation18_spill] sm:$0xff] }
 0x134   : > { %v2047_v24 = vor.u32 %v9852_v12, %v9850_v0  ;;  %v6453_v7 = vcombine.low %v8808_v8, %v8815_v38  ;;  %v2059_v35 = vshrl.u32 %v6100_v22, 16  ;;  %v1620_v27 = vsel %vm8264_vm2, %v1615_v53, %v1619_v6  ;;  %v6106_v6 = vld [vmem:[%s7807_s10 + $0x60] sm:$0x8]  ;;  %v6109_v51 = vld [vmem:[%s7807_s10 + $0x70] sm:$0x8] }
 0x135   : > { %v2056_v16 = vor.u32 %v9855_v9, %v9853_v59  ;;  %v2026_v49 = vsel %vm8447_vm5, %v6140_v34, %v9856_v56  ;;  %v9859_v11 = vshll.u32 %v9858_v4, 16  ;;  %v2071_v29 = vrot.slane %v9857_v39, 4  ;;  %v9867_v25 = vld [vmem:[#allocation14_spill] sm:$0xff] }
 0x136   : > { %v6082_v3 = vcombine.low %v1610_v43, %v1620_v27  ;;  %v6172_v32 = vcombine.low %v2026_v49, %v2035_v18  ;;  %v2048_v8 = vsel %vm8447_vm5, %v6141_v30, %v2047_v24  ;;  %v6142_v40 = vrot.slane %v2059_v35, 11  ;;  %7269 = vmatpush3.bf16.msra.mxu0 %v7695_v54  ;;  %v9869_v12 = vld [vmem:[#allocation22_spill] sm:$0xff]  ;;  %v9870_v24 = vld [vmem:[#allocation17_spill] sm:$0xff]  ;;  %v9872_v30 = vld [vmem:[#allocation24_spill] sm:$0xff] }
 0x137   : > { %v2069_v50 = vor.u32 %v9859_v11, %v9857_v39  ;;  %v2057_v38 = vsel %vm8447_vm5, %v2049_v63, %v2056_v16  ;;  %v9862_v44 = vshll.u32 %v9861_v20, 16  ;;  %v6454_v58 = vcombine.low %v8837_v23, %v8842_v61  ;;  %v6112_v41 = vld [vmem:[%s7807_s10 + $0x80] sm:$0x8]  ;;  %v9876_v27 = vld [vmem:[#allocation23_spill] sm:$0xff]  ;;  %v9160_v20 = vld [vmem:[%s7807_s10 + $0x94] sm:$0xf] }
 0x138   : > { %v6173_v26 = vcombine.low %v2048_v8, %v2057_v38  ;;  %7011 = vmatmul.mubr.bf16.gmra.mrb[28].mxu1 %v6082_v3  ;;  %v2081_v19 = vshrl.u32 %v6103_v5, 16  ;;  %v9865_v13 = vshll.u32 %v9864_v1, 16  ;;  %v2093_v18 = vrot.slane %v9863_v60, 4  ;;  %v9875_v35 = vld [vmem:[#allocation26_spill] sm:$0xff]  ;;  %v6115_v8 = vld [vmem:[%s7807_s10 + $0x90] sm:$0x8] }
 0x139   : > { %v2078_v15 = vor.u32 %v9862_v44, %v9860_v31  ;;  %v9868_v22 = vshll.u32 %v9867_v25, 16  ;;  %7030 = vmatprep.mubr.bf16.mxu1 %v6171_v2  ;;  %v2070_v52 = vsel %vm8447_vm5, %v6142_v40, %v2069_v50  ;;  %v6455_v61 = vcombine.low %v8865_v47, %v8868_v28  ;;  %7239 = vmatmul.mubr.bf16.gmra.mrb[16].mxu0 %v6452_v48  ;;  %v9873_v47 = vld [vmem:[#allocation20_spill] sm:$0xff]  ;;  %v9878_v50 = vld [vmem:[#allocation27_spill] sm:$0xff] }
 0x13a   : > { %v2091_v45 = vor.u32 %v9865_v13, %v9863_v60  ;;  %v2103_v54 = vshrl.u32 %v6106_v6, 16  ;;  %v6143_v0 = vrot.slane %v2081_v19, 11  ;;  %v9871_v53 = vshll.u32 %v9870_v24, 16  ;;  %7242 = vmatprep.mubr.bf16.mxu0 %v6453_v7  ;;  %v9882_v19 = vld [vmem:[#allocation28_spill] sm:$0xff]  ;;  %v6468_v24 = vld [vmem:[%s7807_s10 + $0x28] sm:$0xf] }
 0x13b   : > { %v2100_v43 = vor.u32 %v9868_v22, %v9866_v46  ;;  %v2079_v23 = vsel %vm8447_vm5, %v2071_v29, %v2078_v15  ;;  %v2115_v63 = vrot.slane %v9869_v12, 4  ;;  %v9874_v28 = vshll.u32 %v9873_v47, 16  ;;  %v9879_v29 = vld [vmem:[#allocation25_spill] sm:$0xff]  ;;  %v9881_v15 = vld [vmem:[#allocation30_spill] sm:$0xff] }
 0x13c   : > { %v9125_v14 = vcombine.low %v2070_v52, %v2079_v23  ;;  %v2113_v2 = vor.u32 %v9871_v53, %v9869_v12  ;;  %v6144_v34 = vrot.slane %v2103_v54, 11  ;;  %v6456_v48 = vcombine.low %v8893_v42, %v8896_v33  ;;  %v9172_v22 = vld [vmem:[%s7807_s10 + $0x98] sm:$0xf]  ;;  %v6469_v53 = vld [vmem:[%s7807_s10 + $0x2c] sm:$0x1] }
 0x13d   : > { %v2101_v62 = vsel %vm8447_vm5, %v2093_v18, %v2100_v43  ;;  %v2122_v59 = vor.u32 %v9874_v28, %v9872_v30  ;;  %v2092_v9 = vsel %vm8447_vm5, %v6143_v0, %v2091_v45  ;;  %v2125_v16 = vshrl.u32 %v6109_v51, 16  ;;  %v9884_v45 = vld [vmem:[#allocation31_spill] sm:$0xff]  ;;  %v9885_v18 = vld [vmem:[#allocation29_spill] sm:$0xff]  ;;  %v6467_v51 = vld [vmem:[%s7807_s10 + $0x24] sm:$0xf] }
 0x13e   : > { %v9877_v56 = vshll.u32 %v9876_v27, 16  ;;  %v2137_v49 = vrot.slane %v9875_v35, 4  ;;  %v9145_v39 = vcombine.low %v2092_v9, %v2101_v62  ;;  %v2114_v4 = vsel %vm8447_vm5, %v6144_v34, %v2113_v2  ;;  %v7725_v2 = vld [vmem:[%s9708_s1 + $0x108] sm:$0xff]   ;;  %v9199_v27 = vld [vmem:[%s7807_s10 + $0xa4] sm:$0xf] }
 0x13f   : > { %v2123_v11 = vsel %vm8447_vm5, %v2115_v63, %v2122_v59  ;;  %v9880_v5 = vshll.u32 %v9879_v29, 16  ;;  %v6145_v6 = vrot.slane %v2125_v16, 11  ;;  %v6457_v40 = vcombine.low %v8920_v10, %v8923_v17 }
 0x140   : > { %v2135_v7 = vor.u32 %v9877_v56, %v9875_v35  ;;  %v9155_v38 = vcombine.low %v2114_v4, %v2123_v11  ;;  %v2147_v31 = vshrl.u32 %v6112_v41, 16  ;;  %v9883_v60 = vshll.u32 %v9882_v19, 16  ;;  %7031 = vmatmul.mubr.bf16.vlgmr.msra.gmra.mrb[0].mxu1 %v6172_v32  ;;  %v6118_v41 = vld [vmem:[%s7807_s10 + $0xa0] sm:$0x8]  ;;  %v7726_v11 = vld [vmem:[%s9708_s1 + $0x110] sm:$0xff]  }
 0x141   : > { %v2144_v3 = vor.u32 %v9880_v5, %v9878_v50  ;;  %v2159_v13 = vrot.slane %v9881_v15, 4  ;;  %v9886_v46 = vshll.u32 %v9885_v18, 16  ;;  %v6458_v23 = vcombine.low %v8948_v36, %v8953_v55  ;;  %7310 = vmatpush3.bf16.msra.mxu1 %v8938_v57  ;;  %7034 = vmatprep.mubr.bf16.mxu1 %v6173_v26  ;;  %v6124_v55 = vld [vmem:[%s7807_s10 + $0xc0] sm:$0x8] }
 0x142   : > { %v2157_v1 = vor.u32 %v9883_v60, %v9881_v15  ;;  %v2136_v43 = vsel %vm8447_vm5, %v6145_v6, %v2135_v7  ;;  %v6146_v52 = vrot.slane %v2147_v31, 11  ;;  %v2169_v54 = vshrl.u32 %v6115_v8, 16  ;;  %7303 = vmatprep.subr.bf16.mxu1 %v7725_v2  ;;  %7243 = vmatmul.mubr.bf16.gmra.mrb[20].mxu0 %v6454_v58  ;;  %v6470_v15 = vld [vmem:[%s7807_s10 + $0x34] sm:$0xf] }
 0x143   : > { %v2145_v44 = vsel %vm8447_vm5, %v2137_v49, %v2144_v3  ;;  %v2166_v25 = vor.u32 %v9886_v46, %v9884_v45  ;;  %v2174_v12 = vshrl.u32 %v9160_v20, 16  ;;  %v2177_v32 = vshll.u32 %v9160_v20, 16  ;;  %7246 = vmatprep.mubr.bf16.mxu0 %v6455_v61  ;;  %v9202_v61 = vld [vmem:[%s7807_s10 + $0xa8] sm:$0xf] }
 0x144   : > { %v9180_v0 = vcombine.low %v2136_v43, %v2145_v44  ;;  %v2158_v57 = vsel %vm8447_vm5, %v6146_v52, %v2157_v1  ;;  %v6147_v26 = vrot.slane %v2169_v54, 11  ;;  %v2183_v34 = vshrl.u32 %v9172_v22, 16  ;;  %v6471_v43 = vld [vmem:[%s7807_s10 + $0x38] sm:$0xf] }
 0x145   : > { %v2167_v62 = vsel %vm8447_vm5, %v2159_v13, %v2166_v25  ;;  %v2186_v63 = vshll.u32 %v9172_v22, 16  ;;  %v2176_v47 = vrot.slane %v2174_v12, 7  ;;  %v4900_v28 = vshrl.u32 %v6467_v51, 16  ;;  %7311 = vmatpush3.bf16.msra.mxu1 %v7725_v2 }
 0x146   : > { %v9195_v30 = vcombine.low %v2158_v57, %v2167_v62  ;;  %v4903_v59 = vshll.u32 %v6467_v51, 16  ;;  %v2185_v9 = vrot.slane %v2183_v34, 7  ;;  %v4909_v16 = vshll.u32 %v6468_v24, 16  ;;  %7304 = vmatprep.subr.bf16.mxu1 %v7726_v11 }
 0x147   : > { %v4913_v35 = vshrl.u32 %v6468_v24, 16  ;;  %v4919_v58 = vshll.u32 %v6469_v53, 16  ;;  %v2179_v56 = vor.u32 %v2177_v32, %v2176_v47  ;;  %v2181_v7 = vrot.slane %v2176_v47, 4  ;;  %v6121_v32 = vld [vmem:[%s7807_s10 + $0xb0] sm:$0x8] }
 0x148   : > { %v4902_v49 = vrot.slane %v4900_v28, 4  ;;  %v4905_v4 = vrot.slane %v4903_v59, 5  ;;  %v2188_v50 = vor.u32 %v2186_v63, %v2185_v9  ;;  %v4911_v29 = vrot.slane %v4909_v16, 5  ;;  %7035 = vmatmul.mubr.bf16.gmra.mrb[4].mxu1 %v9125_v14  ;;  %v7727_v14 = vld [vmem:[%s9708_s1 + $0x118] sm:$0xff]   ;;  %v7728_v28 = vld [vmem:[%s9708_s1 + $0x120] sm:$0xff]  }
 0x149   : > { %v4915_v5 = vrot.slane %v4913_v35, 4  ;;  %v4921_v3 = vrot.slane %v4919_v58, 5  ;;  %v2180_v8 = vsel %vm8447_vm5, %v6147_v26, %v2179_v56  ;;  %v2191_v31 = vshrl.u32 %v6118_v41, 16  ;;  %7038 = vmatprep.mubr.bf16.mxu1 %v9145_v39  ;;  %7312 = vmatpush3.bf16.msra.mxu1 %v7726_v11  ;;  %v9237_v26 = vld [vmem:[%s7807_s10 + $0xb4] sm:$0xf] }
 0x14a   : > { %v4906_v6 = vor.u32 %v4905_v4, %v4902_v49  ;;  %v2196_v44 = vshrl.u32 %v9199_v27, 16  ;;  %v2189_v19 = vsel %vm8447_vm5, %v2181_v7, %v2188_v50  ;;  %v2199_v1 = vshll.u32 %v9199_v27, 16  ;;  %7247 = vmatmul.mubr.bf16.gmra.mrb[24].mxu0 %v6456_v48  ;;  %7305 = vmatprep.subr.bf16.mxu1 %v7727_v14  ;;  %v6472_v48 = vld [vmem:[%s7807_s10 + $0x3c] sm:$0x1]  ;;  %v9242_v63 = vld [vmem:[%s7807_s10 + $0xb8] sm:$0xf] }
 0x14b   : > { %v4916_v60 = vor.u32 %v4915_v5, %v4911_v29  ;;  %v2205_v13 = vshrl.u32 %v9202_v61, 16  ;;  %v9217_v45 = vcombine.low %v2180_v8, %v2189_v19  ;;  %v6148_v46 = vrot.slane %v2191_v31, 11  ;;  %7250 = vmatprep.mubr.bf16.mxu0 %v6457_v40  ;;  %v6473_v7 = vld [vmem:[%s7807_s10 + $0x44] sm:$0xf]  ;;  %v6474_v49 = vld [vmem:[%s7807_s10 + $0x48] sm:$0xf] }
 0x14c   : > { %v4907_v18 = vrot.slane %v4906_v6, 4  ;;  %v2198_v25 = vrot.slane %v2196_v44, 7  ;;  %v2208_v54 = vshll.u32 %v9202_v61, 16  ;;  %v4924_v51 = vshrl.u32 %v6470_v15, 16  ;;  %v6475_v31 = vld [vmem:[%s7807_s10 + $0x4c] sm:$0x1] }
 0x14d   : > { %v4917_v39 = vrot.slane %v4916_v60, 4  ;;  %v2207_v52 = vrot.slane %v2205_v13, 7  ;;  %v4927_v12 = vshll.u32 %v6470_v15, 16  ;;  %v4933_v57 = vshll.u32 %v6471_v43, 16  ;;  %7313 = vmatpush3.bf16.msra.mxu1 %v7727_v14 }
 0x14e   : > { %v4912_v62 = vsel %vm8264_vm2, %v4907_v18, %v4911_v29  ;;  %v2201_v42 = vor.u32 %v2199_v1, %v2198_v25  ;;  %v2203_v33 = vrot.slane %v2198_v25, 4  ;;  %v4926_v2 = vrot.slane %v4924_v51, 4  ;;  %7306 = vmatprep.subr.bf16.mxu1 %v7728_v28  ;;  %v9277_v51 = vld [vmem:[%s7807_s10 + $0xc8] sm:$0xf] }
 0x14f   : > { %v4922_v24 = vsel %vm8264_vm2, %v4917_v39, %v4921_v3  ;;  %v2210_v53 = vor.u32 %v2208_v54, %v2207_v52  ;;  %v4929_v40 = vrot.slane %v4927_v12, 5  ;;  %v4937_v34 = vshrl.u32 %v6471_v43, 16  ;;  %v9270_v43 = vld [vmem:[%s7807_s10 + $0xc4] sm:$0xf]  ;;  %v6476_v12 = vld [vmem:[%s7807_s10 + $0x54] sm:$0xf] }
 0x150   : > { %v6531_v10 = vcombine.low %v4912_v62, %v4922_v24  ;;  %v2202_v17 = vsel %vm8447_vm5, %v6148_v46, %v2201_v42  ;;  %v4935_v59 = vrot.slane %v4933_v57, 5  ;;  %v4943_v41 = vshll.u32 %v6472_v48, 16  ;;  %7039 = vmatmul.mubr.bf16.gmra.mrb[8].mxu1 %v9155_v38 }
 0x151   : > { %v2211_v47 = vsel %vm8447_vm5, %v2203_v33, %v2210_v53  ;;  %v2213_v9 = vshrl.u32 %v6121_v32, 16  ;;  %v4930_v35 = vor.u32 %v4929_v40, %v4926_v2  ;;  %v4939_v58 = vrot.slane %v4937_v34, 4  ;;  %7042 = vmatprep.mubr.bf16.mxu1 %v9180_v0  ;;  %7314 = vmatpush3.bf16.msra.mxu1 %v7728_v28  ;;  %v7729_v0 = vld [vmem:[%s9708_s1 + $0x128] sm:$0xff]   ;;  %v7730_v32 = vld [vmem:[%s9708_s1 + $0x130] sm:$0xff]  }
 0x152   : > { %v9249_v16 = vcombine.low %v2202_v17, %v2211_v47  ;;  %v2218_v56 = vshrl.u32 %v9237_v26, 16  ;;  %v4945_v4 = vrot.slane %v4943_v41, 5  ;;  %v2221_v50 = vshll.u32 %v9237_v26, 16  ;;  %7251 = vmatmul.mubr.bf16.gmra.mrb[28].mxu0 %v6458_v23  ;;  %7307 = vmatprep.subr.bf16.mxu1 %v7729_v0 }
 0x153   : > { %v6149_v11 = vrot.slane %v2213_v9, 11  ;;  %v2227_v29 = vshrl.u32 %v9242_v63, 16  ;;  %v4931_v5 = vrot.slane %v4930_v35, 4  ;;  %v4940_v3 = vor.u32 %v4939_v58, %v4935_v59  ;;  %7270 = vmatprep.mubr.bf16.mxu0 %v6531_v10  ;;  %v6477_v10 = vld [vmem:[%s7807_s10 + $0x58] sm:$0xf] }
 0x154   : > { %v2220_v8 = vrot.slane %v2218_v56, 7  ;;  %v2230_v6 = vshll.u32 %v9242_v63, 16  ;;  %v4948_v44 = vshrl.u32 %v6473_v7, 16  ;;  %v4951_v15 = vshll.u32 %v6473_v7, 16  ;;  %v6478_v9 = vld [vmem:[%s7807_s10 + $0x5c] sm:$0x1] }
 0x155   : > { %v2229_v38 = vrot.slane %v2227_v29, 7  ;;  %v4957_v19 = vshll.u32 %v6474_v49, 16  ;;  %v4936_v60 = vsel %vm8264_vm2, %v4931_v5, %v4935_v59  ;;  %v4941_v1 = vrot.slane %v4940_v3, 4  ;;  %7315 = vmatpush3.bf16.msra.mxu1 %v7729_v0 }
 0x156   : > { %v2223_v13 = vor.u32 %v2221_v50, %v2220_v8  ;;  %v2225_v36 = vrot.slane %v2220_v8, 4  ;;  %v4950_v18 = vrot.slane %v4948_v44, 4  ;;  %v4953_v46 = vrot.slane %v4951_v15, 5  ;;  %7308 = vmatprep.subr.bf16.mxu1 %v7730_v32 }
 0x157   : > { %v2232_v23 = vor.u32 %v2230_v6, %v2229_v38  ;;  %v4959_v25 = vrot.slane %v4957_v19, 5  ;;  %v4946_v14 = vsel %vm8264_vm2, %v4941_v1, %v4945_v4  ;;  %v4961_v52 = vshrl.u32 %v6474_v49, 16  ;;  %v6127_v49 = vld [vmem:[%s7807_s10 + $0xd0] sm:$0x8]  ;;  %v9300_v38 = vld [vmem:[%s7807_s10 + $0xd4] sm:$0xf] }
 0x158   : > { %v2224_v39 = vsel %vm8447_vm5, %v6149_v11, %v2223_v13  ;;  %v4967_v54 = vshll.u32 %v6475_v31, 16  ;;  %v6532_v62 = vcombine.low %v4936_v60, %v4946_v14  ;;  %v4954_v33 = vor.u32 %v4953_v46, %v4950_v18  ;;  %7043 = vmatmul.mubr.bf16.gmra.mrb[12].mxu1 %v9195_v30  ;;  %v9307_v19 = vld [vmem:[%s7807_s10 + $0xd8] sm:$0xf]  ;;  %v6480_v14 = vld [vmem:[%s7807_s10 + $0x68] sm:$0xf] }
 0x159   : > { %v2233_v42 = vsel %vm8447_vm5, %v2225_v36, %v2232_v23  ;;  %v2235_v48 = vshrl.u32 %v6124_v55, 16  ;;  %v4963_v53 = vrot.slane %v4961_v52, 4  ;;  %v2240_v57 = vshrl.u32 %v9270_v43, 16  ;;  %7046 = vmatprep.mubr.bf16.mxu1 %v9217_v45  ;;  %7316 = vmatpush3.bf16.msra.mxu1 %v7730_v32  ;;  %v7731_v45 = vld [vmem:[%s9708_s1 + $0x138] sm:$0xff]   ;;  %v6479_v55 = vld [vmem:[%s7807_s10 + $0x64] sm:$0xf] }
 0x15a   : > { %v6181_v24 = vcombine.low %v2224_v39, %v2233_v42  ;;  %v4969_v2 = vrot.slane %v4967_v54, 5  ;;  %v4955_v17 = vrot.slane %v4954_v33, 4  ;;  %v2243_v34 = vshll.u32 %v9270_v43, 16  ;;  %7271 = vmatmul.mubr.bf16.vlgmr.msra.gmra.mrb[0].mxu0 %v6532_v62  ;;  %7309 = vmatprep.subr.bf16.mxu1 %v7731_v45 }
 0x15b   : > { %v6150_v40 = vrot.slane %v2235_v48, 11  ;;  %v2249_v47 = vshrl.u32 %v9277_v51, 16  ;;  %v4964_v28 = vor.u32 %v4963_v53, %v4959_v25  ;;  %v2242_v59 = vrot.slane %v2240_v57, 7  ;;  %v6481_v48 = vld [vmem:[%s7807_s10 + $0x6c] sm:$0x1] }
 0x15c   : > { %v2252_v41 = vshll.u32 %v9277_v51, 16  ;;  %v4972_v35 = vshrl.u32 %v6476_v12, 16  ;;  %v4960_v30 = vsel %vm8264_vm2, %v4955_v17, %v4959_v25  ;;  %v4975_v56 = vshll.u32 %v6476_v12, 16 }
 0x15d   : > { %v2251_v58 = vrot.slane %v2249_v47, 7  ;;  %v4981_v7 = vshll.u32 %v6477_v10, 16  ;;  %v4965_v4 = vrot.slane %v4964_v28, 4  ;;  %v2245_v11 = vor.u32 %v2243_v34, %v2242_v59  ;;  %7317 = vmatpush3.bf16.msra.mxu1 %v7731_v45 }
 0x15e   : > { %v2247_v50 = vrot.slane %v2242_v59, 4  ;;  %v4974_v29 = vrot.slane %v4972_v35, 4  ;;  %v4977_v3 = vrot.slane %v4975_v56, 5  ;;  %v4985_v6 = vshrl.u32 %v6477_v10, 16  ;;  %v6130_v10 = vld [vmem:[%s7807_s10 + $0xe0] sm:$0x8] }
 0x15f   : > { %v2254_v5 = vor.u32 %v2252_v41, %v2251_v58  ;;  %v4983_v8 = vrot.slane %v4981_v7, 5  ;;  %v4970_v31 = vsel %vm8264_vm2, %v4965_v4, %v4969_v2  ;;  %v2246_v44 = vsel %vm8447_vm5, %v6150_v40, %v2245_v11  ;;  %v9330_v7 = vld [vmem:[%s7807_s10 + $0xe8] sm:$0xf] }
 0x160   : > { %v4991_v15 = vshll.u32 %v6478_v9, 16  ;;  %v2257_v0 = vshrl.u32 %v6127_v49, 16  ;;  %v6533_v60 = vcombine.low %v4960_v30, %v4970_v31  ;;  %v4978_v13 = vor.u32 %v4977_v3, %v4974_v29  ;;  %7047 = vmatmul.mubr.bf16.gmra.mrb[16].mxu1 %v9249_v16 }
 0x161   : > { %v2255_v1 = vsel %vm8447_vm5, %v2247_v50, %v2254_v5  ;;  %v4987_v36 = vrot.slane %v4985_v6, 4  ;;  %v2262_v25 = vshrl.u32 %v9300_v38, 16  ;;  %v2265_v54 = vshll.u32 %v9300_v38, 16  ;;  %7050 = vmatprep.mubr.bf16.mxu1 %v6181_v24  ;;  %v9323_v24 = vld [vmem:[%s7807_s10 + $0xe4] sm:$0xf] }
 0x162   : > { %v6182_v23 = vcombine.low %v2246_v44, %v2255_v1  ;;  %v4993_v18 = vrot.slane %v4991_v15, 5  ;;  %v6151_v46 = vrot.slane %v2257_v0, 11  ;;  %7274 = vmatprep.mubr.bf16.mxu0 %v6533_v60  ;;  %v4979_v39 = vrot.slane %v4978_v13, 4  ;;  %v6482_v50 = vld [vmem:[%s7807_s10 + $0x74] sm:$0xf] }
 0x163   : > { %v4988_v52 = vor.u32 %v4987_v36, %v4983_v8  ;;  %v2271_v62 = vshrl.u32 %v9307_v19, 16  ;;  %v2264_v42 = vrot.slane %v2262_v25, 7  ;;  %v2274_v33 = vshll.u32 %v9307_v19, 16  ;;  %v6483_v0 = vld [vmem:[%s7807_s10 + $0x78] sm:$0xf] }
 0x164   : > { %v4996_v12 = vshrl.u32 %v6479_v55, 16  ;;  %v4999_v32 = vshll.u32 %v6479_v55, 16  ;;  %v4984_v53 = vsel %vm8264_vm2, %v4979_v39, %v4983_v8  ;;  %v5005_v57 = vshll.u32 %v6480_v14, 16  ;;  %v6484_v13 = vld [vmem:[%s7807_s10 + $0x7c] sm:$0x1] }
 0x165   : > { %v4989_v16 = vrot.slane %v4988_v52, 4  ;;  %v2273_v2 = vrot.slane %v2271_v62, 7  ;;  %v2267_v17 = vor.u32 %v2265_v54, %v2264_v42  ;;  %v2269_v40 = vrot.slane %v2264_v42, 4  ;;  %v9345_v42 = vld [vmem:[%s7807_s10 + $0xf4] sm:$0xf] }
 0x166   : > { %v4998_v34 = vrot.slane %v4996_v12, 4  ;;  %v5001_v47 = vrot.slane %v4999_v32, 5  ;;  %v5007_v41 = vrot.slane %v5005_v57, 5  ;;  %v5009_v9 = vshrl.u32 %v6480_v14, 16  ;;  %v6133_v14 = vld [vmem:[%s7807_s10 + $0xf0] sm:$0x8] }
 0x167   : > { %v4994_v28 = vsel %vm8264_vm2, %v4989_v16, %v4993_v18  ;;  %v2276_v59 = vor.u32 %v2274_v33, %v2273_v2  ;;  %v2268_v30 = vsel %vm8447_vm5, %v6151_v46, %v2267_v17  ;;  %v5015_v56 = vshll.u32 %v6481_v48, 16 }
 0x168   : > { %v6534_v35 = vcombine.low %v4984_v53, %v4994_v28  ;;  %v5002_v58 = vor.u32 %v5001_v47, %v4998_v34  ;;  %v5011_v45 = vrot.slane %v5009_v9, 4  ;;  %v2279_v4 = vshrl.u32 %v6130_v10, 16  ;;  %7051 = vmatmul.mubr.bf16.gmra.mrb[20].mxu1 %v6182_v23  ;;  %v9352_v10 = vld [vmem:[%s7807_s10 + $0xf8] sm:$0xf]  ;;  %v6485_v28 = vld [vmem:[%s7807_s10 + $0x84] sm:$0xf] }
 0x169   : > { %v2277_v49 = vsel %vm8447_vm5, %v2269_v40, %v2276_v59  ;;  %v2284_v11 = vshrl.u32 %v9323_v24, 16  ;;  %v5017_v3 = vrot.slane %v5015_v56, 5  ;;  %v2287_v8 = vshll.u32 %v9323_v24, 16 }
 0x16a   : > { %7275 = vmatmul.mubr.bf16.gmra.mrb[4].mxu0 %v6534_v35  ;;  %v6183_v29 = vcombine.low %v2268_v30, %v2277_v49  ;;  %v5003_v5 = vrot.slane %v5002_v58, 4  ;;  %v5012_v6 = vor.u32 %v5011_v45, %v5007_v41  ;;  %v6152_v31 = vrot.slane %v2279_v4, 11  ;;  %v6486_v30 = vld [vmem:[%s7807_s10 + $0x88] sm:$0xf]  ;;  %v6487_v4 = vld [vmem:[%s7807_s10 + $0x8c] sm:$0x1] }
 0x16b   : > { %v2286_v44 = vrot.slane %v2284_v11, 7  ;;  %v2293_v15 = vshrl.u32 %v9330_v7, 16  ;;  %v2296_v1 = vshll.u32 %v9330_v7, 16  ;;  %v5020_v36 = vshrl.u32 %v6482_v50, 16 }
 0x16c   : > { %7054 = vmatprep.mubr.bf16.mxu1 %v6183_v29  ;;  %v5008_v60 = vsel %vm8264_vm2, %v5003_v5, %v5007_v41  ;;  %v5023_v55 = vshll.u32 %v6482_v50, 16  ;;  %v5013_v18 = vrot.slane %v5012_v6, 4  ;;  %v5029_v54 = vshll.u32 %v6483_v0, 16 }
 0x16d   : > { %v2289_v46 = vor.u32 %v2287_v8, %v2286_v44  ;;  %v2291_v23 = vrot.slane %v2286_v44, 4  ;;  %v2295_v25 = vrot.slane %v2293_v15, 7  ;;  %v5022_v39 = vrot.slane %v5020_v36, 4  ;;  %v9367_v15 = vld [vmem:[%s7807_s10 + $0x104] sm:$0xf] }
 0x16e   : > { %v5025_v52 = vrot.slane %v5023_v55, 5  ;;  %v5033_v62 = vshrl.u32 %v6483_v0, 16  ;;  %v5018_v33 = vsel %vm8264_vm2, %v5013_v18, %v5017_v3  ;;  %v5039_v32 = vshll.u32 %v6484_v13, 16  ;;  %v6136_v3 = vld [vmem:[%s7807_s10 + $0x100] sm:$0x8] }
 0x16f   : > { %v2290_v48 = vsel %vm8447_vm5, %v6152_v31, %v2289_v46  ;;  %v2298_v12 = vor.u32 %v2296_v1, %v2295_v25  ;;  %v6535_v53 = vcombine.low %v5008_v60, %v5018_v33  ;;  %v5031_v2 = vrot.slane %v5029_v54, 5  ;;  %v9372_v36 = vld [vmem:[%s7807_s10 + $0x108] sm:$0xf] }
 0x170   : > { %v5026_v16 = vor.u32 %v5025_v52, %v5022_v39  ;;  %v5035_v57 = vrot.slane %v5033_v62, 4  ;;  %v5041_v40 = vrot.slane %v5039_v32, 5  ;;  %v2301_v34 = vshrl.u32 %v6133_v14, 16 }
 0x171   : > { %v2299_v17 = vsel %vm8447_vm5, %v2291_v23, %v2298_v12  ;;  %v2306_v47 = vshrl.u32 %v9345_v42, 16  ;;  %7278 = vmatprep.mubr.bf16.mxu0 %v6535_v53  ;;  %v2309_v35 = vshll.u32 %v9345_v42, 16  ;;  %v2315_v49 = vshrl.u32 %v9352_v10, 16  ;;  %v6488_v12 = vld [vmem:[%s7807_s10 + $0x94] sm:$0xf] }
 0x172   : > { %v6184_v59 = vcombine.low %v2290_v48, %v2299_v17  ;;  %v5027_v41 = vrot.slane %v5026_v16, 4  ;;  %v5036_v9 = vor.u32 %v5035_v57, %v5031_v2  ;;  %v6153_v58 = vrot.slane %v2301_v34, 11  ;;  %v6489_v57 = vld [vmem:[%s7807_s10 + $0x98] sm:$0xf] }
 0x173   : > { %v2308_v56 = vrot.slane %v2306_v47, 7  ;;  %v2318_v45 = vshll.u32 %v9352_v10, 16  ;;  %v5044_v29 = vshrl.u32 %v6485_v28, 16  ;;  %v5047_v5 = vshll.u32 %v6485_v28, 16 }
 0x174   : > { %7055 = vmatmul.mubr.bf16.gmra.mrb[24].mxu1 %v6184_v59  ;;  %v5032_v11 = vsel %vm8264_vm2, %v5027_v41, %v5031_v2  ;;  %v5037_v50 = vrot.slane %v5036_v9, 4  ;;  %v2317_v31 = vrot.slane %v2315_v49, 7  ;;  %v5053_v44 = vshll.u32 %v6486_v30, 16 }
 0x175   : > { %v2311_v8 = vor.u32 %v2309_v35, %v2308_v56  ;;  %v2313_v6 = vrot.slane %v2308_v56, 4  ;;  %v5046_v60 = vrot.slane %v5044_v29, 4  ;;  %v5049_v1 = vrot.slane %v5047_v5, 5  ;;  %v6490_v56 = vld [vmem:[%s7807_s10 + $0x9c] sm:$0x1] }
 0x176   : > { %v5042_v0 = vsel %vm8264_vm2, %v5037_v50, %v5041_v40  ;;  %v5057_v13 = vshrl.u32 %v6486_v30, 16  ;;  %v2320_v46 = vor.u32 %v2318_v45, %v2317_v31  ;;  %v5055_v23 = vrot.slane %v5053_v44, 5  ;;  %v6491_v45 = vld [vmem:[%s7807_s10 + $0xa4] sm:$0xf]  ;;  %v6492_v5 = vld [vmem:[%s7807_s10 + $0xa8] sm:$0xf] }
 0x177   : > { %v6536_v55 = vcombine.low %v5032_v11, %v5042_v0  ;;  %v2312_v18 = vsel %vm8447_vm5, %v6153_v58, %v2311_v8  ;;  %v5050_v25 = vor.u32 %v5049_v1, %v5046_v60  ;;  %v5063_v39 = vshll.u32 %v6487_v4, 16 }
 0x178   : > { %v5059_v14 = vrot.slane %v5057_v13, 4  ;;  %v2323_v52 = vshrl.u32 %v6136_v3, 16  ;;  %v2321_v54 = vsel %vm8447_vm5, %v2313_v6, %v2320_v46  ;;  %v2328_v62 = vshrl.u32 %v9367_v15, 16  ;;  %v6493_v13 = vld [vmem:[%s7807_s10 + $0xac] sm:$0x1] }
 0x179   : > { %7279 = vmatmul.mubr.bf16.gmra.mrb[8].mxu0 %v6536_v55  ;;  %v2331_v33 = vshll.u32 %v9367_v15, 16  ;;  %v2337_v48 = vshrl.u32 %v9372_v36, 16  ;;  %v6185_v32 = vcombine.low %v2312_v18, %v2321_v54  ;;  %v5051_v53 = vrot.slane %v5050_v25, 4 }
 0x17a   : > { %v5060_v16 = vor.u32 %v5059_v14, %v5055_v23  ;;  %v5065_v2 = vrot.slane %v5063_v39, 5  ;;  %v6154_v17 = vrot.slane %v2323_v52, 11  ;;  %v2330_v40 = vrot.slane %v2328_v62, 7  ;;  %v6494_v52 = vld [vmem:[%s7807_s10 + $0xb4] sm:$0xf] }
 0x17b   : > { %v2339_v34 = vrot.slane %v2337_v48, 7  ;;  %v2340_v47 = vshll.u32 %v9372_v36, 16  ;;  %7058 = vmatprep.mubr.bf16.mxu1 %v6185_v32  ;;  %v5056_v28 = vsel %vm8264_vm2, %v5051_v53, %v5055_v23  ;;  %v5068_v41 = vshrl.u32 %v6488_v12, 16 }
 0x17c   : > { %v5061_v59 = vrot.slane %v5060_v16, 4  ;;  %v5071_v9 = vshll.u32 %v6488_v12, 16  ;;  %v2333_v35 = vor.u32 %v2331_v33, %v2330_v40  ;;  %v2335_v30 = vrot.slane %v2330_v40, 4  ;;  %v6495_v12 = vld [vmem:[%s7807_s10 + $0xb8] sm:$0xf] }
 0x17d   : > { %v2342_v58 = vor.u32 %v2340_v47, %v2339_v34  ;;  %v5077_v49 = vshll.u32 %v6489_v57, 16  ;;  %v5070_v11 = vrot.slane %v5068_v41, 4  ;;  %v5081_v29 = vshrl.u32 %v6489_v57, 16  ;;  %v6496_v57 = vld [vmem:[%s7807_s10 + $0xbc] sm:$0x1] }
 0x17e   : > { %v5066_v4 = vsel %vm8264_vm2, %v5061_v59, %v5065_v2  ;;  %v5073_v50 = vrot.slane %v5071_v9, 5  ;;  %v2334_v8 = vsel %vm8447_vm5, %v6154_v17, %v2333_v35  ;;  %v5087_v1 = vshll.u32 %v6490_v56, 16  ;;  %v6497_v41 = vld [vmem:[%s7807_s10 + $0xc4] sm:$0xf] }
 0x17f   : > { %v6537_v3 = vcombine.low %v5056_v28, %v5066_v4  ;;  %v2343_v6 = vsel %vm8447_vm5, %v2335_v30, %v2342_v58  ;;  %v5079_v31 = vrot.slane %v5077_v49, 5  ;;  %v5083_v60 = vrot.slane %v5081_v29, 4  ;;  %v6499_v29 = vld [vmem:[%s7807_s10 + $0xcc] sm:$0x1] }
 0x180   : > { %v6186_v44 = vcombine.low %v2334_v8, %v2343_v6  ;;  %v5074_v0 = vor.u32 %v5073_v50, %v5070_v11  ;;  %v6219_v55 = vcombine.low %v9160_v20, %v9172_v22  ;;  %v5092_v18 = vshrl.u32 %v6491_v45, 16 }
 0x181   : > { %7282 = vmatprep.mubr.bf16.mxu0 %v6537_v3  ;;  %v5095_v46 = vshll.u32 %v6491_v45, 16  ;;  %v5101_v23 = vshll.u32 %v6492_v5, 16  ;;  %v5084_v14 = vor.u32 %v5083_v60, %v5079_v31  ;;  %v5089_v37 = vrot.slane %v5087_v1, 5  ;;  %v6498_v45 = vld [vmem:[%s7807_s10 + $0xc8] sm:$0xf] }
 0x182   : > { %7059 = vmatmul.mubr.bf16.gmra.mrb[28].mxu1 %v6186_v44  ;;  %v5075_v25 = vrot.slane %v5074_v0, 4  ;;  %v5105_v39 = vshrl.u32 %v6492_v5, 16  ;;  %v5094_v54 = vrot.slane %v5092_v18, 4  ;;  %v5111_v48 = vshll.u32 %v6493_v13, 16  ;;  %v6500_v44 = vld [vmem:[%s7807_s10 + $0xd4] sm:$0xf] }
 0x183   : > { %7094 = vmatprep.mubr.bf16.mxu1 %v6219_v55  ;;  %v5097_v62 = vrot.slane %v5095_v46, 5  ;;  %v5103_v33 = vrot.slane %v5101_v23, 5  ;;  %v5085_v22 = vrot.slane %v5084_v14, 4  ;;  %v6220_v53 = vcombine.low %v9199_v27, %v9202_v61  ;;  %v6501_v46 = vld [vmem:[%s7807_s10 + $0xd8] sm:$0xf] }
 0x184   : > { %v5080_v20 = vsel %vm8264_vm2, %v5075_v25, %v5079_v31  ;;  %v5107_v32 = vrot.slane %v5105_v39, 4  ;;  %v5113_v2 = vrot.slane %v5111_v48, 5  ;;  %v5116_v17 = vshrl.u32 %v6494_v52, 16  ;;  %v6503_v48 = vld [vmem:[%s7807_s10 + $0xe4] sm:$0xf] }
 0x185   : > { %v5098_v16 = vor.u32 %v5097_v62, %v5094_v54  ;;  %v5119_v40 = vshll.u32 %v6494_v52, 16  ;;  %v5090_v34 = vsel %vm8264_vm2, %v5085_v22, %v5089_v37  ;;  %v5125_v28 = vshll.u32 %v6495_v12, 16  ;;  %v6502_v37 = vld [vmem:[%s7807_s10 + $0xdc] sm:$0x1] }
 0x186   : > { %v5108_v47 = vor.u32 %v5107_v32, %v5103_v33  ;;  %v5129_v59 = vshrl.u32 %v6495_v12, 16  ;;  %v6538_v9 = vcombine.low %v5080_v20, %v5090_v34  ;;  %v5118_v30 = vrot.slane %v5116_v17, 4  ;;  %v6505_v34 = vld [vmem:[%s7807_s10 + $0xec] sm:$0x1] }
 0x187   : > { %v5099_v35 = vrot.slane %v5098_v16, 4  ;;  %v5121_v58 = vrot.slane %v5119_v40, 5  ;;  %v5127_v27 = vrot.slane %v5125_v28, 5  ;;  %v5135_v49 = vshll.u32 %v6496_v57, 16 }
 0x188   : > { %v5109_v56 = vrot.slane %v5108_v47, 4  ;;  %v5131_v61 = vrot.slane %v5129_v59, 4  ;;  %7283 = vmatmul.mubr.bf16.gmra.mrb[12].mxu0 %v6538_v9  ;;  %v6221_v50 = vcombine.low %v9237_v26, %v9242_v63  ;;  %v5140_v5 = vshrl.u32 %v6497_v41, 16 }
 0x189   : > { %v5104_v4 = vsel %vm8264_vm2, %v5099_v35, %v5103_v33  ;;  %v5122_v11 = vor.u32 %v5121_v58, %v5118_v30  ;;  %v5137_v6 = vrot.slane %v5135_v49, 5  ;;  %v5143_v31 = vshll.u32 %v6497_v41, 16  ;;  %v6506_v49 = vld [vmem:[%s7807_s10 + $0xf4] sm:$0xf] }
 0x18a   : > { %v5114_v3 = vsel %vm8264_vm2, %v5109_v56, %v5113_v2  ;;  %7095 = vmatmul.mubr.bf16.vlgmr.msra.gmra.mrb[16].mxu1 %v6220_v53  ;;  %v5132_v8 = vor.u32 %v5131_v61, %v5127_v27  ;;  %v5142_v1 = vrot.slane %v5140_v5, 4  ;;  %v5149_v13 = vshll.u32 %v6498_v45, 16 }
 0x18b   : > { %v6539_v0 = vcombine.low %v5104_v4, %v5114_v3  ;;  %v5123_v60 = vrot.slane %v5122_v11, 4  ;;  %7098 = vmatprep.mubr.bf16.mxu1 %v6221_v50  ;;  %v5145_v26 = vrot.slane %v5143_v31, 5  ;;  %v5153_v63 = vshrl.u32 %v6498_v45, 16 }
 0x18c   : > { %v5133_v55 = vrot.slane %v5132_v8, 4  ;;  %v5159_v18 = vshll.u32 %v6499_v29, 16  ;;  %v5151_v25 = vrot.slane %v5149_v13, 5  ;;  %v6222_v14 = vcombine.low %v9270_v43, %v9277_v51  ;;  %v6504_v43 = vld [vmem:[%s7807_s10 + $0xe8] sm:$0xf] }
 0x18d   : > { %7286 = vmatprep.mubr.bf16.mxu0 %v6539_v0  ;;  %v5128_v23 = vsel %vm8264_vm2, %v5123_v60, %v5127_v27  ;;  %v5164_v39 = vshrl.u32 %v6500_v44, 16  ;;  %v5146_v54 = vor.u32 %v5145_v26, %v5142_v1  ;;  %v5155_v62 = vrot.slane %v5153_v63, 4  ;;  %v6507_v29 = vld [vmem:[%s7807_s10 + $0xf8] sm:$0xf]  ;;  %v6508_v0 = vld [vmem:[%s7807_s10 + $0xfc] sm:$0x1] }
 0x18e   : > { %v5138_v52 = vsel %vm8264_vm2, %v5133_v55, %v5137_v6  ;;  %v5161_v33 = vrot.slane %v5159_v18, 5  ;;  %v5167_v22 = vshll.u32 %v6500_v44, 16  ;;  %v5173_v32 = vshll.u32 %v6501_v46, 16  ;;  %v6509_v18 = vld [vmem:[%s7807_s10 + $0x104] sm:$0xf] }
 0x18f   : > { %v6540_v12 = vcombine.low %v5128_v23, %v5138_v52  ;;  %v5166_v20 = vrot.slane %v5164_v39, 4  ;;  %v5147_v53 = vrot.slane %v5146_v54, 4  ;;  %v5156_v16 = vor.u32 %v5155_v62, %v5151_v25  ;;  %v6510_v52 = vld [vmem:[%s7807_s10 + $0x108] sm:$0xf] }
 0x190   : > { %v5177_v2 = vshrl.u32 %v6501_v46, 16  ;;  %v5183_v57 = vshll.u32 %v6502_v37, 16  ;;  %v5169_v51 = vrot.slane %v5167_v22, 5  ;;  %v5175_v17 = vrot.slane %v5173_v32, 5 }
 0x191   : > { %7287 = vmatmul.mubr.bf16.gmra.mrb[16].mxu0 %v6540_v12  ;;  %v6223_v40 = vcombine.low %v9300_v38, %v9307_v19  ;;  %v5188_v47 = vshrl.u32 %v6503_v48, 16  ;;  %v5152_v28 = vsel %vm8264_vm2, %v5147_v53, %v5151_v25  ;;  %v5157_v59 = vrot.slane %v5156_v16, 4  ;;  %v6512_v16 = vld [vmem:[%s7807_s10 + $0x114] sm:$0xf] }
 0x192   : > { %7099 = vmatmul.mubr.bf16.gmra.mrb[20].mxu1 %v6222_v14  ;;  %v5179_v41 = vrot.slane %v5177_v2, 4  ;;  %v5185_v9 = vrot.slane %v5183_v57, 5  ;;  %v5170_v35 = vor.u32 %v5169_v51, %v5166_v20  ;;  %v5191_v58 = vshll.u32 %v6503_v48, 16  ;;  %v6511_v48 = vld [vmem:[%s7807_s10 + $0x10c] sm:$0x1] }
 0x193   : > { %7102 = vmatprep.mubr.bf16.mxu1 %v6223_v40  ;;  %v5190_v30 = vrot.slane %v5188_v47, 4  ;;  %v5197_v56 = vshll.u32 %v6504_v43, 16  ;;  %v5162_v27 = vsel %vm8264_vm2, %v5157_v59, %v5161_v33  ;;  %v5201_v19 = vshrl.u32 %v6504_v43, 16 }
 0x194   : > { %v5180_v38 = vor.u32 %v5179_v41, %v5175_v17  ;;  %v5207_v61 = vshll.u32 %v6505_v34, 16  ;;  %v6541_v45 = vcombine.low %v5152_v28, %v5162_v27  ;;  %v5171_v4 = vrot.slane %v5170_v35, 4  ;;  %v6514_v41 = vld [vmem:[%s7807_s10 + $0x11c] sm:$0x1] }
 0x195   : > { %v5193_v11 = vrot.slane %v5191_v58, 5  ;;  %v5199_v50 = vrot.slane %v5197_v56, 5  ;;  %v5203_v3 = vrot.slane %v5201_v19, 4  ;;  %v6224_v6 = vcombine.low %v9323_v24, %v9330_v7 }
 0x196   : > { %v5181_v5 = vrot.slane %v5180_v38, 4  ;;  %v5209_v8 = vrot.slane %v5207_v61, 5  ;;  %7290 = vmatprep.mubr.bf16.mxu0 %v6541_v45  ;;  %v5176_v31 = vsel %vm8264_vm2, %v5171_v4, %v5175_v17  ;;  %v5212_v60 = vshrl.u32 %v6506_v49, 16 }
 0x197   : > { %v5194_v44 = vor.u32 %v5193_v11, %v5190_v30  ;;  %v5215_v1 = vshll.u32 %v6506_v49, 16  ;;  %v5204_v55 = vor.u32 %v5203_v3, %v5199_v50  ;;  %v5221_v26 = vshll.u32 %v6507_v29, 16 }
 0x198   : > { %v5186_v13 = vsel %vm8264_vm2, %v5181_v5, %v5185_v9  ;;  %v5225_v63 = vshrl.u32 %v6507_v29, 16  ;;  %v5214_v24 = vrot.slane %v5212_v60, 4  ;;  %v5231_v39 = vshll.u32 %v6508_v0, 16 }
 0x199   : > { %v6542_v46 = vcombine.low %v5176_v31, %v5186_v13  ;;  %v5195_v23 = vrot.slane %v5194_v44, 4  ;;  %v5217_v7 = vrot.slane %v5215_v1, 5  ;;  %v5205_v25 = vrot.slane %v5204_v55, 4 }
 0x19a   : > { %7103 = vmatmul.mubr.bf16.gmra.mrb[24].mxu1 %v6224_v6  ;;  %v5223_v14 = vrot.slane %v5221_v26, 5  ;;  %v5227_v37 = vrot.slane %v5225_v63, 4  ;;  %v6225_v33 = vcombine.low %v9345_v42, %v9352_v10  ;;  %v5236_v12 = vshrl.u32 %v6509_v18, 16  ;;  %v6513_v10 = vld [vmem:[%s7807_s10 + $0x118] sm:$0xf] }
 0x19b   : > { %7291 = vmatmul.mubr.bf16.gmra.mrb[20].mxu0 %v6542_v46  ;;  %v5200_v54 = vsel %vm8264_vm2, %v5195_v23, %v5199_v50  ;;  %v5218_v62 = vor.u32 %v5217_v7, %v5214_v24  ;;  %v5210_v20 = vsel %vm8264_vm2, %v5205_v25, %v5209_v8  ;;  %v5233_v32 = vrot.slane %v5231_v39, 5 }
 0x19c   : > { %v5228_v22 = vor.u32 %v5227_v37, %v5223_v14  ;;  %v5239_v53 = vshll.u32 %v6509_v18, 16  ;;  %v6543_v2 = vcombine.low %v5200_v54, %v5210_v20  ;;  %7106 = vmatprep.mubr.bf16.mxu1 %v6225_v33  ;;  %v5238_v43 = vrot.slane %v5236_v12, 4  ;;  %v9631_v12 = vld [vmem:[%s9709_s2] ss:$0 sm:$0xff] }
 0x19d   : > { %v5219_v57 = vrot.slane %v5218_v62, 4  ;;  %v5245_v51 = vshll.u32 %v6510_v52, 16  ;;  %v5249_v34 = vshrl.u32 %v6510_v52, 16  ;;  %v5255_v42 = vshll.u32 %v6511_v48, 16 }
 0x19e   : > { %v5229_v17 = vrot.slane %v5228_v22, 4  ;;  %v5241_v40 = vrot.slane %v5239_v53, 5  ;;  %7294 = vmatprep.mubr.bf16.mxu0 %v6543_v2  ;;  %v6226_v59 = vcombine.low %v9367_v15, %v9372_v36  ;;  %v5260_v9 = vshrl.u32 %v6512_v16, 16 }
 0x19f   : > { %v5224_v47 = vsel %vm8264_vm2, %v5219_v57, %v5223_v14  ;;  %v5247_v28 = vrot.slane %v5245_v51, 5  ;;  %v5251_v58 = vrot.slane %v5249_v34, 4  ;;  %v5257_v56 = vrot.slane %v5255_v42, 5 }
 0x1a0   : > { %v5234_v35 = vsel %vm8264_vm2, %v5229_v17, %v5233_v32  ;;  %v5242_v30 = vor.u32 %v5241_v40, %v5238_v43  ;;  %v5262_v38 = vrot.slane %v5260_v9, 4  ;;  %v5263_v19 = vshll.u32 %v6512_v16, 16 }
 0x1a1   : > { %v6544_v27 = vcombine.low %v5224_v47, %v5234_v35  ;;  %v5269_v61 = vshll.u32 %v6513_v10, 16  ;;  %v5252_v45 = vor.u32 %v5251_v58, %v5247_v28  ;;  %v5273_v4 = vshrl.u32 %v6513_v10, 16 }
 0x1a2   : > { %v5243_v49 = vrot.slane %v5242_v30, 4  ;;  %7107 = vmatmul.mubr.bf16.gmra.mrb[28].mxu1 %v6226_v59  ;;  %v5279_v11 = vshll.u32 %v6514_v41, 16  ;;  %v5265_v50 = vrot.slane %v5263_v19, 5 }
 0x1a3   : > { %7295 = vmatmul.mubr.bf16.gmra.mrb[24].mxu0 %v6544_v27  ;;  %v5271_v15 = vrot.slane %v5269_v61, 5  ;;  %v5253_v29 = vrot.slane %v5252_v45, 4  ;;  %v5275_v5 = vrot.slane %v5273_v4, 4 }
 0x1a4   : > { %v5248_v36 = vsel %vm8264_vm2, %v5243_v49, %v5247_v28  ;;  %v5266_v3 = vor.u32 %v5265_v50, %v5262_v38  ;;  %v5281_v31 = vrot.slane %v5279_v11, 5 }
 0x1a5   : > { %v5258_v8 = vsel %vm8264_vm2, %v5253_v29, %v5257_v56  ;;  %v5276_v6 = vor.u32 %v5275_v5, %v5271_v15 }
 0x1a6   : > { %v6545_v44 = vcombine.low %v5248_v36, %v5258_v8  ;;  %v5267_v0 = vrot.slane %v5266_v3, 4 }
 0x1a7   : > { %v5277_v60 = vrot.slane %v5276_v6, 4 }
 0x1a8   : > { %7298 = vmatprep.mubr.bf16.mxu0 %v6545_v44  ;;  %v5272_v1 = vsel %vm8264_vm2, %v5267_v0, %v5271_v15 }
 0x1a9   : > { %v5282_v13 = vsel %vm8264_vm2, %v5277_v60, %v5281_v31 }
 0x1aa   : > { %v6546_v55 = vcombine.low %v5272_v1, %v5282_v13 }
 0x1ac   : > { %7299 = vmatmul.mubr.bf16.gmra.mrb[28].mxu0 %v6546_v55 }
 0x213   : > { %v7032_v26 = vpop.f32.mrb[0].mxu1 }
 0x214   : > { %v2507_v63 = vpop.f32.mrb[1].mxu1 }
 0x215   : > { %v7033_v18 = vpop.f32.mrb[2].mxu1 }
 0x216   : > { %v2510_v46 = vpop.f32.mrb[3].mxu1 }
 0x21b   : > { %v7036_v23 = vpop.f32.mrb[4].mxu1 }
 0x21c   : > { %v2523_v24 = vpop.f32.mrb[5].mxu1 }
 0x21d   : > { %v7037_v7 = vpop.f32.mrb[6].mxu1 }
 0x21e   : > { %v2526_v25 = vpop.f32.mrb[7].mxu1 }
 0x223   : > { %v7040_v14 = vpop.f32.mrb[8].mxu1 }
 0x224   : > { %v2539_v37 = vpop.f32.mrb[9].mxu1 }
 0x225   : > { %v7041_v39 = vpop.f32.mrb[10].mxu1 }
 0x226   : > { %v9620_v52 = vpop.f32.mrb[11].mxu1 }
 0x22b   : > { %v9622_v54 = vpop.f32.mrb[12].mxu1 }
 0x22c   : > { %v9624_v62 = vpop.f32.mrb[13].mxu1 }
 0x22d   : > { %v9626_v33 = vpop.f32.mrb[14].mxu1  ;;  %v7272_v48 = vpop.f32.mrb[0].mxu0 }
 0x22e   : > { %v9633_v20 = vpop.f32.mrb[15].mxu1  ;;  %v7318_v22 = vadd.f32 %v7272_v48, %v7032_v26  ;;  %v5446_v32 = vpop.f32.mrb[1].mxu0 }
 0x22f   : > { %v7319_v53 = vadd.f32 %v5446_v32, %v2507_v63  ;;  %v7273_v16 = vpop.f32.mrb[2].mxu0 }
 0x230   : > { %v5614_v2 = vadd.f32 %v7318_v22, %v9631_v12  ;;  %v7320_v57 = vadd.f32 %v7273_v16, %v7033_v18  ;;  %v5449_v43 = vpop.f32.mrb[3].mxu0 }
 0x231   : > { %v5612_v51 = vadd.f32 %v7319_v53, %v9631_v12  ;;  %v7321_v17 = vadd.f32 %v5449_v43, %v2510_v46 }
 0x232   : > { %v5646_v40 = vmax.f32 %v5614_v2, 0.0  ;;  %v5615_v34 = vadd.f32 %v7320_v57, %v9631_v12 }
 0x233   : > { %v5644_v42 = vmax.f32 %v5612_v51, 0.0  ;;  %v5613_v10 = vadd.f32 %v7321_v17, %v9631_v12 }
 0x234   : > { %v6624_v47 = vpack.c.bf16 %v5646_v40, %v5646_v40  ;;  %v5647_v28 = vmax.f32 %v5615_v34, 0.0 }
 0x235   : > { %v6622_v59 = vpack.c.bf16 %v5644_v42, %v5644_v42  ;;  %v5645_v41 = vmax.f32 %v5613_v10, 0.0 }
 0x236   : > { %6590 = vst [vmem:[%s9474_s16 + $0x24] sm:$0xf] %v6624_v47  ;;  %v6625_v9 = vpack.c.bf16 %v5647_v28, %v5647_v28 }
 0x237   : > { %6588 = vst [vmem:[%s9474_s16 + $0x14] sm:$0xf] %v6622_v59  ;;  %v6623_v35 = vpack.c.bf16 %v5645_v41, %v5645_v41 }
 0x238   : > { %6591 = vst [vmem:[%s9474_s16 + $0x28] sm:$0xf] %v6625_v9 }
 0x239   : > { %6589 = vst [vmem:[%s9474_s16 + $0x18] sm:$0xf] %v6623_v35 }
 0x23d   : > { %v7276_v30 = vpop.f32.mrb[4].mxu0 }
 0x23e   : > { %v7322_v58 = vadd.f32 %v7276_v30, %v7036_v23  ;;  %v5462_v56 = vpop.f32.mrb[5].mxu0 }
 0x23f   : > { %v7323_v27 = vadd.f32 %v5462_v56, %v2523_v24  ;;  %v7277_v38 = vpop.f32.mrb[6].mxu0 }
 0x240   : > { %v5618_v19 = vadd.f32 %v7322_v58, %v9631_v12  ;;  %v7324_v61 = vadd.f32 %v7277_v38, %v7037_v7  ;;  %v5465_v49 = vpop.f32.mrb[7].mxu0 }
 0x241   : > { %v5616_v45 = vadd.f32 %v7323_v27, %v9631_v12  ;;  %v7325_v4 = vadd.f32 %v5465_v49, %v2526_v25 }
 0x242   : > { %v5650_v11 = vmax.f32 %v5618_v19, 0.0  ;;  %v5619_v50 = vadd.f32 %v7324_v61, %v9631_v12 }
 0x243   : > { %v5648_v15 = vmax.f32 %v5616_v45, 0.0  ;;  %v5617_v36 = vadd.f32 %v7325_v4, %v9631_v12 }
 0x244   : > { %v6628_v29 = vpack.c.bf16 %v5650_v11, %v5650_v11  ;;  %v5651_v5 = vmax.f32 %v5619_v50, 0.0 }
 0x245   : > { %v6626_v3 = vpack.c.bf16 %v5648_v15, %v5648_v15  ;;  %v5649_v8 = vmax.f32 %v5617_v36, 0.0 }
 0x246   : > { %6594 = vst [vmem:[%s9474_s16 + $0x44] sm:$0xf] %v6628_v29  ;;  %v6629_v6 = vpack.c.bf16 %v5651_v5, %v5651_v5 }
 0x247   : > { %6592 = vst [vmem:[%s9474_s16 + $0x34] sm:$0xf] %v6626_v3  ;;  %v6627_v31 = vpack.c.bf16 %v5649_v8, %v5649_v8 }
 0x248   : > { %6595 = vst [vmem:[%s9474_s16 + $0x48] sm:$0xf] %v6629_v6 }
 0x249   : > { %6593 = vst [vmem:[%s9474_s16 + $0x38] sm:$0xf] %v6627_v31 }
 0x24c   : > { %v7280_v44 = vpop.f32.mrb[8].mxu0 }
 0x24d   : > { %v7326_v0 = vadd.f32 %v7280_v44, %v7040_v14  ;;  %v5478_v60 = vpop.f32.mrb[9].mxu0 }
 0x24e   : > { %v7327_v1 = vadd.f32 %v5478_v60, %v2539_v37  ;;  %v7281_v13 = vpop.f32.mrb[10].mxu0 }
 0x24f   : > { %v5622_v55 = vadd.f32 %v7326_v0, %v9631_v12  ;;  %v7328_v21 = vadd.f32 %v7281_v13, %v7041_v39  ;;  %v5481_v26 = vpop.f32.mrb[11].mxu0 }
 0x250   : > { %v5620_v63 = vadd.f32 %v7327_v1, %v9631_v12  ;;  %v7329_v18 = vadd.f32 %v5481_v26, %v9620_v52 }
 0x251   : > { %v5654_v46 = vmax.f32 %v5622_v55, 0.0  ;;  %v5623_v23 = vadd.f32 %v7328_v21, %v9631_v12 }
 0x252   : > { %v5652_v24 = vmax.f32 %v5620_v63, 0.0  ;;  %v5621_v7 = vadd.f32 %v7329_v18, %v9631_v12 }
 0x253   : > { %v6632_v25 = vpack.c.bf16 %v5654_v46, %v5654_v46  ;;  %v5655_v14 = vmax.f32 %v5623_v23, 0.0 }
 0x254   : > { %v6630_v37 = vpack.c.bf16 %v5652_v24, %v5652_v24  ;;  %v5653_v48 = vmax.f32 %v5621_v7, 0.0 }
 0x255   : > { %6598 = vst [vmem:[%s9474_s16 + $0x64] sm:$0xf] %v6632_v25  ;;  %v6633_v22 = vpack.c.bf16 %v5655_v14, %v5655_v14 }
 0x256   : > { %6596 = vst [vmem:[%s9474_s16 + $0x54] sm:$0xf] %v6630_v37  ;;  %v6631_v39 = vpack.c.bf16 %v5653_v48, %v5653_v48 }
 0x257   : > { %6599 = vst [vmem:[%s9474_s16 + $0x68] sm:$0xf] %v6633_v22 }
 0x258   : > { %6597 = vst [vmem:[%s9474_s16 + $0x58] sm:$0xf] %v6631_v39 }
 0x25b   : > { %v7284_v32 = vpop.f32.mrb[12].mxu0 }
 0x25c   : > { %v7330_v53 = vadd.f32 %v7284_v32, %v9622_v54  ;;  %v5494_v52 = vpop.f32.mrb[13].mxu0 }
 0x25d   : > { %v7096_v16 = vpop.f32.mrb[16].mxu1  ;;  %v7331_v2 = vadd.f32 %v5494_v52, %v9624_v62  ;;  %v7285_v57 = vpop.f32.mrb[14].mxu0 }
 0x25e   : > { %v2925_v43 = vpop.f32.mrb[17].mxu1  ;;  %v5626_v51 = vadd.f32 %v7330_v53, %v9631_v12  ;;  %v7332_v17 = vadd.f32 %v7285_v57, %v9626_v33  ;;  %v5497_v40 = vpop.f32.mrb[15].mxu0 }
 0x25f   : > { %v7097_v34 = vpop.f32.mrb[18].mxu1  ;;  %v5624_v42 = vadd.f32 %v7331_v2, %v9631_v12  ;;  %v7333_v10 = vadd.f32 %v5497_v40, %v9633_v20 }
 0x260   : > { %v2928_v47 = vpop.f32.mrb[19].mxu1  ;;  %v5658_v54 = vmax.f32 %v5626_v51, 0.0  ;;  %v5627_v28 = vadd.f32 %v7332_v17, %v9631_v12 }
 0x261   : > { %v5656_v59 = vmax.f32 %v5624_v42, 0.0  ;;  %v5625_v62 = vadd.f32 %v7333_v10, %v9631_v12 }
 0x262   : > { %v6636_v41 = vpack.c.bf16 %v5658_v54, %v5658_v54  ;;  %v5659_v9 = vmax.f32 %v5627_v28, 0.0 }
 0x263   : > { %v6634_v35 = vpack.c.bf16 %v5656_v59, %v5656_v59  ;;  %v5657_v30 = vmax.f32 %v5625_v62, 0.0 }
 0x264   : > { %v7288_v33 = vpop.f32.mrb[16].mxu0  ;;  %6602 = vst [vmem:[%s9474_s16 + $0x84] sm:$0xf] %v6636_v41  ;;  %v6637_v58 = vpack.c.bf16 %v5659_v9, %v5659_v9 }
 0x265   : > { %v7334_v56 = vadd.f32 %v7288_v33, %v7096_v16  ;;  %v5510_v27 = vpop.f32.mrb[17].mxu0  ;;  %v7100_v20 = vpop.f32.mrb[20].mxu1  ;;  %6600 = vst [vmem:[%s9474_s16 + $0x74] sm:$0xf] %v6634_v35  ;;  %v6635_v38 = vpack.c.bf16 %v5657_v30, %v5657_v30 }
 0x266   : > { %v7335_v19 = vadd.f32 %v5510_v27, %v2925_v43  ;;  %v7289_v61 = vpop.f32.mrb[18].mxu0  ;;  %v2941_v49 = vpop.f32.mrb[21].mxu1  ;;  %6603 = vst [vmem:[%s9474_s16 + $0x88] sm:$0xf] %v6637_v58 }
 0x267   : > { %v5630_v45 = vadd.f32 %v7334_v56, %v9631_v12  ;;  %v7336_v4 = vadd.f32 %v7289_v61, %v7097_v34  ;;  %v5513_v11 = vpop.f32.mrb[19].mxu0  ;;  %v7101_v50 = vpop.f32.mrb[22].mxu1  ;;  %6601 = vst [vmem:[%s9474_s16 + $0x78] sm:$0xf] %v6635_v38 }
 0x268   : > { %v5628_v15 = vadd.f32 %v7335_v19, %v9631_v12  ;;  %v7337_v36 = vadd.f32 %v5513_v11, %v2928_v47  ;;  %v2944_v29 = vpop.f32.mrb[23].mxu1 }
 0x269   : > { %v5662_v5 = vmax.f32 %v5630_v45, 0.0  ;;  %v5631_v3 = vadd.f32 %v7336_v4, %v9631_v12 }
 0x26a   : > { %v5660_v8 = vmax.f32 %v5628_v15, 0.0  ;;  %v5629_v6 = vadd.f32 %v7337_v36, %v9631_v12 }
 0x26b   : > { %v6640_v31 = vpack.c.bf16 %v5662_v5, %v5662_v5  ;;  %v5663_v44 = vmax.f32 %v5631_v3, 0.0 }
 0x26c   : > { %v6638_v0 = vpack.c.bf16 %v5660_v8, %v5660_v8  ;;  %v5661_v60 = vmax.f32 %v5629_v6, 0.0 }
 0x26d   : > { %6606 = vst [vmem:[%s9474_s16 + $0xa4] sm:$0xf] %v6640_v31  ;;  %v6641_v1 = vpack.c.bf16 %v5663_v44, %v5663_v44  ;;  %v7104_v13 = vpop.f32.mrb[24].mxu1 }
 0x26e   : > { %6604 = vst [vmem:[%s9474_s16 + $0x94] sm:$0xf] %v6638_v0  ;;  %v6639_v55 = vpack.c.bf16 %v5661_v60, %v5661_v60  ;;  %v7292_v21 = vpop.f32.mrb[20].mxu0  ;;  %v2957_v26 = vpop.f32.mrb[25].mxu1 }
 0x26f   : > { %6607 = vst [vmem:[%s9474_s16 + $0xa8] sm:$0xf] %v6641_v1  ;;  %v7338_v63 = vadd.f32 %v7292_v21, %v7100_v20  ;;  %v5526_v18 = vpop.f32.mrb[21].mxu0  ;;  %v7105_v46 = vpop.f32.mrb[26].mxu1 }
 0x270   : > { %6605 = vst [vmem:[%s9474_s16 + $0x98] sm:$0xf] %v6639_v55  ;;  %v7339_v23 = vadd.f32 %v5526_v18, %v2941_v49  ;;  %v7293_v24 = vpop.f32.mrb[22].mxu0  ;;  %v2960_v7 = vpop.f32.mrb[27].mxu1 }
 0x271   : > { %v5634_v25 = vadd.f32 %v7338_v63, %v9631_v12  ;;  %v7340_v14 = vadd.f32 %v7293_v24, %v7101_v50  ;;  %v5529_v37 = vpop.f32.mrb[23].mxu0 }
 0x272   : > { %v5632_v48 = vadd.f32 %v7339_v23, %v9631_v12  ;;  %v7341_v22 = vadd.f32 %v5529_v37, %v2944_v29 }
 0x273   : > { %v5666_v39 = vmax.f32 %v5634_v25, 0.0  ;;  %v5635_v32 = vadd.f32 %v7340_v14, %v9631_v12 }
 0x274   : > { %v5664_v53 = vmax.f32 %v5632_v48, 0.0  ;;  %v5633_v52 = vadd.f32 %v7341_v22, %v9631_v12 }
 0x275   : > { %v6644_v16 = vpack.c.bf16 %v5666_v39, %v5666_v39  ;;  %v5667_v2 = vmax.f32 %v5635_v32, 0.0  ;;  %v7108_v57 = vpop.f32.mrb[28].mxu1 }
 0x276   : > { %v6642_v43 = vpack.c.bf16 %v5664_v53, %v5664_v53  ;;  %v5665_v51 = vmax.f32 %v5633_v52, 0.0  ;;  %v7296_v17 = vpop.f32.mrb[24].mxu0  ;;  %v2973_v40 = vpop.f32.mrb[29].mxu1 }
 0x277   : > { %6610 = vst [vmem:[%s9474_s16 + $0xc4] sm:$0xf] %v6644_v16  ;;  %v6645_v34 = vpack.c.bf16 %v5667_v2, %v5667_v2  ;;  %v7342_v42 = vadd.f32 %v7296_v17, %v7104_v13  ;;  %v5542_v10 = vpop.f32.mrb[25].mxu0  ;;  %v7109_v47 = vpop.f32.mrb[30].mxu1 }
 0x278   : > { %6608 = vst [vmem:[%s9474_s16 + $0xb4] sm:$0xf] %v6642_v43  ;;  %v6643_v54 = vpack.c.bf16 %v5665_v51, %v5665_v51  ;;  %v7343_v28 = vadd.f32 %v5542_v10, %v2957_v26  ;;  %v7297_v59 = vpop.f32.mrb[26].mxu0  ;;  %v2976_v62 = vpop.f32.mrb[31].mxu1 }
 0x279   : > { %6611 = vst [vmem:[%s9474_s16 + $0xc8] sm:$0xf] %v6645_v34  ;;  %v5638_v41 = vadd.f32 %v7342_v42, %v9631_v12  ;;  %v7344_v9 = vadd.f32 %v7297_v59, %v7105_v46  ;;  %v5545_v35 = vpop.f32.mrb[27].mxu0 }
 0x27a   : > { %6609 = vst [vmem:[%s9474_s16 + $0xb8] sm:$0xf] %v6643_v54  ;;  %v5636_v30 = vadd.f32 %v7343_v28, %v9631_v12  ;;  %v7345_v33 = vadd.f32 %v5545_v35, %v2960_v7 }
 0x27b   : > { %v5670_v58 = vmax.f32 %v5638_v41, 0.0  ;;  %v5639_v56 = vadd.f32 %v7344_v9, %v9631_v12 }
 0x27c   : > { %v5668_v27 = vmax.f32 %v5636_v30, 0.0  ;;  %v5637_v20 = vadd.f32 %v7345_v33, %v9631_v12 }
 0x27d   : > { %v6648_v38 = vpack.c.bf16 %v5670_v58, %v5670_v58  ;;  %v5671_v19 = vmax.f32 %v5639_v56, 0.0 }
 0x27e   : > { %v6646_v61 = vpack.c.bf16 %v5668_v27, %v5668_v27  ;;  %v5669_v49 = vmax.f32 %v5637_v20, 0.0 }
 0x27f   : > { %6614 = vst [vmem:[%s9474_s16 + $0xe4] sm:$0xf] %v6648_v38  ;;  %v6649_v45 = vpack.c.bf16 %v5671_v19, %v5671_v19  ;;  %v7300_v11 = vpop.f32.mrb[28].mxu0 }
 0x280   : > { %6612 = vst [vmem:[%s9474_s16 + $0xd4] sm:$0xf] %v6646_v61  ;;  %v6647_v4 = vpack.c.bf16 %v5669_v49, %v5669_v49  ;;  %v7346_v50 = vadd.f32 %v7300_v11, %v7108_v57  ;;  %v5558_v15 = vpop.f32.mrb[29].mxu0 }
 0x281   : > { %6615 = vst [vmem:[%s9474_s16 + $0xe8] sm:$0xf] %v6649_v45  ;;  %v7347_v36 = vadd.f32 %v5558_v15, %v2973_v40  ;;  %v7301_v29 = vpop.f32.mrb[30].mxu0 }
 0x282   : > { %6613 = vst [vmem:[%s9474_s16 + $0xd8] sm:$0xf] %v6647_v4  ;;  %v5642_v5 = vadd.f32 %v7346_v50, %v9631_v12  ;;  %v7348_v3 = vadd.f32 %v7301_v29, %v7109_v47  ;;  %v5561_v8 = vpop.f32.mrb[31].mxu0 }
 0x283   : > { %v5640_v6 = vadd.f32 %v7347_v36, %v9631_v12  ;;  %v7349_v31 = vadd.f32 %v5561_v8, %v2976_v62 }
 0x284   : > { %v5674_v44 = vmax.f32 %v5642_v5, 0.0  ;;  %v5643_v0 = vadd.f32 %v7348_v3, %v9631_v12 }
 0x285   : > { %v5672_v60 = vmax.f32 %v5640_v6, 0.0  ;;  %v5641_v1 = vadd.f32 %v7349_v31, %v9631_v12 }
 0x286   : > { %v6652_v13 = vpack.c.bf16 %v5674_v44, %v5674_v44  ;;  %v5675_v55 = vmax.f32 %v5643_v0, 0.0 }
 0x287   : > { %v6650_v21 = vpack.c.bf16 %v5672_v60, %v5672_v60  ;;  %v5673_v26 = vmax.f32 %v5641_v1, 0.0 }
 0x288   : > { %6618 = vst [vmem:[%s9474_s16 + $0x104] sm:$0xf] %v6652_v13  ;;  %v6653_v63 = vpack.c.bf16 %v5675_v55, %v5675_v55 }
 0x289   : > { %6616 = vst [vmem:[%s9474_s16 + $0xf4] sm:$0xf] %v6650_v21  ;;  %v6651_v18 = vpack.c.bf16 %v5673_v26, %v5673_v26 }
 0x28a   : > { %6619 = vst [vmem:[%s9474_s16 + $0x108] sm:$0xf] %v6653_v63 }
 0x28b   : > { %6617 = vst [vmem:[%s9474_s16 + $0xf8] sm:$0xf] %v6651_v18 }
 0x28c PF: > { %s13_s12 = sadd.s32 1, %s7738_s12  }
 0x28d   : > { %p10_p4 = scmp.ge.s32.totalorder %s13_s12, 4  }
 0x28f   :  { %12 = sbr.rel (!%p10_p4) target bundleno = 1 (0x1), region = 73 }

</bundles_post_ra>
